<compile_context>
chip_gen: v7x
topology: tpu7x:2x2x1
jax: 0.10.0
libtpu: 0.0.40
codegen_flags: <defaults>
</compile_context>

<pallas_src>
import jax
import jax.numpy as jnp
from jax import lax
from jax.experimental import pallas as pl
from jax.experimental.pallas import tpu as pltpu


# ----------------------------------------------------------------------------
# Fused Pallas kernel (closure over the static problem sizes)
# ----------------------------------------------------------------------------
def _make_bilstm_kernel(T, B, H, num_layers):
    """Ref layout (all whole-array VMEM, no grid):
      inputs : x2d (T*B, I)   time-major flattened (row = t*B + b)
               then per (stack, layer): wih_cat (in, 8H), whh_cat (H, 8H),
               b_cat (1, 8H)  -- [fwd | bwd] concatenated along the gate axis
      outputs: r1 (B, 4H), r2 (B, 4H)
      scratch: gx (T*B, 8H), out_a (T*B, 2H), out_b (T*B, 2H)
    Gate order inside each 4H block follows PyTorch: i, f, g, o.
    """
    G4 = 4 * H

    def kernel(*refs):
        x_ref = refs[0]
        w_refs = refs[1:1 + 6 * num_layers]
        r1_ref = refs[1 + 6 * num_layers]
        r2_ref = refs[2 + 6 * num_layers]
        gx_ref, out_a_ref, out_b_ref = refs[3 + 6 * num_layers:]

        def run_bidir_pass(in_ref, wih_ref, whh_ref, b_ref, h0, c0, out_ref):
            """One bidirectional layer over the whole sequence.

            h0/c0: (2B, H); rows [0, B) = forward dir, rows [B, 2B) = backward.
            Writes the layer output (time-major, feature-concat [fwd | bwd])
            to out_ref (T*B, 2H); returns the final (h, c), each (2B, H).
            """
            # Hoisted input projection: ONE whole-sequence matmul for both
            # directions; bias broadcast/add happens here once, not per step.
            gx_ref[...] = (
                jnp.dot(in_ref[...], wih_ref[...],
                        preferred_element_type=jnp.float32)
                + b_ref[...])                                    # (T*B, 8H)
            whh = whh_ref[...]                                   # (H, 8H)

            h_all, c_all = h0, c0
            # T is a static Python int -> fully unrolled recurrence (same
            # effect as lax.fori_loop(..., unroll=True)); all slices static.
            for t in range(T):
                t_rev = T - 1 - t
                # Single recurrent MXU push for both directions, stacked on
                # the sublane/batch axis: (2B, H) @ (H, 8H) -> (2B, 8H).
                gh = jnp.dot(h_all, whh,
                             preferred_element_type=jnp.float32)
                # fwd rows use fwd gate columns at time t; bwd rows use bwd
                # gate columns at (reversed) time T-1-t.
                gates = jnp.concatenate(
                    [gh[:B, :G4] + gx_ref[t * B:(t + 1) * B, :G4],
                     gh[B:, G4:] + gx_ref[t_rev * B:(t_rev + 1) * B, G4:]],
                    axis=0)                                      # (2B, 4H)
                i_g = jax.nn.sigmoid(gates[:, 0:H])
                f_g = jax.nn.sigmoid(gates[:, H:2 * H])
                g_g = jnp.tanh(gates[:, 2 * H:3 * H])
                o_g = jax.nn.sigmoid(gates[:, 3 * H:4 * H])
                c_all = f_g * c_all + i_g * g_g
                h_all = o_g * jnp.tanh(c_all)
                # Store in original time order: fwd hidden belongs to time t,
                # bwd hidden belongs to time T-1-t.
                out_ref[t * B:(t + 1) * B, 0:H] = h_all[:B]
                out_ref[t_rev * B:(t_rev + 1) * B, H:2 * H] = h_all[B:]
            return h_all, c_all

        def run_stack(stack, h0s, c0s, r_ref):
            """One multi-layer bidirectional LSTM (= one nn.LSTM module)."""
            h_fin, c_fin = [], []
            in_ref = x_ref
            for l in range(num_layers):
                off = 3 * (stack * num_layers + l)
                out_ref = out_a_ref if (l % 2 == 0) else out_b_ref
                h, c = run_bidir_pass(in_ref, w_refs[off], w_refs[off + 1],
                                      w_refs[off + 2], h0s[l], c0s[l], out_ref)
                h_fin.append(h)
                c_fin.append(c)
                in_ref = out_ref
            # torch.cat([out[:, -1, :], h_n[0], h_n[-1]], dim=1) -> (B, 4H)
            r_ref[:, 0:2 * H] = in_ref[(T - 1) * B:T * B, :]   # out[:, -1, :]
            r_ref[:, 2 * H:3 * H] = h_fin[0][:B]               # h_n[0]
            r_ref[:, 3 * H:4 * H] = h_fin[-1][B:]              # h_n[-1]
            return h_fin, c_fin

        zeros = jnp.zeros((2 * B, H), jnp.float32)
        # lstm1 starts from zeros; lstm2 starts from lstm1's final (h, c),
        # layer-by-layer (PyTorch h_n ordering [l0_fwd, l0_bwd, l1_fwd, ...]).
        h1, c1 = run_stack(0, [zeros] * num_layers, [zeros] * num_layers, r1_ref)
        run_stack(1, h1, c1, r2_ref)

    return kernel


# ----------------------------------------------------------------------------
# Wrapper: parameter packing + single pallas_call
# ----------------------------------------------------------------------------
def _pack_bidir_layer(dir_params):
    """((wih_f.T, whh_f.T, b_f), (wih_b.T, whh_b.T, b_b)) -> kernel params."""
    (wih_f, whh_f, b_f), (wih_b, whh_b, b_b) = dir_params
    wih_cat = jnp.concatenate([wih_f, wih_b], axis=1)            # (in, 8H)
    whh_cat = jnp.concatenate([whh_f, whh_b], axis=1)            # (H, 8H)
    b_cat = jnp.concatenate([b_f, b_b]).reshape(1, -1)           # (1, 8H)
    return wih_cat, whh_cat, b_cat


def bilstm_forward_pallas(x, params1, params2, num_layers, hidden_size):
    """Mirrors BiLSTM.forward with one fused Pallas kernel call."""
    B, T, I = x.shape
    H = hidden_size
    # Time-major flatten once (row = t*B + b) so the kernel is purely 2-D.
    x2d = jnp.transpose(x, (1, 0, 2)).reshape(T * B, I).astype(jnp.float32)

    packed = []
    for params in (params1, params2):
        for l in range(num_layers):
            packed.extend(_pack_bidir_layer(params[l]))

    vmem = pl.BlockSpec(memory_space=pltpu.MemorySpace.VMEM)
    kernel = _make_bilstm_kernel(T, B, H, num_layers)
    r1, r2 = pl.pallas_call(
        kernel,
        out_shape=(jax.ShapeDtypeStruct((B, 4 * H), jnp.float32),
                   jax.ShapeDtypeStruct((B, 4 * H), jnp.float32)),
        in_specs=[vmem] * (1 + len(packed)),
        out_specs=(vmem, vmem),
        scratch_shapes=[
            pltpu.VMEM((T * B, 8 * H), jnp.float32),   # hoisted input gates
            pltpu.VMEM((T * B, 2 * H), jnp.float32),   # layer-output ping
            pltpu.VMEM((T * B, 2 * H), jnp.float32),   # layer-output pong
        ],
        # Everything is VMEM-resident at these sizes; raise the scoped limit
        # explicitly so larger T/H configs don't hit the 16 MiB default.
        compiler_params=pltpu.CompilerParams(
            vmem_limit_bytes=32 * 1024 * 1024),
    )(x2d, *packed)
    return r1, r2


# ----------------------------------------------------------------------------
# Pure-JAX reference (matches torch.nn.LSTM semantics) for correctness check
# ----------------------------------------------------------------------------
def _lstm_layer_dir_ref(x, wih_t, whh_t, b, h0, c0):
    H = h0.shape[-1]

    def step(carry, x_t):
        h, c = carry
        gates = x_t @ wih_t + h @ whh_t + b
        i_g = jax.nn.sigmoid(gates[:, 0:H])
        f_g = jax.nn.sigmoid(gates[:, H:2 * H])
        g_g = jnp.tanh(gates[:, 2 * H:3 * H])
        o_g = jax.nn.sigmoid(gates[:, 3 * H:4 * H])
        c_new = f_g * c + i_g * g_g
        h_new = o_g * jnp.tanh(c_new)
        return (h_new, c_new), h_new

    (hT, cT), outs = lax.scan(step, (h0, c0), jnp.transpose(x, (1, 0, 2)))
    return jnp.transpose(outs, (1, 0, 2)), hT, cT


def _bidirectional_lstm_ref(x, params, h0, c0):
    num_layers = len(params)
    layer_in = x
    h_n, c_n = [], []
    for l in range(num_layers):
        dir_outs = []
        for d in range(2):
            wih_t, whh_t, b = params[l][d]
            idx = 2 * l + d
            inp = layer_in if d == 0 else jnp.flip(layer_in, axis=1)
            out, hT, cT = _lstm_layer_dir_ref(inp, wih_t, whh_t, b,
                                              h0[idx], c0[idx])
            if d == 1:
                out = jnp.flip(out, axis=1)
            dir_outs.append(out)
            h_n.append(hT)
            c_n.append(cT)
        layer_in = jnp.concatenate(dir_outs, axis=-1)
    return layer_in, jnp.stack(h_n, axis=0), jnp.stack(c_n, axis=0)


def bilstm_forward_ref(x, params1, params2, num_layers, hidden_size):
    B = x.shape[0]
    h0 = jnp.zeros((num_layers * 2, B, hidden_size), jnp.float32)
    c0 = jnp.zeros_like(h0)
    out1, h1, c1 = _bidirectional_lstm_ref(x, params1, h0, c0)
    out2, h2, c2 = _bidirectional_lstm_ref(x, params2, h1, c1)
    r1 = jnp.concatenate([out1[:, -1, :], h1[0], h1[-1]], axis=1)
    r2 = jnp.concatenate([out2[:, -1, :], h2[0], h2[-1]], axis=1)
    return r1, r2


# ----------------------------------------------------------------------------
# Deterministic parameter init (same shapes as nn.LSTM; uniform(-1/sqrt(H), +)).
# Stored pre-transposed as (in, 4H) / (H, 4H) with combined bias (b_ih + b_hh).
# ----------------------------------------------------------------------------
def init_lstm_params(key, input_size, hidden_size, num_layers):
    H = hidden_size
    bound = 1.0 / (H ** 0.5)
    params = []
    for l in range(num_layers):
        in_l = input_size if l == 0 else 2 * H
        dirs = []
        for _ in range(2):
            key, k1, k2, k3, k4 = jax.random.split(key, 5)
            wih = jax.random.uniform(k1, (4 * H, in_l), jnp.float32, -bound, bound)
            whh = jax.random.uniform(k2, (4 * H, H), jnp.float32, -bound, bound)
            bih = jax.random.uniform(k3, (4 * H,), jnp.float32, -bound, bound)
            bhh = jax.random.uniform(k4, (4 * H,), jnp.float32, -bound, bound)
            dirs.append((wih.T, whh.T, bih + bhh))
        params.append(dirs)
    return key, params


if __name__ == "__main__":
    B, T, INPUT, HIDDEN, LAYERS = 2, 8, 16, 32, 2

    key = jax.random.PRNGKey(0)
    key, kx = jax.random.split(key)
    x = jax.random.normal(kx, (B, T, INPUT), jnp.float32)
    key, params1 = init_lstm_params(key, INPUT, HIDDEN, LAYERS)
    key, params2 = init_lstm_params(key, INPUT, HIDDEN, LAYERS)

    r1, r2 = bilstm_forward_pallas(x, params1, params2, LAYERS, HIDDEN)
    r1, r2 = jax.block_until_ready((r1, r2))

    assert r1.shape == (B, 4 * HIDDEN) and r2.shape == (B, 4 * HIDDEN)

    ref1, ref2 = bilstm_forward_ref(x, params1, params2, LAYERS, HIDDEN)
    if not (jnp.allclose(r1, ref1, atol=1e-3, rtol=1e-3)
            and jnp.allclose(r2, ref2, atol=1e-3, rtol=1e-3)):
        raise AssertionError("Pallas BiLSTM output mismatch vs JAX reference")

    print("KERNEL_OK")
</pallas_src>

<mosaic_0001>
module attributes {stable_mosaic.version = 11 : i64} {
  func.func @kernel(%arg0: memref<16x16xf32, #tpu.memory_space<vmem>>, %arg1: memref<16x256xf32, #tpu.memory_space<vmem>>, %arg2: memref<32x256xf32, #tpu.memory_space<vmem>>, %arg3: memref<1x256xf32, #tpu.memory_space<vmem>>, %arg4: memref<64x256xf32, #tpu.memory_space<vmem>>, %arg5: memref<32x256xf32, #tpu.memory_space<vmem>>, %arg6: memref<1x256xf32, #tpu.memory_space<vmem>>, %arg7: memref<16x256xf32, #tpu.memory_space<vmem>>, %arg8: memref<32x256xf32, #tpu.memory_space<vmem>>, %arg9: memref<1x256xf32, #tpu.memory_space<vmem>>, %arg10: memref<64x256xf32, #tpu.memory_space<vmem>>, %arg11: memref<32x256xf32, #tpu.memory_space<vmem>>, %arg12: memref<1x256xf32, #tpu.memory_space<vmem>>, %arg13: memref<2x128xf32, #tpu.memory_space<vmem>>, %arg14: memref<2x128xf32, #tpu.memory_space<vmem>>, %arg15: memref<16x256xf32, #tpu.memory_space<vmem>>, %arg16: memref<16x64xf32, #tpu.memory_space<vmem>>, %arg17: memref<16x64xf32, #tpu.memory_space<vmem>>) attributes {dimension_semantics = [], scalar_prefetch = 0 : i64, scratch_operands = 3 : i64, tpu.core_type = #tpu.core_type<tc>} {
    %cst = arith.constant 0.000000e+00 : f32
    %0 = vector.broadcast %cst : f32 to vector<4x32xf32>
    %c0 = arith.constant 0 : index
    %c0_0 = arith.constant 0 : index
    %1 = vector.load %arg0[%c0, %c0_0] : memref<16x16xf32, #tpu.memory_space<vmem>>, vector<16x16xf32>
    %c0_1 = arith.constant 0 : index
    %c0_2 = arith.constant 0 : index
    %2 = vector.load %arg1[%c0_1, %c0_2] : memref<16x256xf32, #tpu.memory_space<vmem>>, vector<16x256xf32>
    %cst_3 = arith.constant dense<0.000000e+00> : vector<16x256xf32>
    %3 = tpu.matmul %1, %2, %cst_3 {dimension_numbers = #tpu.dot_dimension_numbers<[1], [0], [0], [1], [0, 0, 1, 1], [], []>} : vector<16x16xf32>, vector<16x256xf32>, vector<16x256xf32> -> vector<16x256xf32>
    %c0_4 = arith.constant 0 : index
    %c0_5 = arith.constant 0 : index
    %4 = vector.load %arg3[%c0_4, %c0_5] : memref<1x256xf32, #tpu.memory_space<vmem>>, vector<1x256xf32>
    %5 = vector.broadcast %4 : vector<1x256xf32> to vector<16x256xf32>
    %6 = arith.addf %3, %5 : vector<16x256xf32>
    %c0_6 = arith.constant 0 : index
    %c0_7 = arith.constant 0 : index
    %7 = vector.load %arg15[%c0_6, %c0_7] : memref<16x256xf32, #tpu.memory_space<vmem>>, vector<16x256xf32>
    tpu.vector_store %arg15[%c0_6, %c0_7], %6 {strides = array<i32>} : memref<16x256xf32, #tpu.memory_space<vmem>>, vector<16x256xf32>,
    %c0_8 = arith.constant 0 : index
    %c0_9 = arith.constant 0 : index
    %8 = vector.load %arg2[%c0_8, %c0_9] : memref<32x256xf32, #tpu.memory_space<vmem>>, vector<32x256xf32>
    %cst_10 = arith.constant dense<0.000000e+00> : vector<4x256xf32>
    %9 = tpu.matmul %0, %8, %cst_10 {dimension_numbers = #tpu.dot_dimension_numbers<[1], [0], [0], [1], [0, 0, 1, 1], [], []>} : vector<4x32xf32>, vector<32x256xf32>, vector<4x256xf32> -> vector<4x256xf32>
    %10 = vector.extract_strided_slice %9 {offsets = [0, 0], sizes = [2, 128], strides = [1, 1]} : vector<4x256xf32> to vector<2x128xf32>
    %c0_11 = arith.constant 0 : index
    %c0_12 = arith.constant 0 : index
    %11 = vector.load %arg15[%c0_11, %c0_12] : memref<16x256xf32, #tpu.memory_space<vmem>>, vector<2x128xf32>
    %12 = arith.addf %10, %11 : vector<2x128xf32>
    %13 = vector.extract_strided_slice %9 {offsets = [2, 128], sizes = [2, 128], strides = [1, 1]} : vector<4x256xf32> to vector<2x128xf32>
    %c14 = arith.constant 14 : index
    %c128 = arith.constant 128 : index
    %14 = vector.load %arg15[%c14, %c128] : memref<16x256xf32, #tpu.memory_space<vmem>>, vector<2x128xf32>
    %15 = arith.addf %13, %14 : vector<2x128xf32>
    %16 = tpu.concatenate %12, %15 in 0 : vector<2x128xf32>, vector<2x128xf32> -> vector<4x128xf32>
    %17 = vector.extract_strided_slice %16 {offsets = [0, 0], sizes = [4, 32], strides = [1, 1]} : vector<4x128xf32> to vector<4x32xf32>
    %18 = arith.negf %17 : vector<4x32xf32>
    %19 = math.exp %18 : vector<4x32xf32>
    %cst_13 = arith.constant 1.000000e+00 : f32
    %20 = vector.broadcast %cst_13 : f32 to vector<4x32xf32>
    %21 = arith.addf %20, %19 : vector<4x32xf32>
    %22 = arith.divf %20, %21 : vector<4x32xf32>
    %23 = vector.extract_strided_slice %16 {offsets = [0, 32], sizes = [4, 32], strides = [1, 1]} : vector<4x128xf32> to vector<4x32xf32>
    %24 = arith.negf %23 : vector<4x32xf32>
    %25 = math.exp %24 : vector<4x32xf32>
    %cst_14 = arith.constant 1.000000e+00 : f32
    %26 = vector.broadcast %cst_14 : f32 to vector<4x32xf32>
    %27 = arith.addf %26, %25 : vector<4x32xf32>
    %28 = arith.divf %26, %27 : vector<4x32xf32>
    %29 = vector.extract_strided_slice %16 {offsets = [0, 64], sizes = [4, 32], strides = [1, 1]} : vector<4x128xf32> to vector<4x32xf32>
    %30 = math.tanh %29 : vector<4x32xf32>
    %31 = vector.extract_strided_slice %16 {offsets = [0, 96], sizes = [4, 32], strides = [1, 1]} : vector<4x128xf32> to vector<4x32xf32>
    %32 = arith.negf %31 : vector<4x32xf32>
    %33 = math.exp %32 : vector<4x32xf32>
    %cst_15 = arith.constant 1.000000e+00 : f32
    %34 = vector.broadcast %cst_15 : f32 to vector<4x32xf32>
    %35 = arith.addf %34, %33 : vector<4x32xf32>
    %36 = arith.divf %34, %35 : vector<4x32xf32>
    %37 = arith.mulf %28, %0 : vector<4x32xf32>
    %38 = arith.mulf %22, %30 : vector<4x32xf32>
    %39 = arith.addf %37, %38 : vector<4x32xf32>
    %40 = math.tanh %39 : vector<4x32xf32>
    %41 = arith.mulf %36, %40 : vector<4x32xf32>
    %42 = vector.extract_strided_slice %41 {offsets = [0, 0], sizes = [2, 32], strides = [1, 1]} : vector<4x32xf32> to vector<2x32xf32>
    %c0_16 = arith.constant 0 : index
    %c0_17 = arith.constant 0 : index
    %43 = vector.load %arg16[%c0_16, %c0_17] : memref<16x64xf32, #tpu.memory_space<vmem>>, vector<2x32xf32>
    tpu.vector_store %arg16[%c0_16, %c0_17], %42 {strides = array<i32>} : memref<16x64xf32, #tpu.memory_space<vmem>>, vector<2x32xf32>,
    %44 = vector.extract_strided_slice %41 {offsets = [2, 0], sizes = [2, 32], strides = [1, 1]} : vector<4x32xf32> to vector<2x32xf32>
    %c14_18 = arith.constant 14 : index
    %c32 = arith.constant 32 : index
    %45 = vector.load %arg16[%c14_18, %c32] : memref<16x64xf32, #tpu.memory_space<vmem>>, vector<2x32xf32>
    tpu.vector_store %arg16[%c14_18, %c32], %44 {strides = array<i32>} : memref<16x64xf32, #tpu.memory_space<vmem>>, vector<2x32xf32>,
    %cst_19 = arith.constant dense<0.000000e+00> : vector<4x256xf32>
    %46 = tpu.matmul %41, %8, %cst_19 {dimension_numbers = #tpu.dot_dimension_numbers<[1], [0], [0], [1], [0, 0, 1, 1], [], []>} : vector<4x32xf32>, vector<32x256xf32>, vector<4x256xf32> -> vector<4x256xf32>
    %47 = vector.extract_strided_slice %46 {offsets = [0, 0], sizes = [2, 128], strides = [1, 1]} : vector<4x256xf32> to vector<2x128xf32>
    %c2 = arith.constant 2 : index
    %c0_20 = arith.constant 0 : index
    %48 = vector.load %arg15[%c2, %c0_20] : memref<16x256xf32, #tpu.memory_space<vmem>>, vector<2x128xf32>
    %49 = arith.addf %47, %48 : vector<2x128xf32>
    %50 = vector.extract_strided_slice %46 {offsets = [2, 128], sizes = [2, 128], strides = [1, 1]} : vector<4x256xf32> to vector<2x128xf32>
    %c12 = arith.constant 12 : index
    %c128_21 = arith.constant 128 : index
    %51 = vector.load %arg15[%c12, %c128_21] : memref<16x256xf32, #tpu.memory_space<vmem>>, vector<2x128xf32>
    %52 = arith.addf %50, %51 : vector<2x128xf32>
    %53 = tpu.concatenate %49, %52 in 0 : vector<2x128xf32>, vector<2x128xf32> -> vector<4x128xf32>
    %54 = vector.extract_strided_slice %53 {offsets = [0, 0], sizes = [4, 32], strides = [1, 1]} : vector<4x128xf32> to vector<4x32xf32>
    %55 = arith.negf %54 : vector<4x32xf32>
    %56 = math.exp %55 : vector<4x32xf32>
    %cst_22 = arith.constant 1.000000e+00 : f32
    %57 = vector.broadcast %cst_22 : f32 to vector<4x32xf32>
    %58 = arith.addf %57, %56 : vector<4x32xf32>
    %59 = arith.divf %57, %58 : vector<4x32xf32>
    %60 = vector.extract_strided_slice %53 {offsets = [0, 32], sizes = [4, 32], strides = [1, 1]} : vector<4x128xf32> to vector<4x32xf32>
    %61 = arith.negf %60 : vector<4x32xf32>
    %62 = math.exp %61 : vector<4x32xf32>
    %cst_23 = arith.constant 1.000000e+00 : f32
    %63 = vector.broadcast %cst_23 : f32 to vector<4x32xf32>
    %64 = arith.addf %63, %62 : vector<4x32xf32>
    %65 = arith.divf %63, %64 : vector<4x32xf32>
    %66 = vector.extract_strided_slice %53 {offsets = [0, 64], sizes = [4, 32], strides = [1, 1]} : vector<4x128xf32> to vector<4x32xf32>
    %67 = math.tanh %66 : vector<4x32xf32>
    %68 = vector.extract_strided_slice %53 {offsets = [0, 96], sizes = [4, 32], strides = [1, 1]} : vector<4x128xf32> to vector<4x32xf32>
    %69 = arith.negf %68 : vector<4x32xf32>
    %70 = math.exp %69 : vector<4x32xf32>
    %cst_24 = arith.constant 1.000000e+00 : f32
    %71 = vector.broadcast %cst_24 : f32 to vector<4x32xf32>
    %72 = arith.addf %71, %70 : vector<4x32xf32>
    %73 = arith.divf %71, %72 : vector<4x32xf32>
    %74 = arith.mulf %65, %39 : vector<4x32xf32>
    %75 = arith.mulf %59, %67 : vector<4x32xf32>
    %76 = arith.addf %74, %75 : vector<4x32xf32>
    %77 = math.tanh %76 : vector<4x32xf32>
    %78 = arith.mulf %73, %77 : vector<4x32xf32>
    %79 = vector.extract_strided_slice %78 {offsets = [0, 0], sizes = [2, 32], strides = [1, 1]} : vector<4x32xf32> to vector<2x32xf32>
    %c2_25 = arith.constant 2 : index
    %c0_26 = arith.constant 0 : index
    %80 = vector.load %arg16[%c2_25, %c0_26] : memref<16x64xf32, #tpu.memory_space<vmem>>, vector<2x32xf32>
    tpu.vector_store %arg16[%c2_25, %c0_26], %79 {strides = array<i32>} : memref<16x64xf32, #tpu.memory_space<vmem>>, vector<2x32xf32>,
    %81 = vector.extract_strided_slice %78 {offsets = [2, 0], sizes = [2, 32], strides = [1, 1]} : vector<4x32xf32> to vector<2x32xf32>
    %c12_27 = arith.constant 12 : index
    %c32_28 = arith.constant 32 : index
    %82 = vector.load %arg16[%c12_27, %c32_28] : memref<16x64xf32, #tpu.memory_space<vmem>>, vector<2x32xf32>
    tpu.vector_store %arg16[%c12_27, %c32_28], %81 {strides = array<i32>} : memref<16x64xf32, #tpu.memory_space<vmem>>, vector<2x32xf32>,
    %cst_29 = arith.constant dense<0.000000e+00> : vector<4x256xf32>
    %83 = tpu.matmul %78, %8, %cst_29 {dimension_numbers = #tpu.dot_dimension_numbers<[1], [0], [0], [1], [0, 0, 1, 1], [], []>} : vector<4x32xf32>, vector<32x256xf32>, vector<4x256xf32> -> vector<4x256xf32>
    %84 = vector.extract_strided_slice %83 {offsets = [0, 0], sizes = [2, 128], strides = [1, 1]} : vector<4x256xf32> to vector<2x128xf32>
    %c4 = arith.constant 4 : index
    %c0_30 = arith.constant 0 : index
    %85 = vector.load %arg15[%c4, %c0_30] : memref<16x256xf32, #tpu.memory_space<vmem>>, vector<2x128xf32>
    %86 = arith.addf %84, %85 : vector<2x128xf32>
    %87 = vector.extract_strided_slice %83 {offsets = [2, 128], sizes = [2, 128], strides = [1, 1]} : vector<4x256xf32> to vector<2x128xf32>
    %c10 = arith.constant 10 : index
    %c128_31 = arith.constant 128 : index
    %88 = vector.load %arg15[%c10, %c128_31] : memref<16x256xf32, #tpu.memory_space<vmem>>, vector<2x128xf32>
    %89 = arith.addf %87, %88 : vector<2x128xf32>
    %90 = tpu.concatenate %86, %89 in 0 : vector<2x128xf32>, vector<2x128xf32> -> vector<4x128xf32>
    %91 = vector.extract_strided_slice %90 {offsets = [0, 0], sizes = [4, 32], strides = [1, 1]} : vector<4x128xf32> to vector<4x32xf32>
    %92 = arith.negf %91 : vector<4x32xf32>
    %93 = math.exp %92 : vector<4x32xf32>
    %cst_32 = arith.constant 1.000000e+00 : f32
    %94 = vector.broadcast %cst_32 : f32 to vector<4x32xf32>
    %95 = arith.addf %94, %93 : vector<4x32xf32>
    %96 = arith.divf %94, %95 : vector<4x32xf32>
    %97 = vector.extract_strided_slice %90 {offsets = [0, 32], sizes = [4, 32], strides = [1, 1]} : vector<4x128xf32> to vector<4x32xf32>
    %98 = arith.negf %97 : vector<4x32xf32>
    %99 = math.exp %98 : vector<4x32xf32>
    %cst_33 = arith.constant 1.000000e+00 : f32
    %100 = vector.broadcast %cst_33 : f32 to vector<4x32xf32>
    %101 = arith.addf %100, %99 : vector<4x32xf32>
    %102 = arith.divf %100, %101 : vector<4x32xf32>
    %103 = vector.extract_strided_slice %90 {offsets = [0, 64], sizes = [4, 32], strides = [1, 1]} : vector<4x128xf32> to vector<4x32xf32>
    %104 = math.tanh %103 : vector<4x32xf32>
    %105 = vector.extract_strided_slice %90 {offsets = [0, 96], sizes = [4, 32], strides = [1, 1]} : vector<4x128xf32> to vector<4x32xf32>
    %106 = arith.negf %105 : vector<4x32xf32>
    %107 = math.exp %106 : vector<4x32xf32>
    %cst_34 = arith.constant 1.000000e+00 : f32
    %108 = vector.broadcast %cst_34 : f32 to vector<4x32xf32>
    %109 = arith.addf %108, %107 : vector<4x32xf32>
    %110 = arith.divf %108, %109 : vector<4x32xf32>
    %111 = arith.mulf %102, %76 : vector<4x32xf32>
    %112 = arith.mulf %96, %104 : vector<4x32xf32>
    %113 = arith.addf %111, %112 : vector<4x32xf32>
    %114 = math.tanh %113 : vector<4x32xf32>
    %115 = arith.mulf %110, %114 : vector<4x32xf32>
    %116 = vector.extract_strided_slice %115 {offsets = [0, 0], sizes = [2, 32], strides = [1, 1]} : vector<4x32xf32> to vector<2x32xf32>
    %c4_35 = arith.constant 4 : index
    %c0_36 = arith.constant 0 : index
    %117 = vector.load %arg16[%c4_35, %c0_36] : memref<16x64xf32, #tpu.memory_space<vmem>>, vector<2x32xf32>
    tpu.vector_store %arg16[%c4_35, %c0_36], %116 {strides = array<i32>} : memref<16x64xf32, #tpu.memory_space<vmem>>, vector<2x32xf32>,
    %118 = vector.extract_strided_slice %115 {offsets = [2, 0], sizes = [2, 32], strides = [1, 1]} : vector<4x32xf32> to vector<2x32xf32>
    %c10_37 = arith.constant 10 : index
    %c32_38 = arith.constant 32 : index
    %119 = vector.load %arg16[%c10_37, %c32_38] : memref<16x64xf32, #tpu.memory_space<vmem>>, vector<2x32xf32>
    tpu.vector_store %arg16[%c10_37, %c32_38], %118 {strides = array<i32>} : memref<16x64xf32, #tpu.memory_space<vmem>>, vector<2x32xf32>,
    %cst_39 = arith.constant dense<0.000000e+00> : vector<4x256xf32>
    %120 = tpu.matmul %115, %8, %cst_39 {dimension_numbers = #tpu.dot_dimension_numbers<[1], [0], [0], [1], [0, 0, 1, 1], [], []>} : vector<4x32xf32>, vector<32x256xf32>, vector<4x256xf32> -> vector<4x256xf32>
    %121 = vector.extract_strided_slice %120 {offsets = [0, 0], sizes = [2, 128], strides = [1, 1]} : vector<4x256xf32> to vector<2x128xf32>
    %c6 = arith.constant 6 : index
    %c0_40 = arith.constant 0 : index
    %122 = vector.load %arg15[%c6, %c0_40] : memref<16x256xf32, #tpu.memory_space<vmem>>, vector<2x128xf32>
    %123 = arith.addf %121, %122 : vector<2x128xf32>
    %124 = vector.extract_strided_slice %120 {offsets = [2, 128], sizes = [2, 128], strides = [1, 1]} : vector<4x256xf32> to vector<2x128xf32>
    %c8 = arith.constant 8 : index
    %c128_41 = arith.constant 128 : index
    %125 = vector.load %arg15[%c8, %c128_41] : memref<16x256xf32, #tpu.memory_space<vmem>>, vector<2x128xf32>
    %126 = arith.addf %124, %125 : vector<2x128xf32>
    %127 = tpu.concatenate %123, %126 in 0 : vector<2x128xf32>, vector<2x128xf32> -> vector<4x128xf32>
    %128 = vector.extract_strided_slice %127 {offsets = [0, 0], sizes = [4, 32], strides = [1, 1]} : vector<4x128xf32> to vector<4x32xf32>
    %129 = arith.negf %128 : vector<4x32xf32>
    %130 = math.exp %129 : vector<4x32xf32>
    %cst_42 = arith.constant 1.000000e+00 : f32
    %131 = vector.broadcast %cst_42 : f32 to vector<4x32xf32>
    %132 = arith.addf %131, %130 : vector<4x32xf32>
    %133 = arith.divf %131, %132 : vector<4x32xf32>
    %134 = vector.extract_strided_slice %127 {offsets = [0, 32], sizes = [4, 32], strides = [1, 1]} : vector<4x128xf32> to vector<4x32xf32>
    %135 = arith.negf %134 : vector<4x32xf32>
    %136 = math.exp %135 : vector<4x32xf32>
    %cst_43 = arith.constant 1.000000e+00 : f32
    %137 = vector.broadcast %cst_43 : f32 to vector<4x32xf32>
    %138 = arith.addf %137, %136 : vector<4x32xf32>
    %139 = arith.divf %137, %138 : vector<4x32xf32>
    %140 = vector.extract_strided_slice %127 {offsets = [0, 64], sizes = [4, 32], strides = [1, 1]} : vector<4x128xf32> to vector<4x32xf32>
    %141 = math.tanh %140 : vector<4x32xf32>
    %142 = vector.extract_strided_slice %127 {offsets = [0, 96], sizes = [4, 32], strides = [1, 1]} : vector<4x128xf32> to vector<4x32xf32>
    %143 = arith.negf %142 : vector<4x32xf32>
    %144 = math.exp %143 : vector<4x32xf32>
    %cst_44 = arith.constant 1.000000e+00 : f32
    %145 = vector.broadcast %cst_44 : f32 to vector<4x32xf32>
    %146 = arith.addf %145, %144 : vector<4x32xf32>
    %147 = arith.divf %145, %146 : vector<4x32xf32>
    %148 = arith.mulf %139, %113 : vector<4x32xf32>
    %149 = arith.mulf %133, %141 : vector<4x32xf32>
    %150 = arith.addf %148, %149 : vector<4x32xf32>
    %151 = math.tanh %150 : vector<4x32xf32>
    %152 = arith.mulf %147, %151 : vector<4x32xf32>
    %153 = vector.extract_strided_slice %152 {offsets = [0, 0], sizes = [2, 32], strides = [1, 1]} : vector<4x32xf32> to vector<2x32xf32>
    %c6_45 = arith.constant 6 : index
    %c0_46 = arith.constant 0 : index
    %154 = vector.load %arg16[%c6_45, %c0_46] : memref<16x64xf32, #tpu.memory_space<vmem>>, vector<2x32xf32>
    tpu.vector_store %arg16[%c6_45, %c0_46], %153 {strides = array<i32>} : memref<16x64xf32, #tpu.memory_space<vmem>>, vector<2x32xf32>,
    %155 = vector.extract_strided_slice %152 {offsets = [2, 0], sizes = [2, 32], strides = [1, 1]} : vector<4x32xf32> to vector<2x32xf32>
    %c8_47 = arith.constant 8 : index
    %c32_48 = arith.constant 32 : index
    %156 = vector.load %arg16[%c8_47, %c32_48] : memref<16x64xf32, #tpu.memory_space<vmem>>, vector<2x32xf32>
    tpu.vector_store %arg16[%c8_47, %c32_48], %155 {strides = array<i32>} : memref<16x64xf32, #tpu.memory_space<vmem>>, vector<2x32xf32>,
    %cst_49 = arith.constant dense<0.000000e+00> : vector<4x256xf32>
    %157 = tpu.matmul %152, %8, %cst_49 {dimension_numbers = #tpu.dot_dimension_numbers<[1], [0], [0], [1], [0, 0, 1, 1], [], []>} : vector<4x32xf32>, vector<32x256xf32>, vector<4x256xf32> -> vector<4x256xf32>
    %158 = vector.extract_strided_slice %157 {offsets = [0, 0], sizes = [2, 128], strides = [1, 1]} : vector<4x256xf32> to vector<2x128xf32>
    %c8_50 = arith.constant 8 : index
    %c0_51 = arith.constant 0 : index
    %159 = vector.load %arg15[%c8_50, %c0_51] : memref<16x256xf32, #tpu.memory_space<vmem>>, vector<2x128xf32>
    %160 = arith.addf %158, %159 : vector<2x128xf32>
    %161 = vector.extract_strided_slice %157 {offsets = [2, 128], sizes = [2, 128], strides = [1, 1]} : vector<4x256xf32> to vector<2x128xf32>
    %c6_52 = arith.constant 6 : index
    %c128_53 = arith.constant 128 : index
    %162 = vector.load %arg15[%c6_52, %c128_53] : memref<16x256xf32, #tpu.memory_space<vmem>>, vector<2x128xf32>
    %163 = arith.addf %161, %162 : vector<2x128xf32>
    %164 = tpu.concatenate %160, %163 in 0 : vector<2x128xf32>, vector<2x128xf32> -> vector<4x128xf32>
    %165 = vector.extract_strided_slice %164 {offsets = [0, 0], sizes = [4, 32], strides = [1, 1]} : vector<4x128xf32> to vector<4x32xf32>
    %166 = arith.negf %165 : vector<4x32xf32>
    %167 = math.exp %166 : vector<4x32xf32>
    %cst_54 = arith.constant 1.000000e+00 : f32
    %168 = vector.broadcast %cst_54 : f32 to vector<4x32xf32>
    %169 = arith.addf %168, %167 : vector<4x32xf32>
    %170 = arith.divf %168, %169 : vector<4x32xf32>
    %171 = vector.extract_strided_slice %164 {offsets = [0, 32], sizes = [4, 32], strides = [1, 1]} : vector<4x128xf32> to vector<4x32xf32>
    %172 = arith.negf %171 : vector<4x32xf32>
    %173 = math.exp %172 : vector<4x32xf32>
    %cst_55 = arith.constant 1.000000e+00 : f32
    %174 = vector.broadcast %cst_55 : f32 to vector<4x32xf32>
    %175 = arith.addf %174, %173 : vector<4x32xf32>
    %176 = arith.divf %174, %175 : vector<4x32xf32>
    %177 = vector.extract_strided_slice %164 {offsets = [0, 64], sizes = [4, 32], strides = [1, 1]} : vector<4x128xf32> to vector<4x32xf32>
    %178 = math.tanh %177 : vector<4x32xf32>
    %179 = vector.extract_strided_slice %164 {offsets = [0, 96], sizes = [4, 32], strides = [1, 1]} : vector<4x128xf32> to vector<4x32xf32>
    %180 = arith.negf %179 : vector<4x32xf32>
    %181 = math.exp %180 : vector<4x32xf32>
    %cst_56 = arith.constant 1.000000e+00 : f32
    %182 = vector.broadcast %cst_56 : f32 to vector<4x32xf32>
    %183 = arith.addf %182, %181 : vector<4x32xf32>
    %184 = arith.divf %182, %183 : vector<4x32xf32>
    %185 = arith.mulf %176, %150 : vector<4x32xf32>
    %186 = arith.mulf %170, %178 : vector<4x32xf32>
    %187 = arith.addf %185, %186 : vector<4x32xf32>
    %188 = math.tanh %187 : vector<4x32xf32>
    %189 = arith.mulf %184, %188 : vector<4x32xf32>
    %190 = vector.extract_strided_slice %189 {offsets = [0, 0], sizes = [2, 32], strides = [1, 1]} : vector<4x32xf32> to vector<2x32xf32>
    %c8_57 = arith.constant 8 : index
    %c0_58 = arith.constant 0 : index
    %191 = vector.load %arg16[%c8_57, %c0_58] : memref<16x64xf32, #tpu.memory_space<vmem>>, vector<2x32xf32>
    tpu.vector_store %arg16[%c8_57, %c0_58], %190 {strides = array<i32>} : memref<16x64xf32, #tpu.memory_space<vmem>>, vector<2x32xf32>,
    %192 = vector.extract_strided_slice %189 {offsets = [2, 0], sizes = [2, 32], strides = [1, 1]} : vector<4x32xf32> to vector<2x32xf32>
    %c6_59 = arith.constant 6 : index
    %c32_60 = arith.constant 32 : index
    %193 = vector.load %arg16[%c6_59, %c32_60] : memref<16x64xf32, #tpu.memory_space<vmem>>, vector<2x32xf32>
    tpu.vector_store %arg16[%c6_59, %c32_60], %192 {strides = array<i32>} : memref<16x64xf32, #tpu.memory_space<vmem>>, vector<2x32xf32>,
    %cst_61 = arith.constant dense<0.000000e+00> : vector<4x256xf32>
    %194 = tpu.matmul %189, %8, %cst_61 {dimension_numbers = #tpu.dot_dimension_numbers<[1], [0], [0], [1], [0, 0, 1, 1], [], []>} : vector<4x32xf32>, vector<32x256xf32>, vector<4x256xf32> -> vector<4x256xf32>
    %195 = vector.extract_strided_slice %194 {offsets = [0, 0], sizes = [2, 128], strides = [1, 1]} : vector<4x256xf32> to vector<2x128xf32>
    %c10_62 = arith.constant 10 : index
    %c0_63 = arith.constant 0 : index
    %196 = vector.load %arg15[%c10_62, %c0_63] : memref<16x256xf32, #tpu.memory_space<vmem>>, vector<2x128xf32>
    %197 = arith.addf %195, %196 : vector<2x128xf32>
    %198 = vector.extract_strided_slice %194 {offsets = [2, 128], sizes = [2, 128], strides = [1, 1]} : vector<4x256xf32> to vector<2x128xf32>
    %c4_64 = arith.constant 4 : index
    %c128_65 = arith.constant 128 : index
    %199 = vector.load %arg15[%c4_64, %c128_65] : memref<16x256xf32, #tpu.memory_space<vmem>>, vector<2x128xf32>
    %200 = arith.addf %198, %199 : vector<2x128xf32>
    %201 = tpu.concatenate %197, %200 in 0 : vector<2x128xf32>, vector<2x128xf32> -> vector<4x128xf32>
    %202 = vector.extract_strided_slice %201 {offsets = [0, 0], sizes = [4, 32], strides = [1, 1]} : vector<4x128xf32> to vector<4x32xf32>
    %203 = arith.negf %202 : vector<4x32xf32>
    %204 = math.exp %203 : vector<4x32xf32>
    %cst_66 = arith.constant 1.000000e+00 : f32
    %205 = vector.broadcast %cst_66 : f32 to vector<4x32xf32>
    %206 = arith.addf %205, %204 : vector<4x32xf32>
    %207 = arith.divf %205, %206 : vector<4x32xf32>
    %208 = vector.extract_strided_slice %201 {offsets = [0, 32], sizes = [4, 32], strides = [1, 1]} : vector<4x128xf32> to vector<4x32xf32>
    %209 = arith.negf %208 : vector<4x32xf32>
    %210 = math.exp %209 : vector<4x32xf32>
    %cst_67 = arith.constant 1.000000e+00 : f32
    %211 = vector.broadcast %cst_67 : f32 to vector<4x32xf32>
    %212 = arith.addf %211, %210 : vector<4x32xf32>
    %213 = arith.divf %211, %212 : vector<4x32xf32>
    %214 = vector.extract_strided_slice %201 {offsets = [0, 64], sizes = [4, 32], strides = [1, 1]} : vector<4x128xf32> to vector<4x32xf32>
    %215 = math.tanh %214 : vector<4x32xf32>
    %216 = vector.extract_strided_slice %201 {offsets = [0, 96], sizes = [4, 32], strides = [1, 1]} : vector<4x128xf32> to vector<4x32xf32>
    %217 = arith.negf %216 : vector<4x32xf32>
    %218 = math.exp %217 : vector<4x32xf32>
    %cst_68 = arith.constant 1.000000e+00 : f32
    %219 = vector.broadcast %cst_68 : f32 to vector<4x32xf32>
    %220 = arith.addf %219, %218 : vector<4x32xf32>
    %221 = arith.divf %219, %220 : vector<4x32xf32>
    %222 = arith.mulf %213, %187 : vector<4x32xf32>
    %223 = arith.mulf %207, %215 : vector<4x32xf32>
    %224 = arith.addf %222, %223 : vector<4x32xf32>
    %225 = math.tanh %224 : vector<4x32xf32>
    %226 = arith.mulf %221, %225 : vector<4x32xf32>
    %227 = vector.extract_strided_slice %226 {offsets = [0, 0], sizes = [2, 32], strides = [1, 1]} : vector<4x32xf32> to vector<2x32xf32>
    %c10_69 = arith.constant 10 : index
    %c0_70 = arith.constant 0 : index
    %228 = vector.load %arg16[%c10_69, %c0_70] : memref<16x64xf32, #tpu.memory_space<vmem>>, vector<2x32xf32>
    tpu.vector_store %arg16[%c10_69, %c0_70], %227 {strides = array<i32>} : memref<16x64xf32, #tpu.memory_space<vmem>>, vector<2x32xf32>,
    %229 = vector.extract_strided_slice %226 {offsets = [2, 0], sizes = [2, 32], strides = [1, 1]} : vector<4x32xf32> to vector<2x32xf32>
    %c4_71 = arith.constant 4 : index
    %c32_72 = arith.constant 32 : index
    %230 = vector.load %arg16[%c4_71, %c32_72] : memref<16x64xf32, #tpu.memory_space<vmem>>, vector<2x32xf32>
    tpu.vector_store %arg16[%c4_71, %c32_72], %229 {strides = array<i32>} : memref<16x64xf32, #tpu.memory_space<vmem>>, vector<2x32xf32>,
    %cst_73 = arith.constant dense<0.000000e+00> : vector<4x256xf32>
    %231 = tpu.matmul %226, %8, %cst_73 {dimension_numbers = #tpu.dot_dimension_numbers<[1], [0], [0], [1], [0, 0, 1, 1], [], []>} : vector<4x32xf32>, vector<32x256xf32>, vector<4x256xf32> -> vector<4x256xf32>
    %232 = vector.extract_strided_slice %231 {offsets = [0, 0], sizes = [2, 128], strides = [1, 1]} : vector<4x256xf32> to vector<2x128xf32>
    %c12_74 = arith.constant 12 : index
    %c0_75 = arith.constant 0 : index
    %233 = vector.load %arg15[%c12_74, %c0_75] : memref<16x256xf32, #tpu.memory_space<vmem>>, vector<2x128xf32>
    %234 = arith.addf %232, %233 : vector<2x128xf32>
    %235 = vector.extract_strided_slice %231 {offsets = [2, 128], sizes = [2, 128], strides = [1, 1]} : vector<4x256xf32> to vector<2x128xf32>
    %c2_76 = arith.constant 2 : index
    %c128_77 = arith.constant 128 : index
    %236 = vector.load %arg15[%c2_76, %c128_77] : memref<16x256xf32, #tpu.memory_space<vmem>>, vector<2x128xf32>
    %237 = arith.addf %235, %236 : vector<2x128xf32>
    %238 = tpu.concatenate %234, %237 in 0 : vector<2x128xf32>, vector<2x128xf32> -> vector<4x128xf32>
    %239 = vector.extract_strided_slice %238 {offsets = [0, 0], sizes = [4, 32], strides = [1, 1]} : vector<4x128xf32> to vector<4x32xf32>
    %240 = arith.negf %239 : vector<4x32xf32>
    %241 = math.exp %240 : vector<4x32xf32>
    %cst_78 = arith.constant 1.000000e+00 : f32
    %242 = vector.broadcast %cst_78 : f32 to vector<4x32xf32>
    %243 = arith.addf %242, %241 : vector<4x32xf32>
    %244 = arith.divf %242, %243 : vector<4x32xf32>
    %245 = vector.extract_strided_slice %238 {offsets = [0, 32], sizes = [4, 32], strides = [1, 1]} : vector<4x128xf32> to vector<4x32xf32>
    %246 = arith.negf %245 : vector<4x32xf32>
    %247 = math.exp %246 : vector<4x32xf32>
    %cst_79 = arith.constant 1.000000e+00 : f32
    %248 = vector.broadcast %cst_79 : f32 to vector<4x32xf32>
    %249 = arith.addf %248, %247 : vector<4x32xf32>
    %250 = arith.divf %248, %249 : vector<4x32xf32>
    %251 = vector.extract_strided_slice %238 {offsets = [0, 64], sizes = [4, 32], strides = [1, 1]} : vector<4x128xf32> to vector<4x32xf32>
    %252 = math.tanh %251 : vector<4x32xf32>
    %253 = vector.extract_strided_slice %238 {offsets = [0, 96], sizes = [4, 32], strides = [1, 1]} : vector<4x128xf32> to vector<4x32xf32>
    %254 = arith.negf %253 : vector<4x32xf32>
    %255 = math.exp %254 : vector<4x32xf32>
    %cst_80 = arith.constant 1.000000e+00 : f32
    %256 = vector.broadcast %cst_80 : f32 to vector<4x32xf32>
    %257 = arith.addf %256, %255 : vector<4x32xf32>
    %258 = arith.divf %256, %257 : vector<4x32xf32>
    %259 = arith.mulf %250, %224 : vector<4x32xf32>
    %260 = arith.mulf %244, %252 : vector<4x32xf32>
    %261 = arith.addf %259, %260 : vector<4x32xf32>
    %262 = math.tanh %261 : vector<4x32xf32>
    %263 = arith.mulf %258, %262 : vector<4x32xf32>
    %264 = vector.extract_strided_slice %263 {offsets = [0, 0], sizes = [2, 32], strides = [1, 1]} : vector<4x32xf32> to vector<2x32xf32>
    %c12_81 = arith.constant 12 : index
    %c0_82 = arith.constant 0 : index
    %265 = vector.load %arg16[%c12_81, %c0_82] : memref<16x64xf32, #tpu.memory_space<vmem>>, vector<2x32xf32>
    tpu.vector_store %arg16[%c12_81, %c0_82], %264 {strides = array<i32>} : memref<16x64xf32, #tpu.memory_space<vmem>>, vector<2x32xf32>,
    %266 = vector.extract_strided_slice %263 {offsets = [2, 0], sizes = [2, 32], strides = [1, 1]} : vector<4x32xf32> to vector<2x32xf32>
    %c2_83 = arith.constant 2 : index
    %c32_84 = arith.constant 32 : index
    %267 = vector.load %arg16[%c2_83, %c32_84] : memref<16x64xf32, #tpu.memory_space<vmem>>, vector<2x32xf32>
    tpu.vector_store %arg16[%c2_83, %c32_84], %266 {strides = array<i32>} : memref<16x64xf32, #tpu.memory_space<vmem>>, vector<2x32xf32>,
    %cst_85 = arith.constant dense<0.000000e+00> : vector<4x256xf32>
    %268 = tpu.matmul %263, %8, %cst_85 {dimension_numbers = #tpu.dot_dimension_numbers<[1], [0], [0], [1], [0, 0, 1, 1], [], []>} : vector<4x32xf32>, vector<32x256xf32>, vector<4x256xf32> -> vector<4x256xf32>
    %269 = vector.extract_strided_slice %268 {offsets = [0, 0], sizes = [2, 128], strides = [1, 1]} : vector<4x256xf32> to vector<2x128xf32>
    %c14_86 = arith.constant 14 : index
    %c0_87 = arith.constant 0 : index
    %270 = vector.load %arg15[%c14_86, %c0_87] : memref<16x256xf32, #tpu.memory_space<vmem>>, vector<2x128xf32>
    %271 = arith.addf %269, %270 : vector<2x128xf32>
    %272 = vector.extract_strided_slice %268 {offsets = [2, 128], sizes = [2, 128], strides = [1, 1]} : vector<4x256xf32> to vector<2x128xf32>
    %c0_88 = arith.constant 0 : index
    %c128_89 = arith.constant 128 : index
    %273 = vector.load %arg15[%c0_88, %c128_89] : memref<16x256xf32, #tpu.memory_space<vmem>>, vector<2x128xf32>
    %274 = arith.addf %272, %273 : vector<2x128xf32>
    %275 = tpu.concatenate %271, %274 in 0 : vector<2x128xf32>, vector<2x128xf32> -> vector<4x128xf32>
    %276 = vector.extract_strided_slice %275 {offsets = [0, 0], sizes = [4, 32], strides = [1, 1]} : vector<4x128xf32> to vector<4x32xf32>
    %277 = arith.negf %276 : vector<4x32xf32>
    %278 = math.exp %277 : vector<4x32xf32>
    %cst_90 = arith.constant 1.000000e+00 : f32
    %279 = vector.broadcast %cst_90 : f32 to vector<4x32xf32>
    %280 = arith.addf %279, %278 : vector<4x32xf32>
    %281 = arith.divf %279, %280 : vector<4x32xf32>
    %282 = vector.extract_strided_slice %275 {offsets = [0, 32], sizes = [4, 32], strides = [1, 1]} : vector<4x128xf32> to vector<4x32xf32>
    %283 = arith.negf %282 : vector<4x32xf32>
    %284 = math.exp %283 : vector<4x32xf32>
    %cst_91 = arith.constant 1.000000e+00 : f32
    %285 = vector.broadcast %cst_91 : f32 to vector<4x32xf32>
    %286 = arith.addf %285, %284 : vector<4x32xf32>
    %287 = arith.divf %285, %286 : vector<4x32xf32>
    %288 = vector.extract_strided_slice %275 {offsets = [0, 64], sizes = [4, 32], strides = [1, 1]} : vector<4x128xf32> to vector<4x32xf32>
    %289 = math.tanh %288 : vector<4x32xf32>
    %290 = vector.extract_strided_slice %275 {offsets = [0, 96], sizes = [4, 32], strides = [1, 1]} : vector<4x128xf32> to vector<4x32xf32>
    %291 = arith.negf %290 : vector<4x32xf32>
    %292 = math.exp %291 : vector<4x32xf32>
    %cst_92 = arith.constant 1.000000e+00 : f32
    %293 = vector.broadcast %cst_92 : f32 to vector<4x32xf32>
    %294 = arith.addf %293, %292 : vector<4x32xf32>
    %295 = arith.divf %293, %294 : vector<4x32xf32>
    %296 = arith.mulf %287, %261 : vector<4x32xf32>
    %297 = arith.mulf %281, %289 : vector<4x32xf32>
    %298 = arith.addf %296, %297 : vector<4x32xf32>
    %299 = math.tanh %298 : vector<4x32xf32>
    %300 = arith.mulf %295, %299 : vector<4x32xf32>
    %301 = vector.extract_strided_slice %300 {offsets = [0, 0], sizes = [2, 32], strides = [1, 1]} : vector<4x32xf32> to vector<2x32xf32>
    %c14_93 = arith.constant 14 : index
    %c0_94 = arith.constant 0 : index
    %302 = vector.load %arg16[%c14_93, %c0_94] : memref<16x64xf32, #tpu.memory_space<vmem>>, vector<2x32xf32>
    tpu.vector_store %arg16[%c14_93, %c0_94], %301 {strides = array<i32>} : memref<16x64xf32, #tpu.memory_space<vmem>>, vector<2x32xf32>,
    %303 = vector.extract_strided_slice %300 {offsets = [2, 0], sizes = [2, 32], strides = [1, 1]} : vector<4x32xf32> to vector<2x32xf32>
    %c0_95 = arith.constant 0 : index
    %c32_96 = arith.constant 32 : index
    %304 = vector.load %arg16[%c0_95, %c32_96] : memref<16x64xf32, #tpu.memory_space<vmem>>, vector<2x32xf32>
    tpu.vector_store %arg16[%c0_95, %c32_96], %303 {strides = array<i32>} : memref<16x64xf32, #tpu.memory_space<vmem>>, vector<2x32xf32>,
    %c0_97 = arith.constant 0 : index
    %c0_98 = arith.constant 0 : index
    %305 = vector.load %arg16[%c0_97, %c0_98] : memref<16x64xf32, #tpu.memory_space<vmem>>, vector<16x64xf32>
    %c0_99 = arith.constant 0 : index
    %c0_100 = arith.constant 0 : index
    %306 = vector.load %arg4[%c0_99, %c0_100] : memref<64x256xf32, #tpu.memory_space<vmem>>, vector<64x256xf32>
    %cst_101 = arith.constant dense<0.000000e+00> : vector<16x256xf32>
    %307 = tpu.matmul %305, %306, %cst_101 {dimension_numbers = #tpu.dot_dimension_numbers<[1], [0], [0], [1], [0, 0, 1, 1], [], []>} : vector<16x64xf32>, vector<64x256xf32>, vector<16x256xf32> -> vector<16x256xf32>
    %c0_102 = arith.constant 0 : index
    %c0_103 = arith.constant 0 : index
    %308 = vector.load %arg6[%c0_102, %c0_103] : memref<1x256xf32, #tpu.memory_space<vmem>>, vector<1x256xf32>
    %309 = vector.broadcast %308 : vector<1x256xf32> to vector<16x256xf32>
    %310 = arith.addf %307, %309 : vector<16x256xf32>
    %c0_104 = arith.constant 0 : index
    %c0_105 = arith.constant 0 : index
    %311 = vector.load %arg15[%c0_104, %c0_105] : memref<16x256xf32, #tpu.memory_space<vmem>>, vector<16x256xf32>
    tpu.vector_store %arg15[%c0_104, %c0_105], %310 {strides = array<i32>} : memref<16x256xf32, #tpu.memory_space<vmem>>, vector<16x256xf32>,
    %c0_106 = arith.constant 0 : index
    %c0_107 = arith.constant 0 : index
    %312 = vector.load %arg5[%c0_106, %c0_107] : memref<32x256xf32, #tpu.memory_space<vmem>>, vector<32x256xf32>
    %cst_108 = arith.constant dense<0.000000e+00> : vector<4x256xf32>
    %313 = tpu.matmul %0, %312, %cst_108 {dimension_numbers = #tpu.dot_dimension_numbers<[1], [0], [0], [1], [0, 0, 1, 1], [], []>} : vector<4x32xf32>, vector<32x256xf32>, vector<4x256xf32> -> vector<4x256xf32>
    %314 = vector.extract_strided_slice %313 {offsets = [0, 0], sizes = [2, 128], strides = [1, 1]} : vector<4x256xf32> to vector<2x128xf32>
    %c0_109 = arith.constant 0 : index
    %c0_110 = arith.constant 0 : index
    %315 = vector.load %arg15[%c0_109, %c0_110] : memref<16x256xf32, #tpu.memory_space<vmem>>, vector<2x128xf32>
    %316 = arith.addf %314, %315 : vector<2x128xf32>
    %317 = vector.extract_strided_slice %313 {offsets = [2, 128], sizes = [2, 128], strides = [1, 1]} : vector<4x256xf32> to vector<2x128xf32>
    %c14_111 = arith.constant 14 : index
    %c128_112 = arith.constant 128 : index
    %318 = vector.load %arg15[%c14_111, %c128_112] : memref<16x256xf32, #tpu.memory_space<vmem>>, vector<2x128xf32>
    %319 = arith.addf %317, %318 : vector<2x128xf32>
    %320 = tpu.concatenate %316, %319 in 0 : vector<2x128xf32>, vector<2x128xf32> -> vector<4x128xf32>
    %321 = vector.extract_strided_slice %320 {offsets = [0, 0], sizes = [4, 32], strides = [1, 1]} : vector<4x128xf32> to vector<4x32xf32>
    %322 = arith.negf %321 : vector<4x32xf32>
    %323 = math.exp %322 : vector<4x32xf32>
    %cst_113 = arith.constant 1.000000e+00 : f32
    %324 = vector.broadcast %cst_113 : f32 to vector<4x32xf32>
    %325 = arith.addf %324, %323 : vector<4x32xf32>
    %326 = arith.divf %324, %325 : vector<4x32xf32>
    %327 = vector.extract_strided_slice %320 {offsets = [0, 32], sizes = [4, 32], strides = [1, 1]} : vector<4x128xf32> to vector<4x32xf32>
    %328 = arith.negf %327 : vector<4x32xf32>
    %329 = math.exp %328 : vector<4x32xf32>
    %cst_114 = arith.constant 1.000000e+00 : f32
    %330 = vector.broadcast %cst_114 : f32 to vector<4x32xf32>
    %331 = arith.addf %330, %329 : vector<4x32xf32>
    %332 = arith.divf %330, %331 : vector<4x32xf32>
    %333 = vector.extract_strided_slice %320 {offsets = [0, 64], sizes = [4, 32], strides = [1, 1]} : vector<4x128xf32> to vector<4x32xf32>
    %334 = math.tanh %333 : vector<4x32xf32>
    %335 = vector.extract_strided_slice %320 {offsets = [0, 96], sizes = [4, 32], strides = [1, 1]} : vector<4x128xf32> to vector<4x32xf32>
    %336 = arith.negf %335 : vector<4x32xf32>
    %337 = math.exp %336 : vector<4x32xf32>
    %cst_115 = arith.constant 1.000000e+00 : f32
    %338 = vector.broadcast %cst_115 : f32 to vector<4x32xf32>
    %339 = arith.addf %338, %337 : vector<4x32xf32>
    %340 = arith.divf %338, %339 : vector<4x32xf32>
    %341 = arith.mulf %332, %0 : vector<4x32xf32>
    %342 = arith.mulf %326, %334 : vector<4x32xf32>
    %343 = arith.addf %341, %342 : vector<4x32xf32>
    %344 = math.tanh %343 : vector<4x32xf32>
    %345 = arith.mulf %340, %344 : vector<4x32xf32>
    %346 = vector.extract_strided_slice %345 {offsets = [0, 0], sizes = [2, 32], strides = [1, 1]} : vector<4x32xf32> to vector<2x32xf32>
    %c0_116 = arith.constant 0 : index
    %c0_117 = arith.constant 0 : index
    %347 = vector.load %arg17[%c0_116, %c0_117] : memref<16x64xf32, #tpu.memory_space<vmem>>, vector<2x32xf32>
    tpu.vector_store %arg17[%c0_116, %c0_117], %346 {strides = array<i32>} : memref<16x64xf32, #tpu.memory_space<vmem>>, vector<2x32xf32>,
    %348 = vector.extract_strided_slice %345 {offsets = [2, 0], sizes = [2, 32], strides = [1, 1]} : vector<4x32xf32> to vector<2x32xf32>
    %c14_118 = arith.constant 14 : index
    %c32_119 = arith.constant 32 : index
    %349 = vector.load %arg17[%c14_118, %c32_119] : memref<16x64xf32, #tpu.memory_space<vmem>>, vector<2x32xf32>
    tpu.vector_store %arg17[%c14_118, %c32_119], %348 {strides = array<i32>} : memref<16x64xf32, #tpu.memory_space<vmem>>, vector<2x32xf32>,
    %cst_120 = arith.constant dense<0.000000e+00> : vector<4x256xf32>
    %350 = tpu.matmul %345, %312, %cst_120 {dimension_numbers = #tpu.dot_dimension_numbers<[1], [0], [0], [1], [0, 0, 1, 1], [], []>} : vector<4x32xf32>, vector<32x256xf32>, vector<4x256xf32> -> vector<4x256xf32>
    %351 = vector.extract_strided_slice %350 {offsets = [0, 0], sizes = [2, 128], strides = [1, 1]} : vector<4x256xf32> to vector<2x128xf32>
    %c2_121 = arith.constant 2 : index
    %c0_122 = arith.constant 0 : index
    %352 = vector.load %arg15[%c2_121, %c0_122] : memref<16x256xf32, #tpu.memory_space<vmem>>, vector<2x128xf32>
    %353 = arith.addf %351, %352 : vector<2x128xf32>
    %354 = vector.extract_strided_slice %350 {offsets = [2, 128], sizes = [2, 128], strides = [1, 1]} : vector<4x256xf32> to vector<2x128xf32>
    %c12_123 = arith.constant 12 : index
    %c128_124 = arith.constant 128 : index
    %355 = vector.load %arg15[%c12_123, %c128_124] : memref<16x256xf32, #tpu.memory_space<vmem>>, vector<2x128xf32>
    %356 = arith.addf %354, %355 : vector<2x128xf32>
    %357 = tpu.concatenate %353, %356 in 0 : vector<2x128xf32>, vector<2x128xf32> -> vector<4x128xf32>
    %358 = vector.extract_strided_slice %357 {offsets = [0, 0], sizes = [4, 32], strides = [1, 1]} : vector<4x128xf32> to vector<4x32xf32>
    %359 = arith.negf %358 : vector<4x32xf32>
    %360 = math.exp %359 : vector<4x32xf32>
    %cst_125 = arith.constant 1.000000e+00 : f32
    %361 = vector.broadcast %cst_125 : f32 to vector<4x32xf32>
    %362 = arith.addf %361, %360 : vector<4x32xf32>
    %363 = arith.divf %361, %362 : vector<4x32xf32>
    %364 = vector.extract_strided_slice %357 {offsets = [0, 32], sizes = [4, 32], strides = [1, 1]} : vector<4x128xf32> to vector<4x32xf32>
    %365 = arith.negf %364 : vector<4x32xf32>
    %366 = math.exp %365 : vector<4x32xf32>
    %cst_126 = arith.constant 1.000000e+00 : f32
    %367 = vector.broadcast %cst_126 : f32 to vector<4x32xf32>
    %368 = arith.addf %367, %366 : vector<4x32xf32>
    %369 = arith.divf %367, %368 : vector<4x32xf32>
    %370 = vector.extract_strided_slice %357 {offsets = [0, 64], sizes = [4, 32], strides = [1, 1]} : vector<4x128xf32> to vector<4x32xf32>
    %371 = math.tanh %370 : vector<4x32xf32>
    %372 = vector.extract_strided_slice %357 {offsets = [0, 96], sizes = [4, 32], strides = [1, 1]} : vector<4x128xf32> to vector<4x32xf32>
    %373 = arith.negf %372 : vector<4x32xf32>
    %374 = math.exp %373 : vector<4x32xf32>
    %cst_127 = arith.constant 1.000000e+00 : f32
    %375 = vector.broadcast %cst_127 : f32 to vector<4x32xf32>
    %376 = arith.addf %375, %374 : vector<4x32xf32>
    %377 = arith.divf %375, %376 : vector<4x32xf32>
    %378 = arith.mulf %369, %343 : vector<4x32xf32>
    %379 = arith.mulf %363, %371 : vector<4x32xf32>
    %380 = arith.addf %378, %379 : vector<4x32xf32>
    %381 = math.tanh %380 : vector<4x32xf32>
    %382 = arith.mulf %377, %381 : vector<4x32xf32>
    %383 = vector.extract_strided_slice %382 {offsets = [0, 0], sizes = [2, 32], strides = [1, 1]} : vector<4x32xf32> to vector<2x32xf32>
    %c2_128 = arith.constant 2 : index
    %c0_129 = arith.constant 0 : index
    %384 = vector.load %arg17[%c2_128, %c0_129] : memref<16x64xf32, #tpu.memory_space<vmem>>, vector<2x32xf32>
    tpu.vector_store %arg17[%c2_128, %c0_129], %383 {strides = array<i32>} : memref<16x64xf32, #tpu.memory_space<vmem>>, vector<2x32xf32>,
    %385 = vector.extract_strided_slice %382 {offsets = [2, 0], sizes = [2, 32], strides = [1, 1]} : vector<4x32xf32> to vector<2x32xf32>
    %c12_130 = arith.constant 12 : index
    %c32_131 = arith.constant 32 : index
    %386 = vector.load %arg17[%c12_130, %c32_131] : memref<16x64xf32, #tpu.memory_space<vmem>>, vector<2x32xf32>
    tpu.vector_store %arg17[%c12_130, %c32_131], %385 {strides = array<i32>} : memref<16x64xf32, #tpu.memory_space<vmem>>, vector<2x32xf32>,
    %cst_132 = arith.constant dense<0.000000e+00> : vector<4x256xf32>
    %387 = tpu.matmul %382, %312, %cst_132 {dimension_numbers = #tpu.dot_dimension_numbers<[1], [0], [0], [1], [0, 0, 1, 1], [], []>} : vector<4x32xf32>, vector<32x256xf32>, vector<4x256xf32> -> vector<4x256xf32>
    %388 = vector.extract_strided_slice %387 {offsets = [0, 0], sizes = [2, 128], strides = [1, 1]} : vector<4x256xf32> to vector<2x128xf32>
    %c4_133 = arith.constant 4 : index
    %c0_134 = arith.constant 0 : index
    %389 = vector.load %arg15[%c4_133, %c0_134] : memref<16x256xf32, #tpu.memory_space<vmem>>, vector<2x128xf32>
    %390 = arith.addf %388, %389 : vector<2x128xf32>
    %391 = vector.extract_strided_slice %387 {offsets = [2, 128], sizes = [2, 128], strides = [1, 1]} : vector<4x256xf32> to vector<2x128xf32>
    %c10_135 = arith.constant 10 : index
    %c128_136 = arith.constant 128 : index
    %392 = vector.load %arg15[%c10_135, %c128_136] : memref<16x256xf32, #tpu.memory_space<vmem>>, vector<2x128xf32>
    %393 = arith.addf %391, %392 : vector<2x128xf32>
    %394 = tpu.concatenate %390, %393 in 0 : vector<2x128xf32>, vector<2x128xf32> -> vector<4x128xf32>
    %395 = vector.extract_strided_slice %394 {offsets = [0, 0], sizes = [4, 32], strides = [1, 1]} : vector<4x128xf32> to vector<4x32xf32>
    %396 = arith.negf %395 : vector<4x32xf32>
    %397 = math.exp %396 : vector<4x32xf32>
    %cst_137 = arith.constant 1.000000e+00 : f32
    %398 = vector.broadcast %cst_137 : f32 to vector<4x32xf32>
    %399 = arith.addf %398, %397 : vector<4x32xf32>
    %400 = arith.divf %398, %399 : vector<4x32xf32>
    %401 = vector.extract_strided_slice %394 {offsets = [0, 32], sizes = [4, 32], strides = [1, 1]} : vector<4x128xf32> to vector<4x32xf32>
    %402 = arith.negf %401 : vector<4x32xf32>
    %403 = math.exp %402 : vector<4x32xf32>
    %cst_138 = arith.constant 1.000000e+00 : f32
    %404 = vector.broadcast %cst_138 : f32 to vector<4x32xf32>
    %405 = arith.addf %404, %403 : vector<4x32xf32>
    %406 = arith.divf %404, %405 : vector<4x32xf32>
    %407 = vector.extract_strided_slice %394 {offsets = [0, 64], sizes = [4, 32], strides = [1, 1]} : vector<4x128xf32> to vector<4x32xf32>
    %408 = math.tanh %407 : vector<4x32xf32>
    %409 = vector.extract_strided_slice %394 {offsets = [0, 96], sizes = [4, 32], strides = [1, 1]} : vector<4x128xf32> to vector<4x32xf32>
    %410 = arith.negf %409 : vector<4x32xf32>
    %411 = math.exp %410 : vector<4x32xf32>
    %cst_139 = arith.constant 1.000000e+00 : f32
    %412 = vector.broadcast %cst_139 : f32 to vector<4x32xf32>
    %413 = arith.addf %412, %411 : vector<4x32xf32>
    %414 = arith.divf %412, %413 : vector<4x32xf32>
    %415 = arith.mulf %406, %380 : vector<4x32xf32>
    %416 = arith.mulf %400, %408 : vector<4x32xf32>
    %417 = arith.addf %415, %416 : vector<4x32xf32>
    %418 = math.tanh %417 : vector<4x32xf32>
    %419 = arith.mulf %414, %418 : vector<4x32xf32>
    %420 = vector.extract_strided_slice %419 {offsets = [0, 0], sizes = [2, 32], strides = [1, 1]} : vector<4x32xf32> to vector<2x32xf32>
    %c4_140 = arith.constant 4 : index
    %c0_141 = arith.constant 0 : index
    %421 = vector.load %arg17[%c4_140, %c0_141] : memref<16x64xf32, #tpu.memory_space<vmem>>, vector<2x32xf32>
    tpu.vector_store %arg17[%c4_140, %c0_141], %420 {strides = array<i32>} : memref<16x64xf32, #tpu.memory_space<vmem>>, vector<2x32xf32>,
    %422 = vector.extract_strided_slice %419 {offsets = [2, 0], sizes = [2, 32], strides = [1, 1]} : vector<4x32xf32> to vector<2x32xf32>
    %c10_142 = arith.constant 10 : index
    %c32_143 = arith.constant 32 : index
    %423 = vector.load %arg17[%c10_142, %c32_143] : memref<16x64xf32, #tpu.memory_space<vmem>>, vector<2x32xf32>
    tpu.vector_store %arg17[%c10_142, %c32_143], %422 {strides = array<i32>} : memref<16x64xf32, #tpu.memory_space<vmem>>, vector<2x32xf32>,
    %cst_144 = arith.constant dense<0.000000e+00> : vector<4x256xf32>
    %424 = tpu.matmul %419, %312, %cst_144 {dimension_numbers = #tpu.dot_dimension_numbers<[1], [0], [0], [1], [0, 0, 1, 1], [], []>} : vector<4x32xf32>, vector<32x256xf32>, vector<4x256xf32> -> vector<4x256xf32>
    %425 = vector.extract_strided_slice %424 {offsets = [0, 0], sizes = [2, 128], strides = [1, 1]} : vector<4x256xf32> to vector<2x128xf32>
    %c6_145 = arith.constant 6 : index
    %c0_146 = arith.constant 0 : index
    %426 = vector.load %arg15[%c6_145, %c0_146] : memref<16x256xf32, #tpu.memory_space<vmem>>, vector<2x128xf32>
    %427 = arith.addf %425, %426 : vector<2x128xf32>
    %428 = vector.extract_strided_slice %424 {offsets = [2, 128], sizes = [2, 128], strides = [1, 1]} : vector<4x256xf32> to vector<2x128xf32>
    %c8_147 = arith.constant 8 : index
    %c128_148 = arith.constant 128 : index
    %429 = vector.load %arg15[%c8_147, %c128_148] : memref<16x256xf32, #tpu.memory_space<vmem>>, vector<2x128xf32>
    %430 = arith.addf %428, %429 : vector<2x128xf32>
    %431 = tpu.concatenate %427, %430 in 0 : vector<2x128xf32>, vector<2x128xf32> -> vector<4x128xf32>
    %432 = vector.extract_strided_slice %431 {offsets = [0, 0], sizes = [4, 32], strides = [1, 1]} : vector<4x128xf32> to vector<4x32xf32>
    %433 = arith.negf %432 : vector<4x32xf32>
    %434 = math.exp %433 : vector<4x32xf32>
    %cst_149 = arith.constant 1.000000e+00 : f32
    %435 = vector.broadcast %cst_149 : f32 to vector<4x32xf32>
    %436 = arith.addf %435, %434 : vector<4x32xf32>
    %437 = arith.divf %435, %436 : vector<4x32xf32>
    %438 = vector.extract_strided_slice %431 {offsets = [0, 32], sizes = [4, 32], strides = [1, 1]} : vector<4x128xf32> to vector<4x32xf32>
    %439 = arith.negf %438 : vector<4x32xf32>
    %440 = math.exp %439 : vector<4x32xf32>
    %cst_150 = arith.constant 1.000000e+00 : f32
    %441 = vector.broadcast %cst_150 : f32 to vector<4x32xf32>
    %442 = arith.addf %441, %440 : vector<4x32xf32>
    %443 = arith.divf %441, %442 : vector<4x32xf32>
    %444 = vector.extract_strided_slice %431 {offsets = [0, 64], sizes = [4, 32], strides = [1, 1]} : vector<4x128xf32> to vector<4x32xf32>
    %445 = math.tanh %444 : vector<4x32xf32>
    %446 = vector.extract_strided_slice %431 {offsets = [0, 96], sizes = [4, 32], strides = [1, 1]} : vector<4x128xf32> to vector<4x32xf32>
    %447 = arith.negf %446 : vector<4x32xf32>
    %448 = math.exp %447 : vector<4x32xf32>
    %cst_151 = arith.constant 1.000000e+00 : f32
    %449 = vector.broadcast %cst_151 : f32 to vector<4x32xf32>
    %450 = arith.addf %449, %448 : vector<4x32xf32>
    %451 = arith.divf %449, %450 : vector<4x32xf32>
    %452 = arith.mulf %443, %417 : vector<4x32xf32>
    %453 = arith.mulf %437, %445 : vector<4x32xf32>
    %454 = arith.addf %452, %453 : vector<4x32xf32>
    %455 = math.tanh %454 : vector<4x32xf32>
    %456 = arith.mulf %451, %455 : vector<4x32xf32>
    %457 = vector.extract_strided_slice %456 {offsets = [0, 0], sizes = [2, 32], strides = [1, 1]} : vector<4x32xf32> to vector<2x32xf32>
    %c6_152 = arith.constant 6 : index
    %c0_153 = arith.constant 0 : index
    %458 = vector.load %arg17[%c6_152, %c0_153] : memref<16x64xf32, #tpu.memory_space<vmem>>, vector<2x32xf32>
    tpu.vector_store %arg17[%c6_152, %c0_153], %457 {strides = array<i32>} : memref<16x64xf32, #tpu.memory_space<vmem>>, vector<2x32xf32>,
    %459 = vector.extract_strided_slice %456 {offsets = [2, 0], sizes = [2, 32], strides = [1, 1]} : vector<4x32xf32> to vector<2x32xf32>
    %c8_154 = arith.constant 8 : index
    %c32_155 = arith.constant 32 : index
    %460 = vector.load %arg17[%c8_154, %c32_155] : memref<16x64xf32, #tpu.memory_space<vmem>>, vector<2x32xf32>
    tpu.vector_store %arg17[%c8_154, %c32_155], %459 {strides = array<i32>} : memref<16x64xf32, #tpu.memory_space<vmem>>, vector<2x32xf32>,
    %cst_156 = arith.constant dense<0.000000e+00> : vector<4x256xf32>
    %461 = tpu.matmul %456, %312, %cst_156 {dimension_numbers = #tpu.dot_dimension_numbers<[1], [0], [0], [1], [0, 0, 1, 1], [], []>} : vector<4x32xf32>, vector<32x256xf32>, vector<4x256xf32> -> vector<4x256xf32>
    %462 = vector.extract_strided_slice %461 {offsets = [0, 0], sizes = [2, 128], strides = [1, 1]} : vector<4x256xf32> to vector<2x128xf32>
    %c8_157 = arith.constant 8 : index
    %c0_158 = arith.constant 0 : index
    %463 = vector.load %arg15[%c8_157, %c0_158] : memref<16x256xf32, #tpu.memory_space<vmem>>, vector<2x128xf32>
    %464 = arith.addf %462, %463 : vector<2x128xf32>
    %465 = vector.extract_strided_slice %461 {offsets = [2, 128], sizes = [2, 128], strides = [1, 1]} : vector<4x256xf32> to vector<2x128xf32>
    %c6_159 = arith.constant 6 : index
    %c128_160 = arith.constant 128 : index
    %466 = vector.load %arg15[%c6_159, %c128_160] : memref<16x256xf32, #tpu.memory_space<vmem>>, vector<2x128xf32>
    %467 = arith.addf %465, %466 : vector<2x128xf32>
    %468 = tpu.concatenate %464, %467 in 0 : vector<2x128xf32>, vector<2x128xf32> -> vector<4x128xf32>
    %469 = vector.extract_strided_slice %468 {offsets = [0, 0], sizes = [4, 32], strides = [1, 1]} : vector<4x128xf32> to vector<4x32xf32>
    %470 = arith.negf %469 : vector<4x32xf32>
    %471 = math.exp %470 : vector<4x32xf32>
    %cst_161 = arith.constant 1.000000e+00 : f32
    %472 = vector.broadcast %cst_161 : f32 to vector<4x32xf32>
    %473 = arith.addf %472, %471 : vector<4x32xf32>
    %474 = arith.divf %472, %473 : vector<4x32xf32>
    %475 = vector.extract_strided_slice %468 {offsets = [0, 32], sizes = [4, 32], strides = [1, 1]} : vector<4x128xf32> to vector<4x32xf32>
    %476 = arith.negf %475 : vector<4x32xf32>
    %477 = math.exp %476 : vector<4x32xf32>
    %cst_162 = arith.constant 1.000000e+00 : f32
    %478 = vector.broadcast %cst_162 : f32 to vector<4x32xf32>
    %479 = arith.addf %478, %477 : vector<4x32xf32>
    %480 = arith.divf %478, %479 : vector<4x32xf32>
    %481 = vector.extract_strided_slice %468 {offsets = [0, 64], sizes = [4, 32], strides = [1, 1]} : vector<4x128xf32> to vector<4x32xf32>
    %482 = math.tanh %481 : vector<4x32xf32>
    %483 = vector.extract_strided_slice %468 {offsets = [0, 96], sizes = [4, 32], strides = [1, 1]} : vector<4x128xf32> to vector<4x32xf32>
    %484 = arith.negf %483 : vector<4x32xf32>
    %485 = math.exp %484 : vector<4x32xf32>
    %cst_163 = arith.constant 1.000000e+00 : f32
    %486 = vector.broadcast %cst_163 : f32 to vector<4x32xf32>
    %487 = arith.addf %486, %485 : vector<4x32xf32>
    %488 = arith.divf %486, %487 : vector<4x32xf32>
    %489 = arith.mulf %480, %454 : vector<4x32xf32>
    %490 = arith.mulf %474, %482 : vector<4x32xf32>
    %491 = arith.addf %489, %490 : vector<4x32xf32>
    %492 = math.tanh %491 : vector<4x32xf32>
    %493 = arith.mulf %488, %492 : vector<4x32xf32>
    %494 = vector.extract_strided_slice %493 {offsets = [0, 0], sizes = [2, 32], strides = [1, 1]} : vector<4x32xf32> to vector<2x32xf32>
    %c8_164 = arith.constant 8 : index
    %c0_165 = arith.constant 0 : index
    %495 = vector.load %arg17[%c8_164, %c0_165] : memref<16x64xf32, #tpu.memory_space<vmem>>, vector<2x32xf32>
    tpu.vector_store %arg17[%c8_164, %c0_165], %494 {strides = array<i32>} : memref<16x64xf32, #tpu.memory_space<vmem>>, vector<2x32xf32>,
    %496 = vector.extract_strided_slice %493 {offsets = [2, 0], sizes = [2, 32], strides = [1, 1]} : vector<4x32xf32> to vector<2x32xf32>
    %c6_166 = arith.constant 6 : index
    %c32_167 = arith.constant 32 : index
    %497 = vector.load %arg17[%c6_166, %c32_167] : memref<16x64xf32, #tpu.memory_space<vmem>>, vector<2x32xf32>
    tpu.vector_store %arg17[%c6_166, %c32_167], %496 {strides = array<i32>} : memref<16x64xf32, #tpu.memory_space<vmem>>, vector<2x32xf32>,
    %cst_168 = arith.constant dense<0.000000e+00> : vector<4x256xf32>
    %498 = tpu.matmul %493, %312, %cst_168 {dimension_numbers = #tpu.dot_dimension_numbers<[1], [0], [0], [1], [0, 0, 1, 1], [], []>} : vector<4x32xf32>, vector<32x256xf32>, vector<4x256xf32> -> vector<4x256xf32>
    %499 = vector.extract_strided_slice %498 {offsets = [0, 0], sizes = [2, 128], strides = [1, 1]} : vector<4x256xf32> to vector<2x128xf32>
    %c10_169 = arith.constant 10 : index
    %c0_170 = arith.constant 0 : index
    %500 = vector.load %arg15[%c10_169, %c0_170] : memref<16x256xf32, #tpu.memory_space<vmem>>, vector<2x128xf32>
    %501 = arith.addf %499, %500 : vector<2x128xf32>
    %502 = vector.extract_strided_slice %498 {offsets = [2, 128], sizes = [2, 128], strides = [1, 1]} : vector<4x256xf32> to vector<2x128xf32>
    %c4_171 = arith.constant 4 : index
    %c128_172 = arith.constant 128 : index
    %503 = vector.load %arg15[%c4_171, %c128_172] : memref<16x256xf32, #tpu.memory_space<vmem>>, vector<2x128xf32>
    %504 = arith.addf %502, %503 : vector<2x128xf32>
    %505 = tpu.concatenate %501, %504 in 0 : vector<2x128xf32>, vector<2x128xf32> -> vector<4x128xf32>
    %506 = vector.extract_strided_slice %505 {offsets = [0, 0], sizes = [4, 32], strides = [1, 1]} : vector<4x128xf32> to vector<4x32xf32>
    %507 = arith.negf %506 : vector<4x32xf32>
    %508 = math.exp %507 : vector<4x32xf32>
    %cst_173 = arith.constant 1.000000e+00 : f32
    %509 = vector.broadcast %cst_173 : f32 to vector<4x32xf32>
    %510 = arith.addf %509, %508 : vector<4x32xf32>
    %511 = arith.divf %509, %510 : vector<4x32xf32>
    %512 = vector.extract_strided_slice %505 {offsets = [0, 32], sizes = [4, 32], strides = [1, 1]} : vector<4x128xf32> to vector<4x32xf32>
    %513 = arith.negf %512 : vector<4x32xf32>
    %514 = math.exp %513 : vector<4x32xf32>
    %cst_174 = arith.constant 1.000000e+00 : f32
    %515 = vector.broadcast %cst_174 : f32 to vector<4x32xf32>
    %516 = arith.addf %515, %514 : vector<4x32xf32>
    %517 = arith.divf %515, %516 : vector<4x32xf32>
    %518 = vector.extract_strided_slice %505 {offsets = [0, 64], sizes = [4, 32], strides = [1, 1]} : vector<4x128xf32> to vector<4x32xf32>
    %519 = math.tanh %518 : vector<4x32xf32>
    %520 = vector.extract_strided_slice %505 {offsets = [0, 96], sizes = [4, 32], strides = [1, 1]} : vector<4x128xf32> to vector<4x32xf32>
    %521 = arith.negf %520 : vector<4x32xf32>
    %522 = math.exp %521 : vector<4x32xf32>
    %cst_175 = arith.constant 1.000000e+00 : f32
    %523 = vector.broadcast %cst_175 : f32 to vector<4x32xf32>
    %524 = arith.addf %523, %522 : vector<4x32xf32>
    %525 = arith.divf %523, %524 : vector<4x32xf32>
    %526 = arith.mulf %517, %491 : vector<4x32xf32>
    %527 = arith.mulf %511, %519 : vector<4x32xf32>
    %528 = arith.addf %526, %527 : vector<4x32xf32>
    %529 = math.tanh %528 : vector<4x32xf32>
    %530 = arith.mulf %525, %529 : vector<4x32xf32>
    %531 = vector.extract_strided_slice %530 {offsets = [0, 0], sizes = [2, 32], strides = [1, 1]} : vector<4x32xf32> to vector<2x32xf32>
    %c10_176 = arith.constant 10 : index
    %c0_177 = arith.constant 0 : index
    %532 = vector.load %arg17[%c10_176, %c0_177] : memref<16x64xf32, #tpu.memory_space<vmem>>, vector<2x32xf32>
    tpu.vector_store %arg17[%c10_176, %c0_177], %531 {strides = array<i32>} : memref<16x64xf32, #tpu.memory_space<vmem>>, vector<2x32xf32>,
    %533 = vector.extract_strided_slice %530 {offsets = [2, 0], sizes = [2, 32], strides = [1, 1]} : vector<4x32xf32> to vector<2x32xf32>
    %c4_178 = arith.constant 4 : index
    %c32_179 = arith.constant 32 : index
    %534 = vector.load %arg17[%c4_178, %c32_179] : memref<16x64xf32, #tpu.memory_space<vmem>>, vector<2x32xf32>
    tpu.vector_store %arg17[%c4_178, %c32_179], %533 {strides = array<i32>} : memref<16x64xf32, #tpu.memory_space<vmem>>, vector<2x32xf32>,
    %cst_180 = arith.constant dense<0.000000e+00> : vector<4x256xf32>
    %535 = tpu.matmul %530, %312, %cst_180 {dimension_numbers = #tpu.dot_dimension_numbers<[1], [0], [0], [1], [0, 0, 1, 1], [], []>} : vector<4x32xf32>, vector<32x256xf32>, vector<4x256xf32> -> vector<4x256xf32>
    %536 = vector.extract_strided_slice %535 {offsets = [0, 0], sizes = [2, 128], strides = [1, 1]} : vector<4x256xf32> to vector<2x128xf32>
    %c12_181 = arith.constant 12 : index
    %c0_182 = arith.constant 0 : index
    %537 = vector.load %arg15[%c12_181, %c0_182] : memref<16x256xf32, #tpu.memory_space<vmem>>, vector<2x128xf32>
    %538 = arith.addf %536, %537 : vector<2x128xf32>
    %539 = vector.extract_strided_slice %535 {offsets = [2, 128], sizes = [2, 128], strides = [1, 1]} : vector<4x256xf32> to vector<2x128xf32>
    %c2_183 = arith.constant 2 : index
    %c128_184 = arith.constant 128 : index
    %540 = vector.load %arg15[%c2_183, %c128_184] : memref<16x256xf32, #tpu.memory_space<vmem>>, vector<2x128xf32>
    %541 = arith.addf %539, %540 : vector<2x128xf32>
    %542 = tpu.concatenate %538, %541 in 0 : vector<2x128xf32>, vector<2x128xf32> -> vector<4x128xf32>
    %543 = vector.extract_strided_slice %542 {offsets = [0, 0], sizes = [4, 32], strides = [1, 1]} : vector<4x128xf32> to vector<4x32xf32>
    %544 = arith.negf %543 : vector<4x32xf32>
    %545 = math.exp %544 : vector<4x32xf32>
    %cst_185 = arith.constant 1.000000e+00 : f32
    %546 = vector.broadcast %cst_185 : f32 to vector<4x32xf32>
    %547 = arith.addf %546, %545 : vector<4x32xf32>
    %548 = arith.divf %546, %547 : vector<4x32xf32>
    %549 = vector.extract_strided_slice %542 {offsets = [0, 32], sizes = [4, 32], strides = [1, 1]} : vector<4x128xf32> to vector<4x32xf32>
    %550 = arith.negf %549 : vector<4x32xf32>
    %551 = math.exp %550 : vector<4x32xf32>
    %cst_186 = arith.constant 1.000000e+00 : f32
    %552 = vector.broadcast %cst_186 : f32 to vector<4x32xf32>
    %553 = arith.addf %552, %551 : vector<4x32xf32>
    %554 = arith.divf %552, %553 : vector<4x32xf32>
    %555 = vector.extract_strided_slice %542 {offsets = [0, 64], sizes = [4, 32], strides = [1, 1]} : vector<4x128xf32> to vector<4x32xf32>
    %556 = math.tanh %555 : vector<4x32xf32>
    %557 = vector.extract_strided_slice %542 {offsets = [0, 96], sizes = [4, 32], strides = [1, 1]} : vector<4x128xf32> to vector<4x32xf32>
    %558 = arith.negf %557 : vector<4x32xf32>
    %559 = math.exp %558 : vector<4x32xf32>
    %cst_187 = arith.constant 1.000000e+00 : f32
    %560 = vector.broadcast %cst_187 : f32 to vector<4x32xf32>
    %561 = arith.addf %560, %559 : vector<4x32xf32>
    %562 = arith.divf %560, %561 : vector<4x32xf32>
    %563 = arith.mulf %554, %528 : vector<4x32xf32>
    %564 = arith.mulf %548, %556 : vector<4x32xf32>
    %565 = arith.addf %563, %564 : vector<4x32xf32>
    %566 = math.tanh %565 : vector<4x32xf32>
    %567 = arith.mulf %562, %566 : vector<4x32xf32>
    %568 = vector.extract_strided_slice %567 {offsets = [0, 0], sizes = [2, 32], strides = [1, 1]} : vector<4x32xf32> to vector<2x32xf32>
    %c12_188 = arith.constant 12 : index
    %c0_189 = arith.constant 0 : index
    %569 = vector.load %arg17[%c12_188, %c0_189] : memref<16x64xf32, #tpu.memory_space<vmem>>, vector<2x32xf32>
    tpu.vector_store %arg17[%c12_188, %c0_189], %568 {strides = array<i32>} : memref<16x64xf32, #tpu.memory_space<vmem>>, vector<2x32xf32>,
    %570 = vector.extract_strided_slice %567 {offsets = [2, 0], sizes = [2, 32], strides = [1, 1]} : vector<4x32xf32> to vector<2x32xf32>
    %c2_190 = arith.constant 2 : index
    %c32_191 = arith.constant 32 : index
    %571 = vector.load %arg17[%c2_190, %c32_191] : memref<16x64xf32, #tpu.memory_space<vmem>>, vector<2x32xf32>
    tpu.vector_store %arg17[%c2_190, %c32_191], %570 {strides = array<i32>} : memref<16x64xf32, #tpu.memory_space<vmem>>, vector<2x32xf32>,
    %cst_192 = arith.constant dense<0.000000e+00> : vector<4x256xf32>
    %572 = tpu.matmul %567, %312, %cst_192 {dimension_numbers = #tpu.dot_dimension_numbers<[1], [0], [0], [1], [0, 0, 1, 1], [], []>} : vector<4x32xf32>, vector<32x256xf32>, vector<4x256xf32> -> vector<4x256xf32>
    %573 = vector.extract_strided_slice %572 {offsets = [0, 0], sizes = [2, 128], strides = [1, 1]} : vector<4x256xf32> to vector<2x128xf32>
    %c14_193 = arith.constant 14 : index
    %c0_194 = arith.constant 0 : index
    %574 = vector.load %arg15[%c14_193, %c0_194] : memref<16x256xf32, #tpu.memory_space<vmem>>, vector<2x128xf32>
    %575 = arith.addf %573, %574 : vector<2x128xf32>
    %576 = vector.extract_strided_slice %572 {offsets = [2, 128], sizes = [2, 128], strides = [1, 1]} : vector<4x256xf32> to vector<2x128xf32>
    %c0_195 = arith.constant 0 : index
    %c128_196 = arith.constant 128 : index
    %577 = vector.load %arg15[%c0_195, %c128_196] : memref<16x256xf32, #tpu.memory_space<vmem>>, vector<2x128xf32>
    %578 = arith.addf %576, %577 : vector<2x128xf32>
    %579 = tpu.concatenate %575, %578 in 0 : vector<2x128xf32>, vector<2x128xf32> -> vector<4x128xf32>
    %580 = vector.extract_strided_slice %579 {offsets = [0, 0], sizes = [4, 32], strides = [1, 1]} : vector<4x128xf32> to vector<4x32xf32>
    %581 = arith.negf %580 : vector<4x32xf32>
    %582 = math.exp %581 : vector<4x32xf32>
    %cst_197 = arith.constant 1.000000e+00 : f32
    %583 = vector.broadcast %cst_197 : f32 to vector<4x32xf32>
    %584 = arith.addf %583, %582 : vector<4x32xf32>
    %585 = arith.divf %583, %584 : vector<4x32xf32>
    %586 = vector.extract_strided_slice %579 {offsets = [0, 32], sizes = [4, 32], strides = [1, 1]} : vector<4x128xf32> to vector<4x32xf32>
    %587 = arith.negf %586 : vector<4x32xf32>
    %588 = math.exp %587 : vector<4x32xf32>
    %cst_198 = arith.constant 1.000000e+00 : f32
    %589 = vector.broadcast %cst_198 : f32 to vector<4x32xf32>
    %590 = arith.addf %589, %588 : vector<4x32xf32>
    %591 = arith.divf %589, %590 : vector<4x32xf32>
    %592 = vector.extract_strided_slice %579 {offsets = [0, 64], sizes = [4, 32], strides = [1, 1]} : vector<4x128xf32> to vector<4x32xf32>
    %593 = math.tanh %592 : vector<4x32xf32>
    %594 = vector.extract_strided_slice %579 {offsets = [0, 96], sizes = [4, 32], strides = [1, 1]} : vector<4x128xf32> to vector<4x32xf32>
    %595 = arith.negf %594 : vector<4x32xf32>
    %596 = math.exp %595 : vector<4x32xf32>
    %cst_199 = arith.constant 1.000000e+00 : f32
    %597 = vector.broadcast %cst_199 : f32 to vector<4x32xf32>
    %598 = arith.addf %597, %596 : vector<4x32xf32>
    %599 = arith.divf %597, %598 : vector<4x32xf32>
    %600 = arith.mulf %591, %565 : vector<4x32xf32>
    %601 = arith.mulf %585, %593 : vector<4x32xf32>
    %602 = arith.addf %600, %601 : vector<4x32xf32>
    %603 = math.tanh %602 : vector<4x32xf32>
    %604 = arith.mulf %599, %603 : vector<4x32xf32>
    %605 = vector.extract_strided_slice %604 {offsets = [0, 0], sizes = [2, 32], strides = [1, 1]} : vector<4x32xf32> to vector<2x32xf32>
    %c14_200 = arith.constant 14 : index
    %c0_201 = arith.constant 0 : index
    %606 = vector.load %arg17[%c14_200, %c0_201] : memref<16x64xf32, #tpu.memory_space<vmem>>, vector<2x32xf32>
    tpu.vector_store %arg17[%c14_200, %c0_201], %605 {strides = array<i32>} : memref<16x64xf32, #tpu.memory_space<vmem>>, vector<2x32xf32>,
    %607 = vector.extract_strided_slice %604 {offsets = [2, 0], sizes = [2, 32], strides = [1, 1]} : vector<4x32xf32> to vector<2x32xf32>
    %c0_202 = arith.constant 0 : index
    %c32_203 = arith.constant 32 : index
    %608 = vector.load %arg17[%c0_202, %c32_203] : memref<16x64xf32, #tpu.memory_space<vmem>>, vector<2x32xf32>
    tpu.vector_store %arg17[%c0_202, %c32_203], %607 {strides = array<i32>} : memref<16x64xf32, #tpu.memory_space<vmem>>, vector<2x32xf32>,
    %c14_204 = arith.constant 14 : index
    %c0_205 = arith.constant 0 : index
    %609 = vector.load %arg17[%c14_204, %c0_205] : memref<16x64xf32, #tpu.memory_space<vmem>>, vector<2x64xf32>
    %c0_206 = arith.constant 0 : index
    %c0_207 = arith.constant 0 : index
    %610 = vector.load %arg13[%c0_206, %c0_207] : memref<2x128xf32, #tpu.memory_space<vmem>>, vector<2x64xf32>
    tpu.vector_store %arg13[%c0_206, %c0_207], %609 {strides = array<i32>} : memref<2x128xf32, #tpu.memory_space<vmem>>, vector<2x64xf32>,
    %611 = vector.extract_strided_slice %300 {offsets = [0, 0], sizes = [2, 32], strides = [1, 1]} : vector<4x32xf32> to vector<2x32xf32>
    %c0_208 = arith.constant 0 : index
    %c64 = arith.constant 64 : index
    %612 = vector.load %arg13[%c0_208, %c64] : memref<2x128xf32, #tpu.memory_space<vmem>>, vector<2x32xf32>
    tpu.vector_store %arg13[%c0_208, %c64], %611 {strides = array<i32>} : memref<2x128xf32, #tpu.memory_space<vmem>>, vector<2x32xf32>,
    %613 = vector.extract_strided_slice %604 {offsets = [2, 0], sizes = [2, 32], strides = [1, 1]} : vector<4x32xf32> to vector<2x32xf32>
    %c0_209 = arith.constant 0 : index
    %c96 = arith.constant 96 : index
    %614 = vector.load %arg13[%c0_209, %c96] : memref<2x128xf32, #tpu.memory_space<vmem>>, vector<2x32xf32>
    tpu.vector_store %arg13[%c0_209, %c96], %613 {strides = array<i32>} : memref<2x128xf32, #tpu.memory_space<vmem>>, vector<2x32xf32>,
    %c0_210 = arith.constant 0 : index
    %c0_211 = arith.constant 0 : index
    %615 = vector.load %arg0[%c0_210, %c0_211] : memref<16x16xf32, #tpu.memory_space<vmem>>, vector<16x16xf32>
    %c0_212 = arith.constant 0 : index
    %c0_213 = arith.constant 0 : index
    %616 = vector.load %arg7[%c0_212, %c0_213] : memref<16x256xf32, #tpu.memory_space<vmem>>, vector<16x256xf32>
    %cst_214 = arith.constant dense<0.000000e+00> : vector<16x256xf32>
    %617 = tpu.matmul %615, %616, %cst_214 {dimension_numbers = #tpu.dot_dimension_numbers<[1], [0], [0], [1], [0, 0, 1, 1], [], []>} : vector<16x16xf32>, vector<16x256xf32>, vector<16x256xf32> -> vector<16x256xf32>
    %c0_215 = arith.constant 0 : index
    %c0_216 = arith.constant 0 : index
    %618 = vector.load %arg9[%c0_215, %c0_216] : memref<1x256xf32, #tpu.memory_space<vmem>>, vector<1x256xf32>
    %619 = vector.broadcast %618 : vector<1x256xf32> to vector<16x256xf32>
    %620 = arith.addf %617, %619 : vector<16x256xf32>
    %c0_217 = arith.constant 0 : index
    %c0_218 = arith.constant 0 : index
    %621 = vector.load %arg15[%c0_217, %c0_218] : memref<16x256xf32, #tpu.memory_space<vmem>>, vector<16x256xf32>
    tpu.vector_store %arg15[%c0_217, %c0_218], %620 {strides = array<i32>} : memref<16x256xf32, #tpu.memory_space<vmem>>, vector<16x256xf32>,
    %c0_219 = arith.constant 0 : index
    %c0_220 = arith.constant 0 : index
    %622 = vector.load %arg8[%c0_219, %c0_220] : memref<32x256xf32, #tpu.memory_space<vmem>>, vector<32x256xf32>
    %cst_221 = arith.constant dense<0.000000e+00> : vector<4x256xf32>
    %623 = tpu.matmul %300, %622, %cst_221 {dimension_numbers = #tpu.dot_dimension_numbers<[1], [0], [0], [1], [0, 0, 1, 1], [], []>} : vector<4x32xf32>, vector<32x256xf32>, vector<4x256xf32> -> vector<4x256xf32>
    %624 = vector.extract_strided_slice %623 {offsets = [0, 0], sizes = [2, 128], strides = [1, 1]} : vector<4x256xf32> to vector<2x128xf32>
    %c0_222 = arith.constant 0 : index
    %c0_223 = arith.constant 0 : index
    %625 = vector.load %arg15[%c0_222, %c0_223] : memref<16x256xf32, #tpu.memory_space<vmem>>, vector<2x128xf32>
    %626 = arith.addf %624, %625 : vector<2x128xf32>
    %627 = vector.extract_strided_slice %623 {offsets = [2, 128], sizes = [2, 128], strides = [1, 1]} : vector<4x256xf32> to vector<2x128xf32>
    %c14_224 = arith.constant 14 : index
    %c128_225 = arith.constant 128 : index
    %628 = vector.load %arg15[%c14_224, %c128_225] : memref<16x256xf32, #tpu.memory_space<vmem>>, vector<2x128xf32>
    %629 = arith.addf %627, %628 : vector<2x128xf32>
    %630 = tpu.concatenate %626, %629 in 0 : vector<2x128xf32>, vector<2x128xf32> -> vector<4x128xf32>
    %631 = vector.extract_strided_slice %630 {offsets = [0, 0], sizes = [4, 32], strides = [1, 1]} : vector<4x128xf32> to vector<4x32xf32>
    %632 = arith.negf %631 : vector<4x32xf32>
    %633 = math.exp %632 : vector<4x32xf32>
    %cst_226 = arith.constant 1.000000e+00 : f32
    %634 = vector.broadcast %cst_226 : f32 to vector<4x32xf32>
    %635 = arith.addf %634, %633 : vector<4x32xf32>
    %636 = arith.divf %634, %635 : vector<4x32xf32>
    %637 = vector.extract_strided_slice %630 {offsets = [0, 32], sizes = [4, 32], strides = [1, 1]} : vector<4x128xf32> to vector<4x32xf32>
    %638 = arith.negf %637 : vector<4x32xf32>
    %639 = math.exp %638 : vector<4x32xf32>
    %cst_227 = arith.constant 1.000000e+00 : f32
    %640 = vector.broadcast %cst_227 : f32 to vector<4x32xf32>
    %641 = arith.addf %640, %639 : vector<4x32xf32>
    %642 = arith.divf %640, %641 : vector<4x32xf32>
    %643 = vector.extract_strided_slice %630 {offsets = [0, 64], sizes = [4, 32], strides = [1, 1]} : vector<4x128xf32> to vector<4x32xf32>
    %644 = math.tanh %643 : vector<4x32xf32>
    %645 = vector.extract_strided_slice %630 {offsets = [0, 96], sizes = [4, 32], strides = [1, 1]} : vector<4x128xf32> to vector<4x32xf32>
    %646 = arith.negf %645 : vector<4x32xf32>
    %647 = math.exp %646 : vector<4x32xf32>
    %cst_228 = arith.constant 1.000000e+00 : f32
    %648 = vector.broadcast %cst_228 : f32 to vector<4x32xf32>
    %649 = arith.addf %648, %647 : vector<4x32xf32>
    %650 = arith.divf %648, %649 : vector<4x32xf32>
    %651 = arith.mulf %642, %298 : vector<4x32xf32>
    %652 = arith.mulf %636, %644 : vector<4x32xf32>
    %653 = arith.addf %651, %652 : vector<4x32xf32>
    %654 = math.tanh %653 : vector<4x32xf32>
    %655 = arith.mulf %650, %654 : vector<4x32xf32>
    %656 = vector.extract_strided_slice %655 {offsets = [0, 0], sizes = [2, 32], strides = [1, 1]} : vector<4x32xf32> to vector<2x32xf32>
    %c0_229 = arith.constant 0 : index
    %c0_230 = arith.constant 0 : index
    %657 = vector.load %arg16[%c0_229, %c0_230] : memref<16x64xf32, #tpu.memory_space<vmem>>, vector<2x32xf32>
    tpu.vector_store %arg16[%c0_229, %c0_230], %656 {strides = array<i32>} : memref<16x64xf32, #tpu.memory_space<vmem>>, vector<2x32xf32>,
    %658 = vector.extract_strided_slice %655 {offsets = [2, 0], sizes = [2, 32], strides = [1, 1]} : vector<4x32xf32> to vector<2x32xf32>
    %c14_231 = arith.constant 14 : index
    %c32_232 = arith.constant 32 : index
    %659 = vector.load %arg16[%c14_231, %c32_232] : memref<16x64xf32, #tpu.memory_space<vmem>>, vector<2x32xf32>
    tpu.vector_store %arg16[%c14_231, %c32_232], %658 {strides = array<i32>} : memref<16x64xf32, #tpu.memory_space<vmem>>, vector<2x32xf32>,
    %cst_233 = arith.constant dense<0.000000e+00> : vector<4x256xf32>
    %660 = tpu.matmul %655, %622, %cst_233 {dimension_numbers = #tpu.dot_dimension_numbers<[1], [0], [0], [1], [0, 0, 1, 1], [], []>} : vector<4x32xf32>, vector<32x256xf32>, vector<4x256xf32> -> vector<4x256xf32>
    %661 = vector.extract_strided_slice %660 {offsets = [0, 0], sizes = [2, 128], strides = [1, 1]} : vector<4x256xf32> to vector<2x128xf32>
    %c2_234 = arith.constant 2 : index
    %c0_235 = arith.constant 0 : index
    %662 = vector.load %arg15[%c2_234, %c0_235] : memref<16x256xf32, #tpu.memory_space<vmem>>, vector<2x128xf32>
    %663 = arith.addf %661, %662 : vector<2x128xf32>
    %664 = vector.extract_strided_slice %660 {offsets = [2, 128], sizes = [2, 128], strides = [1, 1]} : vector<4x256xf32> to vector<2x128xf32>
    %c12_236 = arith.constant 12 : index
    %c128_237 = arith.constant 128 : index
    %665 = vector.load %arg15[%c12_236, %c128_237] : memref<16x256xf32, #tpu.memory_space<vmem>>, vector<2x128xf32>
    %666 = arith.addf %664, %665 : vector<2x128xf32>
    %667 = tpu.concatenate %663, %666 in 0 : vector<2x128xf32>, vector<2x128xf32> -> vector<4x128xf32>
    %668 = vector.extract_strided_slice %667 {offsets = [0, 0], sizes = [4, 32], strides = [1, 1]} : vector<4x128xf32> to vector<4x32xf32>
    %669 = arith.negf %668 : vector<4x32xf32>
    %670 = math.exp %669 : vector<4x32xf32>
    %cst_238 = arith.constant 1.000000e+00 : f32
    %671 = vector.broadcast %cst_238 : f32 to vector<4x32xf32>
    %672 = arith.addf %671, %670 : vector<4x32xf32>
    %673 = arith.divf %671, %672 : vector<4x32xf32>
    %674 = vector.extract_strided_slice %667 {offsets = [0, 32], sizes = [4, 32], strides = [1, 1]} : vector<4x128xf32> to vector<4x32xf32>
    %675 = arith.negf %674 : vector<4x32xf32>
    %676 = math.exp %675 : vector<4x32xf32>
    %cst_239 = arith.constant 1.000000e+00 : f32
    %677 = vector.broadcast %cst_239 : f32 to vector<4x32xf32>
    %678 = arith.addf %677, %676 : vector<4x32xf32>
    %679 = arith.divf %677, %678 : vector<4x32xf32>
    %680 = vector.extract_strided_slice %667 {offsets = [0, 64], sizes = [4, 32], strides = [1, 1]} : vector<4x128xf32> to vector<4x32xf32>
    %681 = math.tanh %680 : vector<4x32xf32>
    %682 = vector.extract_strided_slice %667 {offsets = [0, 96], sizes = [4, 32], strides = [1, 1]} : vector<4x128xf32> to vector<4x32xf32>
    %683 = arith.negf %682 : vector<4x32xf32>
    %684 = math.exp %683 : vector<4x32xf32>
    %cst_240 = arith.constant 1.000000e+00 : f32
    %685 = vector.broadcast %cst_240 : f32 to vector<4x32xf32>
    %686 = arith.addf %685, %684 : vector<4x32xf32>
    %687 = arith.divf %685, %686 : vector<4x32xf32>
    %688 = arith.mulf %679, %653 : vector<4x32xf32>
    %689 = arith.mulf %673, %681 : vector<4x32xf32>
    %690 = arith.addf %688, %689 : vector<4x32xf32>
    %691 = math.tanh %690 : vector<4x32xf32>
    %692 = arith.mulf %687, %691 : vector<4x32xf32>
    %693 = vector.extract_strided_slice %692 {offsets = [0, 0], sizes = [2, 32], strides = [1, 1]} : vector<4x32xf32> to vector<2x32xf32>
    %c2_241 = arith.constant 2 : index
    %c0_242 = arith.constant 0 : index
    %694 = vector.load %arg16[%c2_241, %c0_242] : memref<16x64xf32, #tpu.memory_space<vmem>>, vector<2x32xf32>
    tpu.vector_store %arg16[%c2_241, %c0_242], %693 {strides = array<i32>} : memref<16x64xf32, #tpu.memory_space<vmem>>, vector<2x32xf32>,
    %695 = vector.extract_strided_slice %692 {offsets = [2, 0], sizes = [2, 32], strides = [1, 1]} : vector<4x32xf32> to vector<2x32xf32>
    %c12_243 = arith.constant 12 : index
    %c32_244 = arith.constant 32 : index
    %696 = vector.load %arg16[%c12_243, %c32_244] : memref<16x64xf32, #tpu.memory_space<vmem>>, vector<2x32xf32>
    tpu.vector_store %arg16[%c12_243, %c32_244], %695 {strides = array<i32>} : memref<16x64xf32, #tpu.memory_space<vmem>>, vector<2x32xf32>,
    %cst_245 = arith.constant dense<0.000000e+00> : vector<4x256xf32>
    %697 = tpu.matmul %692, %622, %cst_245 {dimension_numbers = #tpu.dot_dimension_numbers<[1], [0], [0], [1], [0, 0, 1, 1], [], []>} : vector<4x32xf32>, vector<32x256xf32>, vector<4x256xf32> -> vector<4x256xf32>
    %698 = vector.extract_strided_slice %697 {offsets = [0, 0], sizes = [2, 128], strides = [1, 1]} : vector<4x256xf32> to vector<2x128xf32>
    %c4_246 = arith.constant 4 : index
    %c0_247 = arith.constant 0 : index
    %699 = vector.load %arg15[%c4_246, %c0_247] : memref<16x256xf32, #tpu.memory_space<vmem>>, vector<2x128xf32>
    %700 = arith.addf %698, %699 : vector<2x128xf32>
    %701 = vector.extract_strided_slice %697 {offsets = [2, 128], sizes = [2, 128], strides = [1, 1]} : vector<4x256xf32> to vector<2x128xf32>
    %c10_248 = arith.constant 10 : index
    %c128_249 = arith.constant 128 : index
    %702 = vector.load %arg15[%c10_248, %c128_249] : memref<16x256xf32, #tpu.memory_space<vmem>>, vector<2x128xf32>
    %703 = arith.addf %701, %702 : vector<2x128xf32>
    %704 = tpu.concatenate %700, %703 in 0 : vector<2x128xf32>, vector<2x128xf32> -> vector<4x128xf32>
    %705 = vector.extract_strided_slice %704 {offsets = [0, 0], sizes = [4, 32], strides = [1, 1]} : vector<4x128xf32> to vector<4x32xf32>
    %706 = arith.negf %705 : vector<4x32xf32>
    %707 = math.exp %706 : vector<4x32xf32>
    %cst_250 = arith.constant 1.000000e+00 : f32
    %708 = vector.broadcast %cst_250 : f32 to vector<4x32xf32>
    %709 = arith.addf %708, %707 : vector<4x32xf32>
    %710 = arith.divf %708, %709 : vector<4x32xf32>
    %711 = vector.extract_strided_slice %704 {offsets = [0, 32], sizes = [4, 32], strides = [1, 1]} : vector<4x128xf32> to vector<4x32xf32>
    %712 = arith.negf %711 : vector<4x32xf32>
    %713 = math.exp %712 : vector<4x32xf32>
    %cst_251 = arith.constant 1.000000e+00 : f32
    %714 = vector.broadcast %cst_251 : f32 to vector<4x32xf32>
    %715 = arith.addf %714, %713 : vector<4x32xf32>
    %716 = arith.divf %714, %715 : vector<4x32xf32>
    %717 = vector.extract_strided_slice %704 {offsets = [0, 64], sizes = [4, 32], strides = [1, 1]} : vector<4x128xf32> to vector<4x32xf32>
    %718 = math.tanh %717 : vector<4x32xf32>
    %719 = vector.extract_strided_slice %704 {offsets = [0, 96], sizes = [4, 32], strides = [1, 1]} : vector<4x128xf32> to vector<4x32xf32>
    %720 = arith.negf %719 : vector<4x32xf32>
    %721 = math.exp %720 : vector<4x32xf32>
    %cst_252 = arith.constant 1.000000e+00 : f32
    %722 = vector.broadcast %cst_252 : f32 to vector<4x32xf32>
    %723 = arith.addf %722, %721 : vector<4x32xf32>
    %724 = arith.divf %722, %723 : vector<4x32xf32>
    %725 = arith.mulf %716, %690 : vector<4x32xf32>
    %726 = arith.mulf %710, %718 : vector<4x32xf32>
    %727 = arith.addf %725, %726 : vector<4x32xf32>
    %728 = math.tanh %727 : vector<4x32xf32>
    %729 = arith.mulf %724, %728 : vector<4x32xf32>
    %730 = vector.extract_strided_slice %729 {offsets = [0, 0], sizes = [2, 32], strides = [1, 1]} : vector<4x32xf32> to vector<2x32xf32>
    %c4_253 = arith.constant 4 : index
    %c0_254 = arith.constant 0 : index
    %731 = vector.load %arg16[%c4_253, %c0_254] : memref<16x64xf32, #tpu.memory_space<vmem>>, vector<2x32xf32>
    tpu.vector_store %arg16[%c4_253, %c0_254], %730 {strides = array<i32>} : memref<16x64xf32, #tpu.memory_space<vmem>>, vector<2x32xf32>,
    %732 = vector.extract_strided_slice %729 {offsets = [2, 0], sizes = [2, 32], strides = [1, 1]} : vector<4x32xf32> to vector<2x32xf32>
    %c10_255 = arith.constant 10 : index
    %c32_256 = arith.constant 32 : index
    %733 = vector.load %arg16[%c10_255, %c32_256] : memref<16x64xf32, #tpu.memory_space<vmem>>, vector<2x32xf32>
    tpu.vector_store %arg16[%c10_255, %c32_256], %732 {strides = array<i32>} : memref<16x64xf32, #tpu.memory_space<vmem>>, vector<2x32xf32>,
    %cst_257 = arith.constant dense<0.000000e+00> : vector<4x256xf32>
    %734 = tpu.matmul %729, %622, %cst_257 {dimension_numbers = #tpu.dot_dimension_numbers<[1], [0], [0], [1], [0, 0, 1, 1], [], []>} : vector<4x32xf32>, vector<32x256xf32>, vector<4x256xf32> -> vector<4x256xf32>
    %735 = vector.extract_strided_slice %734 {offsets = [0, 0], sizes = [2, 128], strides = [1, 1]} : vector<4x256xf32> to vector<2x128xf32>
    %c6_258 = arith.constant 6 : index
    %c0_259 = arith.constant 0 : index
    %736 = vector.load %arg15[%c6_258, %c0_259] : memref<16x256xf32, #tpu.memory_space<vmem>>, vector<2x128xf32>
    %737 = arith.addf %735, %736 : vector<2x128xf32>
    %738 = vector.extract_strided_slice %734 {offsets = [2, 128], sizes = [2, 128], strides = [1, 1]} : vector<4x256xf32> to vector<2x128xf32>
    %c8_260 = arith.constant 8 : index
    %c128_261 = arith.constant 128 : index
    %739 = vector.load %arg15[%c8_260, %c128_261] : memref<16x256xf32, #tpu.memory_space<vmem>>, vector<2x128xf32>
    %740 = arith.addf %738, %739 : vector<2x128xf32>
    %741 = tpu.concatenate %737, %740 in 0 : vector<2x128xf32>, vector<2x128xf32> -> vector<4x128xf32>
    %742 = vector.extract_strided_slice %741 {offsets = [0, 0], sizes = [4, 32], strides = [1, 1]} : vector<4x128xf32> to vector<4x32xf32>
    %743 = arith.negf %742 : vector<4x32xf32>
    %744 = math.exp %743 : vector<4x32xf32>
    %cst_262 = arith.constant 1.000000e+00 : f32
    %745 = vector.broadcast %cst_262 : f32 to vector<4x32xf32>
    %746 = arith.addf %745, %744 : vector<4x32xf32>
    %747 = arith.divf %745, %746 : vector<4x32xf32>
    %748 = vector.extract_strided_slice %741 {offsets = [0, 32], sizes = [4, 32], strides = [1, 1]} : vector<4x128xf32> to vector<4x32xf32>
    %749 = arith.negf %748 : vector<4x32xf32>
    %750 = math.exp %749 : vector<4x32xf32>
    %cst_263 = arith.constant 1.000000e+00 : f32
    %751 = vector.broadcast %cst_263 : f32 to vector<4x32xf32>
    %752 = arith.addf %751, %750 : vector<4x32xf32>
    %753 = arith.divf %751, %752 : vector<4x32xf32>
    %754 = vector.extract_strided_slice %741 {offsets = [0, 64], sizes = [4, 32], strides = [1, 1]} : vector<4x128xf32> to vector<4x32xf32>
    %755 = math.tanh %754 : vector<4x32xf32>
    %756 = vector.extract_strided_slice %741 {offsets = [0, 96], sizes = [4, 32], strides = [1, 1]} : vector<4x128xf32> to vector<4x32xf32>
    %757 = arith.negf %756 : vector<4x32xf32>
    %758 = math.exp %757 : vector<4x32xf32>
    %cst_264 = arith.constant 1.000000e+00 : f32
    %759 = vector.broadcast %cst_264 : f32 to vector<4x32xf32>
    %760 = arith.addf %759, %758 : vector<4x32xf32>
    %761 = arith.divf %759, %760 : vector<4x32xf32>
    %762 = arith.mulf %753, %727 : vector<4x32xf32>
    %763 = arith.mulf %747, %755 : vector<4x32xf32>
    %764 = arith.addf %762, %763 : vector<4x32xf32>
    %765 = math.tanh %764 : vector<4x32xf32>
    %766 = arith.mulf %761, %765 : vector<4x32xf32>
    %767 = vector.extract_strided_slice %766 {offsets = [0, 0], sizes = [2, 32], strides = [1, 1]} : vector<4x32xf32> to vector<2x32xf32>
    %c6_265 = arith.constant 6 : index
    %c0_266 = arith.constant 0 : index
    %768 = vector.load %arg16[%c6_265, %c0_266] : memref<16x64xf32, #tpu.memory_space<vmem>>, vector<2x32xf32>
    tpu.vector_store %arg16[%c6_265, %c0_266], %767 {strides = array<i32>} : memref<16x64xf32, #tpu.memory_space<vmem>>, vector<2x32xf32>,
    %769 = vector.extract_strided_slice %766 {offsets = [2, 0], sizes = [2, 32], strides = [1, 1]} : vector<4x32xf32> to vector<2x32xf32>
    %c8_267 = arith.constant 8 : index
    %c32_268 = arith.constant 32 : index
    %770 = vector.load %arg16[%c8_267, %c32_268] : memref<16x64xf32, #tpu.memory_space<vmem>>, vector<2x32xf32>
    tpu.vector_store %arg16[%c8_267, %c32_268], %769 {strides = array<i32>} : memref<16x64xf32, #tpu.memory_space<vmem>>, vector<2x32xf32>,
    %cst_269 = arith.constant dense<0.000000e+00> : vector<4x256xf32>
    %771 = tpu.matmul %766, %622, %cst_269 {dimension_numbers = #tpu.dot_dimension_numbers<[1], [0], [0], [1], [0, 0, 1, 1], [], []>} : vector<4x32xf32>, vector<32x256xf32>, vector<4x256xf32> -> vector<4x256xf32>
    %772 = vector.extract_strided_slice %771 {offsets = [0, 0], sizes = [2, 128], strides = [1, 1]} : vector<4x256xf32> to vector<2x128xf32>
    %c8_270 = arith.constant 8 : index
    %c0_271 = arith.constant 0 : index
    %773 = vector.load %arg15[%c8_270, %c0_271] : memref<16x256xf32, #tpu.memory_space<vmem>>, vector<2x128xf32>
    %774 = arith.addf %772, %773 : vector<2x128xf32>
    %775 = vector.extract_strided_slice %771 {offsets = [2, 128], sizes = [2, 128], strides = [1, 1]} : vector<4x256xf32> to vector<2x128xf32>
    %c6_272 = arith.constant 6 : index
    %c128_273 = arith.constant 128 : index
    %776 = vector.load %arg15[%c6_272, %c128_273] : memref<16x256xf32, #tpu.memory_space<vmem>>, vector<2x128xf32>
    %777 = arith.addf %775, %776 : vector<2x128xf32>
    %778 = tpu.concatenate %774, %777 in 0 : vector<2x128xf32>, vector<2x128xf32> -> vector<4x128xf32>
    %779 = vector.extract_strided_slice %778 {offsets = [0, 0], sizes = [4, 32], strides = [1, 1]} : vector<4x128xf32> to vector<4x32xf32>
    %780 = arith.negf %779 : vector<4x32xf32>
    %781 = math.exp %780 : vector<4x32xf32>
    %cst_274 = arith.constant 1.000000e+00 : f32
    %782 = vector.broadcast %cst_274 : f32 to vector<4x32xf32>
    %783 = arith.addf %782, %781 : vector<4x32xf32>
    %784 = arith.divf %782, %783 : vector<4x32xf32>
    %785 = vector.extract_strided_slice %778 {offsets = [0, 32], sizes = [4, 32], strides = [1, 1]} : vector<4x128xf32> to vector<4x32xf32>
    %786 = arith.negf %785 : vector<4x32xf32>
    %787 = math.exp %786 : vector<4x32xf32>
    %cst_275 = arith.constant 1.000000e+00 : f32
    %788 = vector.broadcast %cst_275 : f32 to vector<4x32xf32>
    %789 = arith.addf %788, %787 : vector<4x32xf32>
    %790 = arith.divf %788, %789 : vector<4x32xf32>
    %791 = vector.extract_strided_slice %778 {offsets = [0, 64], sizes = [4, 32], strides = [1, 1]} : vector<4x128xf32> to vector<4x32xf32>
    %792 = math.tanh %791 : vector<4x32xf32>
    %793 = vector.extract_strided_slice %778 {offsets = [0, 96], sizes = [4, 32], strides = [1, 1]} : vector<4x128xf32> to vector<4x32xf32>
    %794 = arith.negf %793 : vector<4x32xf32>
    %795 = math.exp %794 : vector<4x32xf32>
    %cst_276 = arith.constant 1.000000e+00 : f32
    %796 = vector.broadcast %cst_276 : f32 to vector<4x32xf32>
    %797 = arith.addf %796, %795 : vector<4x32xf32>
    %798 = arith.divf %796, %797 : vector<4x32xf32>
    %799 = arith.mulf %790, %764 : vector<4x32xf32>
    %800 = arith.mulf %784, %792 : vector<4x32xf32>
    %801 = arith.addf %799, %800 : vector<4x32xf32>
    %802 = math.tanh %801 : vector<4x32xf32>
    %803 = arith.mulf %798, %802 : vector<4x32xf32>
    %804 = vector.extract_strided_slice %803 {offsets = [0, 0], sizes = [2, 32], strides = [1, 1]} : vector<4x32xf32> to vector<2x32xf32>
    %c8_277 = arith.constant 8 : index
    %c0_278 = arith.constant 0 : index
    %805 = vector.load %arg16[%c8_277, %c0_278] : memref<16x64xf32, #tpu.memory_space<vmem>>, vector<2x32xf32>
    tpu.vector_store %arg16[%c8_277, %c0_278], %804 {strides = array<i32>} : memref<16x64xf32, #tpu.memory_space<vmem>>, vector<2x32xf32>,
    %806 = vector.extract_strided_slice %803 {offsets = [2, 0], sizes = [2, 32], strides = [1, 1]} : vector<4x32xf32> to vector<2x32xf32>
    %c6_279 = arith.constant 6 : index
    %c32_280 = arith.constant 32 : index
    %807 = vector.load %arg16[%c6_279, %c32_280] : memref<16x64xf32, #tpu.memory_space<vmem>>, vector<2x32xf32>
    tpu.vector_store %arg16[%c6_279, %c32_280], %806 {strides = array<i32>} : memref<16x64xf32, #tpu.memory_space<vmem>>, vector<2x32xf32>,
    %cst_281 = arith.constant dense<0.000000e+00> : vector<4x256xf32>
    %808 = tpu.matmul %803, %622, %cst_281 {dimension_numbers = #tpu.dot_dimension_numbers<[1], [0], [0], [1], [0, 0, 1, 1], [], []>} : vector<4x32xf32>, vector<32x256xf32>, vector<4x256xf32> -> vector<4x256xf32>
    %809 = vector.extract_strided_slice %808 {offsets = [0, 0], sizes = [2, 128], strides = [1, 1]} : vector<4x256xf32> to vector<2x128xf32>
    %c10_282 = arith.constant 10 : index
    %c0_283 = arith.constant 0 : index
    %810 = vector.load %arg15[%c10_282, %c0_283] : memref<16x256xf32, #tpu.memory_space<vmem>>, vector<2x128xf32>
    %811 = arith.addf %809, %810 : vector<2x128xf32>
    %812 = vector.extract_strided_slice %808 {offsets = [2, 128], sizes = [2, 128], strides = [1, 1]} : vector<4x256xf32> to vector<2x128xf32>
    %c4_284 = arith.constant 4 : index
    %c128_285 = arith.constant 128 : index
    %813 = vector.load %arg15[%c4_284, %c128_285] : memref<16x256xf32, #tpu.memory_space<vmem>>, vector<2x128xf32>
    %814 = arith.addf %812, %813 : vector<2x128xf32>
    %815 = tpu.concatenate %811, %814 in 0 : vector<2x128xf32>, vector<2x128xf32> -> vector<4x128xf32>
    %816 = vector.extract_strided_slice %815 {offsets = [0, 0], sizes = [4, 32], strides = [1, 1]} : vector<4x128xf32> to vector<4x32xf32>
    %817 = arith.negf %816 : vector<4x32xf32>
    %818 = math.exp %817 : vector<4x32xf32>
    %cst_286 = arith.constant 1.000000e+00 : f32
    %819 = vector.broadcast %cst_286 : f32 to vector<4x32xf32>
    %820 = arith.addf %819, %818 : vector<4x32xf32>
    %821 = arith.divf %819, %820 : vector<4x32xf32>
    %822 = vector.extract_strided_slice %815 {offsets = [0, 32], sizes = [4, 32], strides = [1, 1]} : vector<4x128xf32> to vector<4x32xf32>
    %823 = arith.negf %822 : vector<4x32xf32>
    %824 = math.exp %823 : vector<4x32xf32>
    %cst_287 = arith.constant 1.000000e+00 : f32
    %825 = vector.broadcast %cst_287 : f32 to vector<4x32xf32>
    %826 = arith.addf %825, %824 : vector<4x32xf32>
    %827 = arith.divf %825, %826 : vector<4x32xf32>
    %828 = vector.extract_strided_slice %815 {offsets = [0, 64], sizes = [4, 32], strides = [1, 1]} : vector<4x128xf32> to vector<4x32xf32>
    %829 = math.tanh %828 : vector<4x32xf32>
    %830 = vector.extract_strided_slice %815 {offsets = [0, 96], sizes = [4, 32], strides = [1, 1]} : vector<4x128xf32> to vector<4x32xf32>
    %831 = arith.negf %830 : vector<4x32xf32>
    %832 = math.exp %831 : vector<4x32xf32>
    %cst_288 = arith.constant 1.000000e+00 : f32
    %833 = vector.broadcast %cst_288 : f32 to vector<4x32xf32>
    %834 = arith.addf %833, %832 : vector<4x32xf32>
    %835 = arith.divf %833, %834 : vector<4x32xf32>
    %836 = arith.mulf %827, %801 : vector<4x32xf32>
    %837 = arith.mulf %821, %829 : vector<4x32xf32>
    %838 = arith.addf %836, %837 : vector<4x32xf32>
    %839 = math.tanh %838 : vector<4x32xf32>
    %840 = arith.mulf %835, %839 : vector<4x32xf32>
    %841 = vector.extract_strided_slice %840 {offsets = [0, 0], sizes = [2, 32], strides = [1, 1]} : vector<4x32xf32> to vector<2x32xf32>
    %c10_289 = arith.constant 10 : index
    %c0_290 = arith.constant 0 : index
    %842 = vector.load %arg16[%c10_289, %c0_290] : memref<16x64xf32, #tpu.memory_space<vmem>>, vector<2x32xf32>
    tpu.vector_store %arg16[%c10_289, %c0_290], %841 {strides = array<i32>} : memref<16x64xf32, #tpu.memory_space<vmem>>, vector<2x32xf32>,
    %843 = vector.extract_strided_slice %840 {offsets = [2, 0], sizes = [2, 32], strides = [1, 1]} : vector<4x32xf32> to vector<2x32xf32>
    %c4_291 = arith.constant 4 : index
    %c32_292 = arith.constant 32 : index
    %844 = vector.load %arg16[%c4_291, %c32_292] : memref<16x64xf32, #tpu.memory_space<vmem>>, vector<2x32xf32>
    tpu.vector_store %arg16[%c4_291, %c32_292], %843 {strides = array<i32>} : memref<16x64xf32, #tpu.memory_space<vmem>>, vector<2x32xf32>,
    %cst_293 = arith.constant dense<0.000000e+00> : vector<4x256xf32>
    %845 = tpu.matmul %840, %622, %cst_293 {dimension_numbers = #tpu.dot_dimension_numbers<[1], [0], [0], [1], [0, 0, 1, 1], [], []>} : vector<4x32xf32>, vector<32x256xf32>, vector<4x256xf32> -> vector<4x256xf32>
    %846 = vector.extract_strided_slice %845 {offsets = [0, 0], sizes = [2, 128], strides = [1, 1]} : vector<4x256xf32> to vector<2x128xf32>
    %c12_294 = arith.constant 12 : index
    %c0_295 = arith.constant 0 : index
    %847 = vector.load %arg15[%c12_294, %c0_295] : memref<16x256xf32, #tpu.memory_space<vmem>>, vector<2x128xf32>
    %848 = arith.addf %846, %847 : vector<2x128xf32>
    %849 = vector.extract_strided_slice %845 {offsets = [2, 128], sizes = [2, 128], strides = [1, 1]} : vector<4x256xf32> to vector<2x128xf32>
    %c2_296 = arith.constant 2 : index
    %c128_297 = arith.constant 128 : index
    %850 = vector.load %arg15[%c2_296, %c128_297] : memref<16x256xf32, #tpu.memory_space<vmem>>, vector<2x128xf32>
    %851 = arith.addf %849, %850 : vector<2x128xf32>
    %852 = tpu.concatenate %848, %851 in 0 : vector<2x128xf32>, vector<2x128xf32> -> vector<4x128xf32>
    %853 = vector.extract_strided_slice %852 {offsets = [0, 0], sizes = [4, 32], strides = [1, 1]} : vector<4x128xf32> to vector<4x32xf32>
    %854 = arith.negf %853 : vector<4x32xf32>
    %855 = math.exp %854 : vector<4x32xf32>
    %cst_298 = arith.constant 1.000000e+00 : f32
    %856 = vector.broadcast %cst_298 : f32 to vector<4x32xf32>
    %857 = arith.addf %856, %855 : vector<4x32xf32>
    %858 = arith.divf %856, %857 : vector<4x32xf32>
    %859 = vector.extract_strided_slice %852 {offsets = [0, 32], sizes = [4, 32], strides = [1, 1]} : vector<4x128xf32> to vector<4x32xf32>
    %860 = arith.negf %859 : vector<4x32xf32>
    %861 = math.exp %860 : vector<4x32xf32>
    %cst_299 = arith.constant 1.000000e+00 : f32
    %862 = vector.broadcast %cst_299 : f32 to vector<4x32xf32>
    %863 = arith.addf %862, %861 : vector<4x32xf32>
    %864 = arith.divf %862, %863 : vector<4x32xf32>
    %865 = vector.extract_strided_slice %852 {offsets = [0, 64], sizes = [4, 32], strides = [1, 1]} : vector<4x128xf32> to vector<4x32xf32>
    %866 = math.tanh %865 : vector<4x32xf32>
    %867 = vector.extract_strided_slice %852 {offsets = [0, 96], sizes = [4, 32], strides = [1, 1]} : vector<4x128xf32> to vector<4x32xf32>
    %868 = arith.negf %867 : vector<4x32xf32>
    %869 = math.exp %868 : vector<4x32xf32>
    %cst_300 = arith.constant 1.000000e+00 : f32
    %870 = vector.broadcast %cst_300 : f32 to vector<4x32xf32>
    %871 = arith.addf %870, %869 : vector<4x32xf32>
    %872 = arith.divf %870, %871 : vector<4x32xf32>
    %873 = arith.mulf %864, %838 : vector<4x32xf32>
    %874 = arith.mulf %858, %866 : vector<4x32xf32>
    %875 = arith.addf %873, %874 : vector<4x32xf32>
    %876 = math.tanh %875 : vector<4x32xf32>
    %877 = arith.mulf %872, %876 : vector<4x32xf32>
    %878 = vector.extract_strided_slice %877 {offsets = [0, 0], sizes = [2, 32], strides = [1, 1]} : vector<4x32xf32> to vector<2x32xf32>
    %c12_301 = arith.constant 12 : index
    %c0_302 = arith.constant 0 : index
    %879 = vector.load %arg16[%c12_301, %c0_302] : memref<16x64xf32, #tpu.memory_space<vmem>>, vector<2x32xf32>
    tpu.vector_store %arg16[%c12_301, %c0_302], %878 {strides = array<i32>} : memref<16x64xf32, #tpu.memory_space<vmem>>, vector<2x32xf32>,
    %880 = vector.extract_strided_slice %877 {offsets = [2, 0], sizes = [2, 32], strides = [1, 1]} : vector<4x32xf32> to vector<2x32xf32>
    %c2_303 = arith.constant 2 : index
    %c32_304 = arith.constant 32 : index
    %881 = vector.load %arg16[%c2_303, %c32_304] : memref<16x64xf32, #tpu.memory_space<vmem>>, vector<2x32xf32>
    tpu.vector_store %arg16[%c2_303, %c32_304], %880 {strides = array<i32>} : memref<16x64xf32, #tpu.memory_space<vmem>>, vector<2x32xf32>,
    %cst_305 = arith.constant dense<0.000000e+00> : vector<4x256xf32>
    %882 = tpu.matmul %877, %622, %cst_305 {dimension_numbers = #tpu.dot_dimension_numbers<[1], [0], [0], [1], [0, 0, 1, 1], [], []>} : vector<4x32xf32>, vector<32x256xf32>, vector<4x256xf32> -> vector<4x256xf32>
    %883 = vector.extract_strided_slice %882 {offsets = [0, 0], sizes = [2, 128], strides = [1, 1]} : vector<4x256xf32> to vector<2x128xf32>
    %c14_306 = arith.constant 14 : index
    %c0_307 = arith.constant 0 : index
    %884 = vector.load %arg15[%c14_306, %c0_307] : memref<16x256xf32, #tpu.memory_space<vmem>>, vector<2x128xf32>
    %885 = arith.addf %883, %884 : vector<2x128xf32>
    %886 = vector.extract_strided_slice %882 {offsets = [2, 128], sizes = [2, 128], strides = [1, 1]} : vector<4x256xf32> to vector<2x128xf32>
    %c0_308 = arith.constant 0 : index
    %c128_309 = arith.constant 128 : index
    %887 = vector.load %arg15[%c0_308, %c128_309] : memref<16x256xf32, #tpu.memory_space<vmem>>, vector<2x128xf32>
    %888 = arith.addf %886, %887 : vector<2x128xf32>
    %889 = tpu.concatenate %885, %888 in 0 : vector<2x128xf32>, vector<2x128xf32> -> vector<4x128xf32>
    %890 = vector.extract_strided_slice %889 {offsets = [0, 0], sizes = [4, 32], strides = [1, 1]} : vector<4x128xf32> to vector<4x32xf32>
    %891 = arith.negf %890 : vector<4x32xf32>
    %892 = math.exp %891 : vector<4x32xf32>
    %cst_310 = arith.constant 1.000000e+00 : f32
    %893 = vector.broadcast %cst_310 : f32 to vector<4x32xf32>
    %894 = arith.addf %893, %892 : vector<4x32xf32>
    %895 = arith.divf %893, %894 : vector<4x32xf32>
    %896 = vector.extract_strided_slice %889 {offsets = [0, 32], sizes = [4, 32], strides = [1, 1]} : vector<4x128xf32> to vector<4x32xf32>
    %897 = arith.negf %896 : vector<4x32xf32>
    %898 = math.exp %897 : vector<4x32xf32>
    %cst_311 = arith.constant 1.000000e+00 : f32
    %899 = vector.broadcast %cst_311 : f32 to vector<4x32xf32>
    %900 = arith.addf %899, %898 : vector<4x32xf32>
    %901 = arith.divf %899, %900 : vector<4x32xf32>
    %902 = vector.extract_strided_slice %889 {offsets = [0, 64], sizes = [4, 32], strides = [1, 1]} : vector<4x128xf32> to vector<4x32xf32>
    %903 = math.tanh %902 : vector<4x32xf32>
    %904 = vector.extract_strided_slice %889 {offsets = [0, 96], sizes = [4, 32], strides = [1, 1]} : vector<4x128xf32> to vector<4x32xf32>
    %905 = arith.negf %904 : vector<4x32xf32>
    %906 = math.exp %905 : vector<4x32xf32>
    %cst_312 = arith.constant 1.000000e+00 : f32
    %907 = vector.broadcast %cst_312 : f32 to vector<4x32xf32>
    %908 = arith.addf %907, %906 : vector<4x32xf32>
    %909 = arith.divf %907, %908 : vector<4x32xf32>
    %910 = arith.mulf %901, %875 : vector<4x32xf32>
    %911 = arith.mulf %895, %903 : vector<4x32xf32>
    %912 = arith.addf %910, %911 : vector<4x32xf32>
    %913 = math.tanh %912 : vector<4x32xf32>
    %914 = arith.mulf %909, %913 : vector<4x32xf32>
    %915 = vector.extract_strided_slice %914 {offsets = [0, 0], sizes = [2, 32], strides = [1, 1]} : vector<4x32xf32> to vector<2x32xf32>
    %c14_313 = arith.constant 14 : index
    %c0_314 = arith.constant 0 : index
    %916 = vector.load %arg16[%c14_313, %c0_314] : memref<16x64xf32, #tpu.memory_space<vmem>>, vector<2x32xf32>
    tpu.vector_store %arg16[%c14_313, %c0_314], %915 {strides = array<i32>} : memref<16x64xf32, #tpu.memory_space<vmem>>, vector<2x32xf32>,
    %917 = vector.extract_strided_slice %914 {offsets = [2, 0], sizes = [2, 32], strides = [1, 1]} : vector<4x32xf32> to vector<2x32xf32>
    %c0_315 = arith.constant 0 : index
    %c32_316 = arith.constant 32 : index
    %918 = vector.load %arg16[%c0_315, %c32_316] : memref<16x64xf32, #tpu.memory_space<vmem>>, vector<2x32xf32>
    tpu.vector_store %arg16[%c0_315, %c32_316], %917 {strides = array<i32>} : memref<16x64xf32, #tpu.memory_space<vmem>>, vector<2x32xf32>,
    %c0_317 = arith.constant 0 : index
    %c0_318 = arith.constant 0 : index
    %919 = vector.load %arg16[%c0_317, %c0_318] : memref<16x64xf32, #tpu.memory_space<vmem>>, vector<16x64xf32>
    %c0_319 = arith.constant 0 : index
    %c0_320 = arith.constant 0 : index
    %920 = vector.load %arg10[%c0_319, %c0_320] : memref<64x256xf32, #tpu.memory_space<vmem>>, vector<64x256xf32>
    %cst_321 = arith.constant dense<0.000000e+00> : vector<16x256xf32>
    %921 = tpu.matmul %919, %920, %cst_321 {dimension_numbers = #tpu.dot_dimension_numbers<[1], [0], [0], [1], [0, 0, 1, 1], [], []>} : vector<16x64xf32>, vector<64x256xf32>, vector<16x256xf32> -> vector<16x256xf32>
    %c0_322 = arith.constant 0 : index
    %c0_323 = arith.constant 0 : index
    %922 = vector.load %arg12[%c0_322, %c0_323] : memref<1x256xf32, #tpu.memory_space<vmem>>, vector<1x256xf32>
    %923 = vector.broadcast %922 : vector<1x256xf32> to vector<16x256xf32>
    %924 = arith.addf %921, %923 : vector<16x256xf32>
    %c0_324 = arith.constant 0 : index
    %c0_325 = arith.constant 0 : index
    %925 = vector.load %arg15[%c0_324, %c0_325] : memref<16x256xf32, #tpu.memory_space<vmem>>, vector<16x256xf32>
    tpu.vector_store %arg15[%c0_324, %c0_325], %924 {strides = array<i32>} : memref<16x256xf32, #tpu.memory_space<vmem>>, vector<16x256xf32>,
    %c0_326 = arith.constant 0 : index
    %c0_327 = arith.constant 0 : index
    %926 = vector.load %arg11[%c0_326, %c0_327] : memref<32x256xf32, #tpu.memory_space<vmem>>, vector<32x256xf32>
    %cst_328 = arith.constant dense<0.000000e+00> : vector<4x256xf32>
    %927 = tpu.matmul %604, %926, %cst_328 {dimension_numbers = #tpu.dot_dimension_numbers<[1], [0], [0], [1], [0, 0, 1, 1], [], []>} : vector<4x32xf32>, vector<32x256xf32>, vector<4x256xf32> -> vector<4x256xf32>
    %928 = vector.extract_strided_slice %927 {offsets = [0, 0], sizes = [2, 128], strides = [1, 1]} : vector<4x256xf32> to vector<2x128xf32>
    %c0_329 = arith.constant 0 : index
    %c0_330 = arith.constant 0 : index
    %929 = vector.load %arg15[%c0_329, %c0_330] : memref<16x256xf32, #tpu.memory_space<vmem>>, vector<2x128xf32>
    %930 = arith.addf %928, %929 : vector<2x128xf32>
    %931 = vector.extract_strided_slice %927 {offsets = [2, 128], sizes = [2, 128], strides = [1, 1]} : vector<4x256xf32> to vector<2x128xf32>
    %c14_331 = arith.constant 14 : index
    %c128_332 = arith.constant 128 : index
    %932 = vector.load %arg15[%c14_331, %c128_332] : memref<16x256xf32, #tpu.memory_space<vmem>>, vector<2x128xf32>
    %933 = arith.addf %931, %932 : vector<2x128xf32>
    %934 = tpu.concatenate %930, %933 in 0 : vector<2x128xf32>, vector<2x128xf32> -> vector<4x128xf32>
    %935 = vector.extract_strided_slice %934 {offsets = [0, 0], sizes = [4, 32], strides = [1, 1]} : vector<4x128xf32> to vector<4x32xf32>
    %936 = arith.negf %935 : vector<4x32xf32>
    %937 = math.exp %936 : vector<4x32xf32>
    %cst_333 = arith.constant 1.000000e+00 : f32
    %938 = vector.broadcast %cst_333 : f32 to vector<4x32xf32>
    %939 = arith.addf %938, %937 : vector<4x32xf32>
    %940 = arith.divf %938, %939 : vector<4x32xf32>
    %941 = vector.extract_strided_slice %934 {offsets = [0, 32], sizes = [4, 32], strides = [1, 1]} : vector<4x128xf32> to vector<4x32xf32>
    %942 = arith.negf %941 : vector<4x32xf32>
    %943 = math.exp %942 : vector<4x32xf32>
    %cst_334 = arith.constant 1.000000e+00 : f32
    %944 = vector.broadcast %cst_334 : f32 to vector<4x32xf32>
    %945 = arith.addf %944, %943 : vector<4x32xf32>
    %946 = arith.divf %944, %945 : vector<4x32xf32>
    %947 = vector.extract_strided_slice %934 {offsets = [0, 64], sizes = [4, 32], strides = [1, 1]} : vector<4x128xf32> to vector<4x32xf32>
    %948 = math.tanh %947 : vector<4x32xf32>
    %949 = vector.extract_strided_slice %934 {offsets = [0, 96], sizes = [4, 32], strides = [1, 1]} : vector<4x128xf32> to vector<4x32xf32>
    %950 = arith.negf %949 : vector<4x32xf32>
    %951 = math.exp %950 : vector<4x32xf32>
    %cst_335 = arith.constant 1.000000e+00 : f32
    %952 = vector.broadcast %cst_335 : f32 to vector<4x32xf32>
    %953 = arith.addf %952, %951 : vector<4x32xf32>
    %954 = arith.divf %952, %953 : vector<4x32xf32>
    %955 = arith.mulf %946, %602 : vector<4x32xf32>
    %956 = arith.mulf %940, %948 : vector<4x32xf32>
    %957 = arith.addf %955, %956 : vector<4x32xf32>
    %958 = math.tanh %957 : vector<4x32xf32>
    %959 = arith.mulf %954, %958 : vector<4x32xf32>
    %960 = vector.extract_strided_slice %959 {offsets = [0, 0], sizes = [2, 32], strides = [1, 1]} : vector<4x32xf32> to vector<2x32xf32>
    %c0_336 = arith.constant 0 : index
    %c0_337 = arith.constant 0 : index
    %961 = vector.load %arg17[%c0_336, %c0_337] : memref<16x64xf32, #tpu.memory_space<vmem>>, vector<2x32xf32>
    tpu.vector_store %arg17[%c0_336, %c0_337], %960 {strides = array<i32>} : memref<16x64xf32, #tpu.memory_space<vmem>>, vector<2x32xf32>,
    %962 = vector.extract_strided_slice %959 {offsets = [2, 0], sizes = [2, 32], strides = [1, 1]} : vector<4x32xf32> to vector<2x32xf32>
    %c14_338 = arith.constant 14 : index
    %c32_339 = arith.constant 32 : index
    %963 = vector.load %arg17[%c14_338, %c32_339] : memref<16x64xf32, #tpu.memory_space<vmem>>, vector<2x32xf32>
    tpu.vector_store %arg17[%c14_338, %c32_339], %962 {strides = array<i32>} : memref<16x64xf32, #tpu.memory_space<vmem>>, vector<2x32xf32>,
    %cst_340 = arith.constant dense<0.000000e+00> : vector<4x256xf32>
    %964 = tpu.matmul %959, %926, %cst_340 {dimension_numbers = #tpu.dot_dimension_numbers<[1], [0], [0], [1], [0, 0, 1, 1], [], []>} : vector<4x32xf32>, vector<32x256xf32>, vector<4x256xf32> -> vector<4x256xf32>
    %965 = vector.extract_strided_slice %964 {offsets = [0, 0], sizes = [2, 128], strides = [1, 1]} : vector<4x256xf32> to vector<2x128xf32>
    %c2_341 = arith.constant 2 : index
    %c0_342 = arith.constant 0 : index
    %966 = vector.load %arg15[%c2_341, %c0_342] : memref<16x256xf32, #tpu.memory_space<vmem>>, vector<2x128xf32>
    %967 = arith.addf %965, %966 : vector<2x128xf32>
    %968 = vector.extract_strided_slice %964 {offsets = [2, 128], sizes = [2, 128], strides = [1, 1]} : vector<4x256xf32> to vector<2x128xf32>
    %c12_343 = arith.constant 12 : index
    %c128_344 = arith.constant 128 : index
    %969 = vector.load %arg15[%c12_343, %c128_344] : memref<16x256xf32, #tpu.memory_space<vmem>>, vector<2x128xf32>
    %970 = arith.addf %968, %969 : vector<2x128xf32>
    %971 = tpu.concatenate %967, %970 in 0 : vector<2x128xf32>, vector<2x128xf32> -> vector<4x128xf32>
    %972 = vector.extract_strided_slice %971 {offsets = [0, 0], sizes = [4, 32], strides = [1, 1]} : vector<4x128xf32> to vector<4x32xf32>
    %973 = arith.negf %972 : vector<4x32xf32>
    %974 = math.exp %973 : vector<4x32xf32>
    %cst_345 = arith.constant 1.000000e+00 : f32
    %975 = vector.broadcast %cst_345 : f32 to vector<4x32xf32>
    %976 = arith.addf %975, %974 : vector<4x32xf32>
    %977 = arith.divf %975, %976 : vector<4x32xf32>
    %978 = vector.extract_strided_slice %971 {offsets = [0, 32], sizes = [4, 32], strides = [1, 1]} : vector<4x128xf32> to vector<4x32xf32>
    %979 = arith.negf %978 : vector<4x32xf32>
    %980 = math.exp %979 : vector<4x32xf32>
    %cst_346 = arith.constant 1.000000e+00 : f32
    %981 = vector.broadcast %cst_346 : f32 to vector<4x32xf32>
    %982 = arith.addf %981, %980 : vector<4x32xf32>
    %983 = arith.divf %981, %982 : vector<4x32xf32>
    %984 = vector.extract_strided_slice %971 {offsets = [0, 64], sizes = [4, 32], strides = [1, 1]} : vector<4x128xf32> to vector<4x32xf32>
    %985 = math.tanh %984 : vector<4x32xf32>
    %986 = vector.extract_strided_slice %971 {offsets = [0, 96], sizes = [4, 32], strides = [1, 1]} : vector<4x128xf32> to vector<4x32xf32>
    %987 = arith.negf %986 : vector<4x32xf32>
    %988 = math.exp %987 : vector<4x32xf32>
    %cst_347 = arith.constant 1.000000e+00 : f32
    %989 = vector.broadcast %cst_347 : f32 to vector<4x32xf32>
    %990 = arith.addf %989, %988 : vector<4x32xf32>
    %991 = arith.divf %989, %990 : vector<4x32xf32>
    %992 = arith.mulf %983, %957 : vector<4x32xf32>
    %993 = arith.mulf %977, %985 : vector<4x32xf32>
    %994 = arith.addf %992, %993 : vector<4x32xf32>
    %995 = math.tanh %994 : vector<4x32xf32>
    %996 = arith.mulf %991, %995 : vector<4x32xf32>
    %997 = vector.extract_strided_slice %996 {offsets = [0, 0], sizes = [2, 32], strides = [1, 1]} : vector<4x32xf32> to vector<2x32xf32>
    %c2_348 = arith.constant 2 : index
    %c0_349 = arith.constant 0 : index
    %998 = vector.load %arg17[%c2_348, %c0_349] : memref<16x64xf32, #tpu.memory_space<vmem>>, vector<2x32xf32>
    tpu.vector_store %arg17[%c2_348, %c0_349], %997 {strides = array<i32>} : memref<16x64xf32, #tpu.memory_space<vmem>>, vector<2x32xf32>,
    %999 = vector.extract_strided_slice %996 {offsets = [2, 0], sizes = [2, 32], strides = [1, 1]} : vector<4x32xf32> to vector<2x32xf32>
    %c12_350 = arith.constant 12 : index
    %c32_351 = arith.constant 32 : index
    %1000 = vector.load %arg17[%c12_350, %c32_351] : memref<16x64xf32, #tpu.memory_space<vmem>>, vector<2x32xf32>
    tpu.vector_store %arg17[%c12_350, %c32_351], %999 {strides = array<i32>} : memref<16x64xf32, #tpu.memory_space<vmem>>, vector<2x32xf32>,
    %cst_352 = arith.constant dense<0.000000e+00> : vector<4x256xf32>
    %1001 = tpu.matmul %996, %926, %cst_352 {dimension_numbers = #tpu.dot_dimension_numbers<[1], [0], [0], [1], [0, 0, 1, 1], [], []>} : vector<4x32xf32>, vector<32x256xf32>, vector<4x256xf32> -> vector<4x256xf32>
    %1002 = vector.extract_strided_slice %1001 {offsets = [0, 0], sizes = [2, 128], strides = [1, 1]} : vector<4x256xf32> to vector<2x128xf32>
    %c4_353 = arith.constant 4 : index
    %c0_354 = arith.constant 0 : index
    %1003 = vector.load %arg15[%c4_353, %c0_354] : memref<16x256xf32, #tpu.memory_space<vmem>>, vector<2x128xf32>
    %1004 = arith.addf %1002, %1003 : vector<2x128xf32>
    %1005 = vector.extract_strided_slice %1001 {offsets = [2, 128], sizes = [2, 128], strides = [1, 1]} : vector<4x256xf32> to vector<2x128xf32>
    %c10_355 = arith.constant 10 : index
    %c128_356 = arith.constant 128 : index
    %1006 = vector.load %arg15[%c10_355, %c128_356] : memref<16x256xf32, #tpu.memory_space<vmem>>, vector<2x128xf32>
    %1007 = arith.addf %1005, %1006 : vector<2x128xf32>
    %1008 = tpu.concatenate %1004, %1007 in 0 : vector<2x128xf32>, vector<2x128xf32> -> vector<4x128xf32>
    %1009 = vector.extract_strided_slice %1008 {offsets = [0, 0], sizes = [4, 32], strides = [1, 1]} : vector<4x128xf32> to vector<4x32xf32>
    %1010 = arith.negf %1009 : vector<4x32xf32>
    %1011 = math.exp %1010 : vector<4x32xf32>
    %cst_357 = arith.constant 1.000000e+00 : f32
    %1012 = vector.broadcast %cst_357 : f32 to vector<4x32xf32>
    %1013 = arith.addf %1012, %1011 : vector<4x32xf32>
    %1014 = arith.divf %1012, %1013 : vector<4x32xf32>
    %1015 = vector.extract_strided_slice %1008 {offsets = [0, 32], sizes = [4, 32], strides = [1, 1]} : vector<4x128xf32> to vector<4x32xf32>
    %1016 = arith.negf %1015 : vector<4x32xf32>
    %1017 = math.exp %1016 : vector<4x32xf32>
    %cst_358 = arith.constant 1.000000e+00 : f32
    %1018 = vector.broadcast %cst_358 : f32 to vector<4x32xf32>
    %1019 = arith.addf %1018, %1017 : vector<4x32xf32>
    %1020 = arith.divf %1018, %1019 : vector<4x32xf32>
    %1021 = vector.extract_strided_slice %1008 {offsets = [0, 64], sizes = [4, 32], strides = [1, 1]} : vector<4x128xf32> to vector<4x32xf32>
    %1022 = math.tanh %1021 : vector<4x32xf32>
    %1023 = vector.extract_strided_slice %1008 {offsets = [0, 96], sizes = [4, 32], strides = [1, 1]} : vector<4x128xf32> to vector<4x32xf32>
    %1024 = arith.negf %1023 : vector<4x32xf32>
    %1025 = math.exp %1024 : vector<4x32xf32>
    %cst_359 = arith.constant 1.000000e+00 : f32
    %1026 = vector.broadcast %cst_359 : f32 to vector<4x32xf32>
    %1027 = arith.addf %1026, %1025 : vector<4x32xf32>
    %1028 = arith.divf %1026, %1027 : vector<4x32xf32>
    %1029 = arith.mulf %1020, %994 : vector<4x32xf32>
    %1030 = arith.mulf %1014, %1022 : vector<4x32xf32>
    %1031 = arith.addf %1029, %1030 : vector<4x32xf32>
    %1032 = math.tanh %1031 : vector<4x32xf32>
    %1033 = arith.mulf %1028, %1032 : vector<4x32xf32>
    %1034 = vector.extract_strided_slice %1033 {offsets = [0, 0], sizes = [2, 32], strides = [1, 1]} : vector<4x32xf32> to vector<2x32xf32>
    %c4_360 = arith.constant 4 : index
    %c0_361 = arith.constant 0 : index
    %1035 = vector.load %arg17[%c4_360, %c0_361] : memref<16x64xf32, #tpu.memory_space<vmem>>, vector<2x32xf32>
    tpu.vector_store %arg17[%c4_360, %c0_361], %1034 {strides = array<i32>} : memref<16x64xf32, #tpu.memory_space<vmem>>, vector<2x32xf32>,
    %1036 = vector.extract_strided_slice %1033 {offsets = [2, 0], sizes = [2, 32], strides = [1, 1]} : vector<4x32xf32> to vector<2x32xf32>
    %c10_362 = arith.constant 10 : index
    %c32_363 = arith.constant 32 : index
    %1037 = vector.load %arg17[%c10_362, %c32_363] : memref<16x64xf32, #tpu.memory_space<vmem>>, vector<2x32xf32>
    tpu.vector_store %arg17[%c10_362, %c32_363], %1036 {strides = array<i32>} : memref<16x64xf32, #tpu.memory_space<vmem>>, vector<2x32xf32>,
    %cst_364 = arith.constant dense<0.000000e+00> : vector<4x256xf32>
    %1038 = tpu.matmul %1033, %926, %cst_364 {dimension_numbers = #tpu.dot_dimension_numbers<[1], [0], [0], [1], [0, 0, 1, 1], [], []>} : vector<4x32xf32>, vector<32x256xf32>, vector<4x256xf32> -> vector<4x256xf32>
    %1039 = vector.extract_strided_slice %1038 {offsets = [0, 0], sizes = [2, 128], strides = [1, 1]} : vector<4x256xf32> to vector<2x128xf32>
    %c6_365 = arith.constant 6 : index
    %c0_366 = arith.constant 0 : index
    %1040 = vector.load %arg15[%c6_365, %c0_366] : memref<16x256xf32, #tpu.memory_space<vmem>>, vector<2x128xf32>
    %1041 = arith.addf %1039, %1040 : vector<2x128xf32>
    %1042 = vector.extract_strided_slice %1038 {offsets = [2, 128], sizes = [2, 128], strides = [1, 1]} : vector<4x256xf32> to vector<2x128xf32>
    %c8_367 = arith.constant 8 : index
    %c128_368 = arith.constant 128 : index
    %1043 = vector.load %arg15[%c8_367, %c128_368] : memref<16x256xf32, #tpu.memory_space<vmem>>, vector<2x128xf32>
    %1044 = arith.addf %1042, %1043 : vector<2x128xf32>
    %1045 = tpu.concatenate %1041, %1044 in 0 : vector<2x128xf32>, vector<2x128xf32> -> vector<4x128xf32>
    %1046 = vector.extract_strided_slice %1045 {offsets = [0, 0], sizes = [4, 32], strides = [1, 1]} : vector<4x128xf32> to vector<4x32xf32>
    %1047 = arith.negf %1046 : vector<4x32xf32>
    %1048 = math.exp %1047 : vector<4x32xf32>
    %cst_369 = arith.constant 1.000000e+00 : f32
    %1049 = vector.broadcast %cst_369 : f32 to vector<4x32xf32>
    %1050 = arith.addf %1049, %1048 : vector<4x32xf32>
    %1051 = arith.divf %1049, %1050 : vector<4x32xf32>
    %1052 = vector.extract_strided_slice %1045 {offsets = [0, 32], sizes = [4, 32], strides = [1, 1]} : vector<4x128xf32> to vector<4x32xf32>
    %1053 = arith.negf %1052 : vector<4x32xf32>
    %1054 = math.exp %1053 : vector<4x32xf32>
    %cst_370 = arith.constant 1.000000e+00 : f32
    %1055 = vector.broadcast %cst_370 : f32 to vector<4x32xf32>
    %1056 = arith.addf %1055, %1054 : vector<4x32xf32>
    %1057 = arith.divf %1055, %1056 : vector<4x32xf32>
    %1058 = vector.extract_strided_slice %1045 {offsets = [0, 64], sizes = [4, 32], strides = [1, 1]} : vector<4x128xf32> to vector<4x32xf32>
    %1059 = math.tanh %1058 : vector<4x32xf32>
    %1060 = vector.extract_strided_slice %1045 {offsets = [0, 96], sizes = [4, 32], strides = [1, 1]} : vector<4x128xf32> to vector<4x32xf32>
    %1061 = arith.negf %1060 : vector<4x32xf32>
    %1062 = math.exp %1061 : vector<4x32xf32>
    %cst_371 = arith.constant 1.000000e+00 : f32
    %1063 = vector.broadcast %cst_371 : f32 to vector<4x32xf32>
    %1064 = arith.addf %1063, %1062 : vector<4x32xf32>
    %1065 = arith.divf %1063, %1064 : vector<4x32xf32>
    %1066 = arith.mulf %1057, %1031 : vector<4x32xf32>
    %1067 = arith.mulf %1051, %1059 : vector<4x32xf32>
    %1068 = arith.addf %1066, %1067 : vector<4x32xf32>
    %1069 = math.tanh %1068 : vector<4x32xf32>
    %1070 = arith.mulf %1065, %1069 : vector<4x32xf32>
    %1071 = vector.extract_strided_slice %1070 {offsets = [0, 0], sizes = [2, 32], strides = [1, 1]} : vector<4x32xf32> to vector<2x32xf32>
    %c6_372 = arith.constant 6 : index
    %c0_373 = arith.constant 0 : index
    %1072 = vector.load %arg17[%c6_372, %c0_373] : memref<16x64xf32, #tpu.memory_space<vmem>>, vector<2x32xf32>
    tpu.vector_store %arg17[%c6_372, %c0_373], %1071 {strides = array<i32>} : memref<16x64xf32, #tpu.memory_space<vmem>>, vector<2x32xf32>,
    %1073 = vector.extract_strided_slice %1070 {offsets = [2, 0], sizes = [2, 32], strides = [1, 1]} : vector<4x32xf32> to vector<2x32xf32>
    %c8_374 = arith.constant 8 : index
    %c32_375 = arith.constant 32 : index
    %1074 = vector.load %arg17[%c8_374, %c32_375] : memref<16x64xf32, #tpu.memory_space<vmem>>, vector<2x32xf32>
    tpu.vector_store %arg17[%c8_374, %c32_375], %1073 {strides = array<i32>} : memref<16x64xf32, #tpu.memory_space<vmem>>, vector<2x32xf32>,
    %cst_376 = arith.constant dense<0.000000e+00> : vector<4x256xf32>
    %1075 = tpu.matmul %1070, %926, %cst_376 {dimension_numbers = #tpu.dot_dimension_numbers<[1], [0], [0], [1], [0, 0, 1, 1], [], []>} : vector<4x32xf32>, vector<32x256xf32>, vector<4x256xf32> -> vector<4x256xf32>
    %1076 = vector.extract_strided_slice %1075 {offsets = [0, 0], sizes = [2, 128], strides = [1, 1]} : vector<4x256xf32> to vector<2x128xf32>
    %c8_377 = arith.constant 8 : index
    %c0_378 = arith.constant 0 : index
    %1077 = vector.load %arg15[%c8_377, %c0_378] : memref<16x256xf32, #tpu.memory_space<vmem>>, vector<2x128xf32>
    %1078 = arith.addf %1076, %1077 : vector<2x128xf32>
    %1079 = vector.extract_strided_slice %1075 {offsets = [2, 128], sizes = [2, 128], strides = [1, 1]} : vector<4x256xf32> to vector<2x128xf32>
    %c6_379 = arith.constant 6 : index
    %c128_380 = arith.constant 128 : index
    %1080 = vector.load %arg15[%c6_379, %c128_380] : memref<16x256xf32, #tpu.memory_space<vmem>>, vector<2x128xf32>
    %1081 = arith.addf %1079, %1080 : vector<2x128xf32>
    %1082 = tpu.concatenate %1078, %1081 in 0 : vector<2x128xf32>, vector<2x128xf32> -> vector<4x128xf32>
    %1083 = vector.extract_strided_slice %1082 {offsets = [0, 0], sizes = [4, 32], strides = [1, 1]} : vector<4x128xf32> to vector<4x32xf32>
    %1084 = arith.negf %1083 : vector<4x32xf32>
    %1085 = math.exp %1084 : vector<4x32xf32>
    %cst_381 = arith.constant 1.000000e+00 : f32
    %1086 = vector.broadcast %cst_381 : f32 to vector<4x32xf32>
    %1087 = arith.addf %1086, %1085 : vector<4x32xf32>
    %1088 = arith.divf %1086, %1087 : vector<4x32xf32>
    %1089 = vector.extract_strided_slice %1082 {offsets = [0, 32], sizes = [4, 32], strides = [1, 1]} : vector<4x128xf32> to vector<4x32xf32>
    %1090 = arith.negf %1089 : vector<4x32xf32>
    %1091 = math.exp %1090 : vector<4x32xf32>
    %cst_382 = arith.constant 1.000000e+00 : f32
    %1092 = vector.broadcast %cst_382 : f32 to vector<4x32xf32>
    %1093 = arith.addf %1092, %1091 : vector<4x32xf32>
    %1094 = arith.divf %1092, %1093 : vector<4x32xf32>
    %1095 = vector.extract_strided_slice %1082 {offsets = [0, 64], sizes = [4, 32], strides = [1, 1]} : vector<4x128xf32> to vector<4x32xf32>
    %1096 = math.tanh %1095 : vector<4x32xf32>
    %1097 = vector.extract_strided_slice %1082 {offsets = [0, 96], sizes = [4, 32], strides = [1, 1]} : vector<4x128xf32> to vector<4x32xf32>
    %1098 = arith.negf %1097 : vector<4x32xf32>
    %1099 = math.exp %1098 : vector<4x32xf32>
    %cst_383 = arith.constant 1.000000e+00 : f32
    %1100 = vector.broadcast %cst_383 : f32 to vector<4x32xf32>
    %1101 = arith.addf %1100, %1099 : vector<4x32xf32>
    %1102 = arith.divf %1100, %1101 : vector<4x32xf32>
    %1103 = arith.mulf %1094, %1068 : vector<4x32xf32>
    %1104 = arith.mulf %1088, %1096 : vector<4x32xf32>
    %1105 = arith.addf %1103, %1104 : vector<4x32xf32>
    %1106 = math.tanh %1105 : vector<4x32xf32>
    %1107 = arith.mulf %1102, %1106 : vector<4x32xf32>
    %1108 = vector.extract_strided_slice %1107 {offsets = [0, 0], sizes = [2, 32], strides = [1, 1]} : vector<4x32xf32> to vector<2x32xf32>
    %c8_384 = arith.constant 8 : index
    %c0_385 = arith.constant 0 : index
    %1109 = vector.load %arg17[%c8_384, %c0_385] : memref<16x64xf32, #tpu.memory_space<vmem>>, vector<2x32xf32>
    tpu.vector_store %arg17[%c8_384, %c0_385], %1108 {strides = array<i32>} : memref<16x64xf32, #tpu.memory_space<vmem>>, vector<2x32xf32>,
    %1110 = vector.extract_strided_slice %1107 {offsets = [2, 0], sizes = [2, 32], strides = [1, 1]} : vector<4x32xf32> to vector<2x32xf32>
    %c6_386 = arith.constant 6 : index
    %c32_387 = arith.constant 32 : index
    %1111 = vector.load %arg17[%c6_386, %c32_387] : memref<16x64xf32, #tpu.memory_space<vmem>>, vector<2x32xf32>
    tpu.vector_store %arg17[%c6_386, %c32_387], %1110 {strides = array<i32>} : memref<16x64xf32, #tpu.memory_space<vmem>>, vector<2x32xf32>,
    %cst_388 = arith.constant dense<0.000000e+00> : vector<4x256xf32>
    %1112 = tpu.matmul %1107, %926, %cst_388 {dimension_numbers = #tpu.dot_dimension_numbers<[1], [0], [0], [1], [0, 0, 1, 1], [], []>} : vector<4x32xf32>, vector<32x256xf32>, vector<4x256xf32> -> vector<4x256xf32>
    %1113 = vector.extract_strided_slice %1112 {offsets = [0, 0], sizes = [2, 128], strides = [1, 1]} : vector<4x256xf32> to vector<2x128xf32>
    %c10_389 = arith.constant 10 : index
    %c0_390 = arith.constant 0 : index
    %1114 = vector.load %arg15[%c10_389, %c0_390] : memref<16x256xf32, #tpu.memory_space<vmem>>, vector<2x128xf32>
    %1115 = arith.addf %1113, %1114 : vector<2x128xf32>
    %1116 = vector.extract_strided_slice %1112 {offsets = [2, 128], sizes = [2, 128], strides = [1, 1]} : vector<4x256xf32> to vector<2x128xf32>
    %c4_391 = arith.constant 4 : index
    %c128_392 = arith.constant 128 : index
    %1117 = vector.load %arg15[%c4_391, %c128_392] : memref<16x256xf32, #tpu.memory_space<vmem>>, vector<2x128xf32>
    %1118 = arith.addf %1116, %1117 : vector<2x128xf32>
    %1119 = tpu.concatenate %1115, %1118 in 0 : vector<2x128xf32>, vector<2x128xf32> -> vector<4x128xf32>
    %1120 = vector.extract_strided_slice %1119 {offsets = [0, 0], sizes = [4, 32], strides = [1, 1]} : vector<4x128xf32> to vector<4x32xf32>
    %1121 = arith.negf %1120 : vector<4x32xf32>
    %1122 = math.exp %1121 : vector<4x32xf32>
    %cst_393 = arith.constant 1.000000e+00 : f32
    %1123 = vector.broadcast %cst_393 : f32 to vector<4x32xf32>
    %1124 = arith.addf %1123, %1122 : vector<4x32xf32>
    %1125 = arith.divf %1123, %1124 : vector<4x32xf32>
    %1126 = vector.extract_strided_slice %1119 {offsets = [0, 32], sizes = [4, 32], strides = [1, 1]} : vector<4x128xf32> to vector<4x32xf32>
    %1127 = arith.negf %1126 : vector<4x32xf32>
    %1128 = math.exp %1127 : vector<4x32xf32>
    %cst_394 = arith.constant 1.000000e+00 : f32
    %1129 = vector.broadcast %cst_394 : f32 to vector<4x32xf32>
    %1130 = arith.addf %1129, %1128 : vector<4x32xf32>
    %1131 = arith.divf %1129, %1130 : vector<4x32xf32>
    %1132 = vector.extract_strided_slice %1119 {offsets = [0, 64], sizes = [4, 32], strides = [1, 1]} : vector<4x128xf32> to vector<4x32xf32>
    %1133 = math.tanh %1132 : vector<4x32xf32>
    %1134 = vector.extract_strided_slice %1119 {offsets = [0, 96], sizes = [4, 32], strides = [1, 1]} : vector<4x128xf32> to vector<4x32xf32>
    %1135 = arith.negf %1134 : vector<4x32xf32>
    %1136 = math.exp %1135 : vector<4x32xf32>
    %cst_395 = arith.constant 1.000000e+00 : f32
    %1137 = vector.broadcast %cst_395 : f32 to vector<4x32xf32>
    %1138 = arith.addf %1137, %1136 : vector<4x32xf32>
    %1139 = arith.divf %1137, %1138 : vector<4x32xf32>
    %1140 = arith.mulf %1131, %1105 : vector<4x32xf32>
    %1141 = arith.mulf %1125, %1133 : vector<4x32xf32>
    %1142 = arith.addf %1140, %1141 : vector<4x32xf32>
    %1143 = math.tanh %1142 : vector<4x32xf32>
    %1144 = arith.mulf %1139, %1143 : vector<4x32xf32>
    %1145 = vector.extract_strided_slice %1144 {offsets = [0, 0], sizes = [2, 32], strides = [1, 1]} : vector<4x32xf32> to vector<2x32xf32>
    %c10_396 = arith.constant 10 : index
    %c0_397 = arith.constant 0 : index
    %1146 = vector.load %arg17[%c10_396, %c0_397] : memref<16x64xf32, #tpu.memory_space<vmem>>, vector<2x32xf32>
    tpu.vector_store %arg17[%c10_396, %c0_397], %1145 {strides = array<i32>} : memref<16x64xf32, #tpu.memory_space<vmem>>, vector<2x32xf32>,
    %1147 = vector.extract_strided_slice %1144 {offsets = [2, 0], sizes = [2, 32], strides = [1, 1]} : vector<4x32xf32> to vector<2x32xf32>
    %c4_398 = arith.constant 4 : index
    %c32_399 = arith.constant 32 : index
    %1148 = vector.load %arg17[%c4_398, %c32_399] : memref<16x64xf32, #tpu.memory_space<vmem>>, vector<2x32xf32>
    tpu.vector_store %arg17[%c4_398, %c32_399], %1147 {strides = array<i32>} : memref<16x64xf32, #tpu.memory_space<vmem>>, vector<2x32xf32>,
    %cst_400 = arith.constant dense<0.000000e+00> : vector<4x256xf32>
    %1149 = tpu.matmul %1144, %926, %cst_400 {dimension_numbers = #tpu.dot_dimension_numbers<[1], [0], [0], [1], [0, 0, 1, 1], [], []>} : vector<4x32xf32>, vector<32x256xf32>, vector<4x256xf32> -> vector<4x256xf32>
    %1150 = vector.extract_strided_slice %1149 {offsets = [0, 0], sizes = [2, 128], strides = [1, 1]} : vector<4x256xf32> to vector<2x128xf32>
    %c12_401 = arith.constant 12 : index
    %c0_402 = arith.constant 0 : index
    %1151 = vector.load %arg15[%c12_401, %c0_402] : memref<16x256xf32, #tpu.memory_space<vmem>>, vector<2x128xf32>
    %1152 = arith.addf %1150, %1151 : vector<2x128xf32>
    %1153 = vector.extract_strided_slice %1149 {offsets = [2, 128], sizes = [2, 128], strides = [1, 1]} : vector<4x256xf32> to vector<2x128xf32>
    %c2_403 = arith.constant 2 : index
    %c128_404 = arith.constant 128 : index
    %1154 = vector.load %arg15[%c2_403, %c128_404] : memref<16x256xf32, #tpu.memory_space<vmem>>, vector<2x128xf32>
    %1155 = arith.addf %1153, %1154 : vector<2x128xf32>
    %1156 = tpu.concatenate %1152, %1155 in 0 : vector<2x128xf32>, vector<2x128xf32> -> vector<4x128xf32>
    %1157 = vector.extract_strided_slice %1156 {offsets = [0, 0], sizes = [4, 32], strides = [1, 1]} : vector<4x128xf32> to vector<4x32xf32>
    %1158 = arith.negf %1157 : vector<4x32xf32>
    %1159 = math.exp %1158 : vector<4x32xf32>
    %cst_405 = arith.constant 1.000000e+00 : f32
    %1160 = vector.broadcast %cst_405 : f32 to vector<4x32xf32>
    %1161 = arith.addf %1160, %1159 : vector<4x32xf32>
    %1162 = arith.divf %1160, %1161 : vector<4x32xf32>
    %1163 = vector.extract_strided_slice %1156 {offsets = [0, 32], sizes = [4, 32], strides = [1, 1]} : vector<4x128xf32> to vector<4x32xf32>
    %1164 = arith.negf %1163 : vector<4x32xf32>
    %1165 = math.exp %1164 : vector<4x32xf32>
    %cst_406 = arith.constant 1.000000e+00 : f32
    %1166 = vector.broadcast %cst_406 : f32 to vector<4x32xf32>
    %1167 = arith.addf %1166, %1165 : vector<4x32xf32>
    %1168 = arith.divf %1166, %1167 : vector<4x32xf32>
    %1169 = vector.extract_strided_slice %1156 {offsets = [0, 64], sizes = [4, 32], strides = [1, 1]} : vector<4x128xf32> to vector<4x32xf32>
    %1170 = math.tanh %1169 : vector<4x32xf32>
    %1171 = vector.extract_strided_slice %1156 {offsets = [0, 96], sizes = [4, 32], strides = [1, 1]} : vector<4x128xf32> to vector<4x32xf32>
    %1172 = arith.negf %1171 : vector<4x32xf32>
    %1173 = math.exp %1172 : vector<4x32xf32>
    %cst_407 = arith.constant 1.000000e+00 : f32
    %1174 = vector.broadcast %cst_407 : f32 to vector<4x32xf32>
    %1175 = arith.addf %1174, %1173 : vector<4x32xf32>
    %1176 = arith.divf %1174, %1175 : vector<4x32xf32>
    %1177 = arith.mulf %1168, %1142 : vector<4x32xf32>
    %1178 = arith.mulf %1162, %1170 : vector<4x32xf32>
    %1179 = arith.addf %1177, %1178 : vector<4x32xf32>
    %1180 = math.tanh %1179 : vector<4x32xf32>
    %1181 = arith.mulf %1176, %1180 : vector<4x32xf32>
    %1182 = vector.extract_strided_slice %1181 {offsets = [0, 0], sizes = [2, 32], strides = [1, 1]} : vector<4x32xf32> to vector<2x32xf32>
    %c12_408 = arith.constant 12 : index
    %c0_409 = arith.constant 0 : index
    %1183 = vector.load %arg17[%c12_408, %c0_409] : memref<16x64xf32, #tpu.memory_space<vmem>>, vector<2x32xf32>
    tpu.vector_store %arg17[%c12_408, %c0_409], %1182 {strides = array<i32>} : memref<16x64xf32, #tpu.memory_space<vmem>>, vector<2x32xf32>,
    %1184 = vector.extract_strided_slice %1181 {offsets = [2, 0], sizes = [2, 32], strides = [1, 1]} : vector<4x32xf32> to vector<2x32xf32>
    %c2_410 = arith.constant 2 : index
    %c32_411 = arith.constant 32 : index
    %1185 = vector.load %arg17[%c2_410, %c32_411] : memref<16x64xf32, #tpu.memory_space<vmem>>, vector<2x32xf32>
    tpu.vector_store %arg17[%c2_410, %c32_411], %1184 {strides = array<i32>} : memref<16x64xf32, #tpu.memory_space<vmem>>, vector<2x32xf32>,
    %cst_412 = arith.constant dense<0.000000e+00> : vector<4x256xf32>
    %1186 = tpu.matmul %1181, %926, %cst_412 {dimension_numbers = #tpu.dot_dimension_numbers<[1], [0], [0], [1], [0, 0, 1, 1], [], []>} : vector<4x32xf32>, vector<32x256xf32>, vector<4x256xf32> -> vector<4x256xf32>
    %1187 = vector.extract_strided_slice %1186 {offsets = [0, 0], sizes = [2, 128], strides = [1, 1]} : vector<4x256xf32> to vector<2x128xf32>
    %c14_413 = arith.constant 14 : index
    %c0_414 = arith.constant 0 : index
    %1188 = vector.load %arg15[%c14_413, %c0_414] : memref<16x256xf32, #tpu.memory_space<vmem>>, vector<2x128xf32>
    %1189 = arith.addf %1187, %1188 : vector<2x128xf32>
    %1190 = vector.extract_strided_slice %1186 {offsets = [2, 128], sizes = [2, 128], strides = [1, 1]} : vector<4x256xf32> to vector<2x128xf32>
    %c0_415 = arith.constant 0 : index
    %c128_416 = arith.constant 128 : index
    %1191 = vector.load %arg15[%c0_415, %c128_416] : memref<16x256xf32, #tpu.memory_space<vmem>>, vector<2x128xf32>
    %1192 = arith.addf %1190, %1191 : vector<2x128xf32>
    %1193 = tpu.concatenate %1189, %1192 in 0 : vector<2x128xf32>, vector<2x128xf32> -> vector<4x128xf32>
    %1194 = vector.extract_strided_slice %1193 {offsets = [0, 0], sizes = [4, 32], strides = [1, 1]} : vector<4x128xf32> to vector<4x32xf32>
    %1195 = arith.negf %1194 : vector<4x32xf32>
    %1196 = math.exp %1195 : vector<4x32xf32>
    %cst_417 = arith.constant 1.000000e+00 : f32
    %1197 = vector.broadcast %cst_417 : f32 to vector<4x32xf32>
    %1198 = arith.addf %1197, %1196 : vector<4x32xf32>
    %1199 = arith.divf %1197, %1198 : vector<4x32xf32>
    %1200 = vector.extract_strided_slice %1193 {offsets = [0, 32], sizes = [4, 32], strides = [1, 1]} : vector<4x128xf32> to vector<4x32xf32>
    %1201 = arith.negf %1200 : vector<4x32xf32>
    %1202 = math.exp %1201 : vector<4x32xf32>
    %cst_418 = arith.constant 1.000000e+00 : f32
    %1203 = vector.broadcast %cst_418 : f32 to vector<4x32xf32>
    %1204 = arith.addf %1203, %1202 : vector<4x32xf32>
    %1205 = arith.divf %1203, %1204 : vector<4x32xf32>
    %1206 = vector.extract_strided_slice %1193 {offsets = [0, 64], sizes = [4, 32], strides = [1, 1]} : vector<4x128xf32> to vector<4x32xf32>
    %1207 = math.tanh %1206 : vector<4x32xf32>
    %1208 = vector.extract_strided_slice %1193 {offsets = [0, 96], sizes = [4, 32], strides = [1, 1]} : vector<4x128xf32> to vector<4x32xf32>
    %1209 = arith.negf %1208 : vector<4x32xf32>
    %1210 = math.exp %1209 : vector<4x32xf32>
    %cst_419 = arith.constant 1.000000e+00 : f32
    %1211 = vector.broadcast %cst_419 : f32 to vector<4x32xf32>
    %1212 = arith.addf %1211, %1210 : vector<4x32xf32>
    %1213 = arith.divf %1211, %1212 : vector<4x32xf32>
    %1214 = arith.mulf %1205, %1179 : vector<4x32xf32>
    %1215 = arith.mulf %1199, %1207 : vector<4x32xf32>
    %1216 = arith.addf %1214, %1215 : vector<4x32xf32>
    %1217 = math.tanh %1216 : vector<4x32xf32>
    %1218 = arith.mulf %1213, %1217 : vector<4x32xf32>
    %1219 = vector.extract_strided_slice %1218 {offsets = [0, 0], sizes = [2, 32], strides = [1, 1]} : vector<4x32xf32> to vector<2x32xf32>
    %c14_420 = arith.constant 14 : index
    %c0_421 = arith.constant 0 : index
    %1220 = vector.load %arg17[%c14_420, %c0_421] : memref<16x64xf32, #tpu.memory_space<vmem>>, vector<2x32xf32>
    tpu.vector_store %arg17[%c14_420, %c0_421], %1219 {strides = array<i32>} : memref<16x64xf32, #tpu.memory_space<vmem>>, vector<2x32xf32>,
    %1221 = vector.extract_strided_slice %1218 {offsets = [2, 0], sizes = [2, 32], strides = [1, 1]} : vector<4x32xf32> to vector<2x32xf32>
    %c0_422 = arith.constant 0 : index
    %c32_423 = arith.constant 32 : index
    %1222 = vector.load %arg17[%c0_422, %c32_423] : memref<16x64xf32, #tpu.memory_space<vmem>>, vector<2x32xf32>
    tpu.vector_store %arg17[%c0_422, %c32_423], %1221 {strides = array<i32>} : memref<16x64xf32, #tpu.memory_space<vmem>>, vector<2x32xf32>,
    %c14_424 = arith.constant 14 : index
    %c0_425 = arith.constant 0 : index
    %1223 = vector.load %arg17[%c14_424, %c0_425] : memref<16x64xf32, #tpu.memory_space<vmem>>, vector<2x64xf32>
    %c0_426 = arith.constant 0 : index
    %c0_427 = arith.constant 0 : index
    %1224 = vector.load %arg14[%c0_426, %c0_427] : memref<2x128xf32, #tpu.memory_space<vmem>>, vector<2x64xf32>
    tpu.vector_store %arg14[%c0_426, %c0_427], %1223 {strides = array<i32>} : memref<2x128xf32, #tpu.memory_space<vmem>>, vector<2x64xf32>,
    %1225 = vector.extract_strided_slice %914 {offsets = [0, 0], sizes = [2, 32], strides = [1, 1]} : vector<4x32xf32> to vector<2x32xf32>
    %c0_428 = arith.constant 0 : index
    %c64_429 = arith.constant 64 : index
    %1226 = vector.load %arg14[%c0_428, %c64_429] : memref<2x128xf32, #tpu.memory_space<vmem>>, vector<2x32xf32>
    tpu.vector_store %arg14[%c0_428, %c64_429], %1225 {strides = array<i32>} : memref<2x128xf32, #tpu.memory_space<vmem>>, vector<2x32xf32>,
    %1227 = vector.extract_strided_slice %1218 {offsets = [2, 0], sizes = [2, 32], strides = [1, 1]} : vector<4x32xf32> to vector<2x32xf32>
    %c0_430 = arith.constant 0 : index
    %c96_431 = arith.constant 96 : index
    %1228 = vector.load %arg14[%c0_430, %c96_431] : memref<2x128xf32, #tpu.memory_space<vmem>>, vector<2x32xf32>
    tpu.vector_store %arg14[%c0_430, %c96_431], %1227 {strides = array<i32>} : memref<2x128xf32, #tpu.memory_space<vmem>>, vector<2x32xf32>,
    return
  }
}

</mosaic_0001>

<bundles_post_ra>
// kernel: tpu_custom_call.1
= control target key start
LH: loop header
LB: loop body
LE: loop exit
PB: predicated region body
PF: predicated region fallthrough
CT: control target
= control target key end

     0   :  { %20 = vsyncpa [#allocation6], 0  ;;  %s6219_s0 = inlined_call_operand.hbm [shape: f32[16,16], index: 0, kind: input, shape index: {}]   ;;  %s6220_s1 = inlined_call_operand.hbm [shape: f32[16,256], index: 1, kind: input, shape index: {}]   ;;  %s6221_s2 = inlined_call_operand.hbm [shape: f32[32,256], index: 2, kind: input, shape index: {}]   ;;  %s6222_s3 = inlined_call_operand.vmem [shape: f32[1,256], index: 3, kind: input, shape index: {}]   ;;  %s6223_s4 = inlined_call_operand.hbm [shape: f32[64,256], index: 4, kind: input, shape index: {}]   ;;  %s6224_s5 = inlined_call_operand.hbm [shape: f32[32,256], index: 5, kind: input, shape index: {}]   ;;  %s6225_s6 = inlined_call_operand.vmem [shape: f32[1,256], index: 6, kind: input, shape index: {}]   ;;  %s6226_s7 = inlined_call_operand.hbm [shape: f32[16,256], index: 7, kind: input, shape index: {}]   ;;  %s6227_s8 = inlined_call_operand.hbm [shape: f32[32,256], index: 8, kind: input, shape index: {}]   ;;  %s6228_s9 = inlined_call_operand.vmem [shape: f32[1,256], index: 9, kind: input, shape index: {}]   ;;  %s6229_s10 = inlined_call_operand.hbm [shape: f32[64,256], index: 10, kind: input, shape index: {}]   ;;  %s6230_s11 = inlined_call_operand.hbm [shape: f32[32,256], index: 11, kind: input, shape index: {}]   ;;  %s6231_s12 = inlined_call_operand.vmem [shape: f32[1,256], index: 12, kind: input, shape index: {}]   ;;  %s6232_s13 = inlined_call_operand.hbm [shape: f32[2,128], index: 13, kind: output, shape index: {0}]   ;;  %s6233_s14 = inlined_call_operand.hbm [shape: f32[2,128], index: 14, kind: output, shape index: {1}]  }
   0x1   :  { %21 = vsyncpa [#allocation9], 0 }
   0x2   :  { %22 = vsyncpa [#allocation12], 0 }
   0x3   :  { %23 = vsyncpa [#allocation15], 0 }
   0x4   :  { %24 = vsyncpa [#allocation18], 0 }
   0x5   :  { %25 = vsyncpa [#allocation7], 0 }
   0x6   :  { %26 = vsyncpa [#allocation22], 0  ;;  %s5294_s29 = smov [#allocation8]   ;;  %s5038_s17 = scalar_lea.hbm %s6220_s1, 512 }
   0x7   :  { %s44_s30 = sshll.u32 %s5294_s29, 4  ;;  %p5039_p0 = scmp.ne.s32.totalorder %s6220_s1, %s5038_s17  ;;  %s45_s30 = int_to_ptr.vmem [resolvable:$true] %s44_s30 }
   0x8   :  { %p5042_p1 = scmp.lt.u32.totalorder %s5038_s17, %s6220_s1 }
   0xa   :  { %p5044_p2 = pnand %p5042_p1, %p5039_p0 }
   0xc   :  { %5047 = shalt.err (!%p5044_p2)
}
   0xd   :  { %s5048_s22 = scalar_lea.vmem %s45_s30, 512  ;;  %p5053_p4 = scmp.lt.s32.totalorder %s45_s30, %s45_s30 }
   0xe   :  { %p5049_p3 = scmp.ne.s32.totalorder %s45_s30, %s5048_s22  ;;  %p5054_p5 = scmp.lt.s32.totalorder %s5048_s22, %s5048_s22 }
  0x10   :  { %p5055_p6 = por %p5054_p5, %p5053_p4 }
  0x12   :  { %p5056_p7 = pnand %p5055_p6, %p5049_p3 }
  0x14   :  { %5059 = shalt.err (!%p5056_p7)
}
  0x15   :  { %s5295_s23 = smov 256   ;;  %s5296_s24 = smov 16  }
  0x16   :  { %50 = dma.hbm_to_vmem [thread:$0]  %s6220_s1, 512, %s45_s30, [#allocation9], %s5295_s23, %s5295_s23, %s5296_s24  }
  0x17   :  { %s5297_s27 = smov [#allocation11]   ;;  %s5298_s29 = smov [#allocation14]  }
  0x18   :  { %s70_s28 = sshll.u32 %s5297_s27, 4  ;;  %s96_s15 = sshll.u32 %s5298_s29, 4  ;;  %s71_s28 = int_to_ptr.vmem [resolvable:$true] %s70_s28  ;;  %s97_s15 = int_to_ptr.vmem [resolvable:$true] %s96_s15 }
  0x19   :  { %s5060_s18 = scalar_lea.hbm %s6223_s4, 2048 }
  0x1a   :  { %p5061_p8 = scmp.ne.s32.totalorder %s6223_s4, %s5060_s18  ;;  %p5064_p9 = scmp.lt.u32.totalorder %s5060_s18, %s6223_s4 }
  0x1c   :  { %p5066_p10 = pnand %p5064_p9, %p5061_p8 }
  0x1e   :  { %5069 = shalt.err (!%p5066_p10)
}
  0x1f   :  { %s5070_s1 = scalar_lea.vmem %s71_s28, 2048  ;;  %p5075_p12 = scmp.lt.s32.totalorder %s71_s28, %s71_s28 }
  0x20   :  { %p5071_p11 = scmp.ne.s32.totalorder %s71_s28, %s5070_s1  ;;  %p5076_p13 = scmp.lt.s32.totalorder %s5070_s1, %s5070_s1 }
  0x22   :  { %p5077_p0 = por %p5076_p13, %p5075_p12 }
  0x24   :  { %p5078_p1 = pnand %p5077_p0, %p5071_p11 }
  0x26   :  { %5081 = shalt.err (!%p5078_p1)
}
  0x27   :  { %76 = dma.hbm_to_vmem [thread:$0]  %s6223_s4, 2048, %s71_s28, [#allocation12], %s5295_s23, %s5295_s23, %s5296_s24  }
  0x28   :  { %s5082_s29 = scalar_lea.hbm %s6226_s7, 512 }
  0x29   :  { %p5083_p2 = scmp.ne.s32.totalorder %s6226_s7, %s5082_s29  ;;  %p5086_p3 = scmp.lt.u32.totalorder %s5082_s29, %s6226_s7 }
  0x2b   :  { %p5088_p4 = pnand %p5086_p3, %p5083_p2 }
  0x2d   :  { %5091 = shalt.err (!%p5088_p4)
}
  0x2e   :  { %s5092_s20 = scalar_lea.vmem %s97_s15, 512  ;;  %p5097_p6 = scmp.lt.s32.totalorder %s97_s15, %s97_s15 }
  0x2f   :  { %p5093_p5 = scmp.ne.s32.totalorder %s97_s15, %s5092_s20  ;;  %p5098_p7 = scmp.lt.s32.totalorder %s5092_s20, %s5092_s20 }
  0x31   :  { %p5099_p8 = por %p5098_p7, %p5097_p6 }
  0x33   :  { %p5100_p9 = pnand %p5099_p8, %p5093_p5 }
  0x35   :  { %5103 = shalt.err (!%p5100_p9)
}
  0x36   :  { %102 = dma.hbm_to_vmem [thread:$0]  %s6226_s7, 512, %s97_s15, [#allocation15], %s5295_s23, %s5295_s23, %s5296_s24  }
  0x37   :  { %s5299_s21 = smov [#allocation17]   ;;  %s5300_s1 = smov [#allocation5]  }
  0x38   :  { %s122_s22 = sshll.u32 %s5299_s21, 4  ;;  %s32_s30 = sshll.u32 %s5300_s1, 4  ;;  %s123_s22 = int_to_ptr.vmem [resolvable:$true] %s122_s22  ;;  %s33_s30 = int_to_ptr.vmem [resolvable:$true] %s32_s30 }
  0x39   :  { %s5104_s27 = scalar_lea.hbm %s6229_s10, 2048 }
  0x3a   :  { %p5105_p10 = scmp.ne.s32.totalorder %s6229_s10, %s5104_s27  ;;  %p5108_p11 = scmp.lt.u32.totalorder %s5104_s27, %s6229_s10 }
  0x3c   :  { %p5110_p12 = pnand %p5108_p11, %p5105_p10 }
  0x3e   :  { %5113 = shalt.err (!%p5110_p12)
}
  0x3f   :  { %s5114_s7 = scalar_lea.vmem %s123_s22, 2048  ;;  %p5119_p0 = scmp.lt.s32.totalorder %s123_s22, %s123_s22 }
  0x40   :  { %p5115_p13 = scmp.ne.s32.totalorder %s123_s22, %s5114_s7  ;;  %p5120_p1 = scmp.lt.s32.totalorder %s5114_s7, %s5114_s7 }
  0x42   :  { %p5121_p2 = por %p5120_p1, %p5119_p0 }
  0x44   :  { %p5122_p3 = pnand %p5121_p2, %p5115_p13 }
  0x46   :  { %5125 = shalt.err (!%p5122_p3)
}
  0x47   :  { %128 = dma.hbm_to_vmem [thread:$0]  %s6229_s10, 2048, %s123_s22, [#allocation18], %s5295_s23, %s5295_s23, %s5296_s24  }
  0x48   :  { %s5126_s28 = scalar_lea.hbm %s6219_s0, 256 }
  0x49   :  { %p5127_p4 = scmp.ne.s32.totalorder %s6219_s0, %s5126_s28  ;;  %p5130_p5 = scmp.lt.u32.totalorder %s5126_s28, %s6219_s0 }
  0x4b   :  { %p5132_p6 = pnand %p5130_p5, %p5127_p4 }
  0x4d   :  { %5135 = shalt.err (!%p5132_p6)
}
  0x4e   :  { %s5136_s27 = scalar_lea.vmem %s33_s30, 256  ;;  %p5141_p8 = scmp.lt.s32.totalorder %s33_s30, %s33_s30 }
  0x4f   :  { %p5137_p7 = scmp.ne.s32.totalorder %s33_s30, %s5136_s27  ;;  %p5142_p9 = scmp.lt.s32.totalorder %s5136_s27, %s5136_s27 }
  0x51   :  { %p5143_p10 = por %p5142_p9, %p5141_p8 }
  0x53   :  { %p5144_p11 = pnand %p5143_p10, %p5137_p7 }
  0x55   :  { %5147 = shalt.err (!%p5144_p11)
}
  0x56   :  { %s5301_s10 = smov 128   ;;  %s5302_s22 = smov 8  }
  0x57   :  { %38 = dma.hbm_to_vmem [thread:$0]  %s6219_s0, 256, %s33_s30, [#allocation6], %s5301_s10, %s5301_s10, %s5302_s22  }
  0x58   :  { %s5303_s17 = smov [#allocation10]   ;;  %s5304_s7 = smov [#allocation13]  }
  0x59   :  { %s56_s18 = sshll.u32 %s5303_s17, 4  ;;  %s82_s15 = sshll.u32 %s5304_s7, 4  ;;  %s57_s18 = int_to_ptr.vmem [resolvable:$true] %s56_s18  ;;  %s83_s15 = int_to_ptr.vmem [resolvable:$true] %s82_s15 }
  0x5a   :  { %s5148_s4 = scalar_lea.hbm %s6221_s2, 1024 }
  0x5b   :  { %p5149_p12 = scmp.ne.s32.totalorder %s6221_s2, %s5148_s4  ;;  %p5152_p13 = scmp.lt.u32.totalorder %s5148_s4, %s6221_s2 }
  0x5d   :  { %p5154_p0 = pnand %p5152_p13, %p5149_p12 }
  0x5f   :  { %5157 = shalt.err (!%p5154_p0)
}
  0x60   :  { %s5158_s0 = scalar_lea.vmem %s57_s18, 1024  ;;  %p5163_p2 = scmp.lt.s32.totalorder %s57_s18, %s57_s18 }
  0x61   :  { %p5159_p1 = scmp.ne.s32.totalorder %s57_s18, %s5158_s0  ;;  %p5164_p3 = scmp.lt.s32.totalorder %s5158_s0, %s5158_s0 }
  0x63   :  { %p5165_p4 = por %p5164_p3, %p5163_p2 }
  0x65   :  { %p5166_p5 = pnand %p5165_p4, %p5159_p1 }
  0x67   :  { %5169 = shalt.err (!%p5166_p5)
}
  0x68   :  { %62 = dma.hbm_to_vmem [thread:$0]  %s6221_s2, 1024, %s57_s18, [#allocation9], %s5295_s23, %s5295_s23, %s5296_s24  }
  0x69   :  { %s5170_s22 = scalar_lea.hbm %s6224_s5, 1024 }
  0x6a   :  { %p5171_p6 = scmp.ne.s32.totalorder %s6224_s5, %s5170_s22  ;;  %p5174_p7 = scmp.lt.u32.totalorder %s5170_s22, %s6224_s5 }
  0x6c   :  { %p5176_p8 = pnand %p5174_p7, %p5171_p6 }
  0x6e   :  { %5179 = shalt.err (!%p5176_p8)
}
  0x6f   :  { %s5180_s19 = scalar_lea.vmem %s83_s15, 1024  ;;  %p5185_p10 = scmp.lt.s32.totalorder %s83_s15, %s83_s15 }
  0x70   :  { %p5181_p9 = scmp.ne.s32.totalorder %s83_s15, %s5180_s19  ;;  %p5186_p11 = scmp.lt.s32.totalorder %s5180_s19, %s5180_s19 }
  0x72   :  { %p5187_p12 = por %p5186_p11, %p5185_p10 }
  0x74   :  { %p5188_p13 = pnand %p5187_p12, %p5181_p9 }
  0x76   :  { %5191 = shalt.err (!%p5188_p13)
}
  0x77   :  { %88 = dma.hbm_to_vmem [thread:$0]  %s6224_s5, 1024, %s83_s15, [#allocation12], %s5295_s23, %s5295_s23, %s5296_s24  }
  0x78   :  { %s5305_s20 = smov [#allocation16]   ;;  %s5306_s28 = smov [#allocation19]  }
  0x79   :  { %s108_s4 = sshll.u32 %s5305_s20, 4  ;;  %s134_s21 = sshll.u32 %s5306_s28, 4  ;;  %s109_s4 = int_to_ptr.vmem [resolvable:$true] %s108_s4  ;;  %s135_s21 = int_to_ptr.vmem [resolvable:$true] %s134_s21 }
  0x7a   :  { %s5192_s0 = scalar_lea.hbm %s6227_s8, 1024 }
  0x7b   :  { %p5193_p0 = scmp.ne.s32.totalorder %s6227_s8, %s5192_s0  ;;  %p5196_p1 = scmp.lt.u32.totalorder %s5192_s0, %s6227_s8 }
  0x7d   :  { %p5198_p2 = pnand %p5196_p1, %p5193_p0 }
  0x7f   :  { %5201 = shalt.err (!%p5198_p2)
}
  0x80   :  { %s5202_s5 = scalar_lea.vmem %s109_s4, 1024  ;;  %p5207_p4 = scmp.lt.s32.totalorder %s109_s4, %s109_s4 }
  0x81   :  { %p5203_p3 = scmp.ne.s32.totalorder %s109_s4, %s5202_s5  ;;  %p5208_p5 = scmp.lt.s32.totalorder %s5202_s5, %s5202_s5 }
  0x83   :  { %p5209_p6 = por %p5208_p5, %p5207_p4 }
  0x85   :  { %p5210_p7 = pnand %p5209_p6, %p5203_p3 }
  0x87   :  { %5213 = shalt.err (!%p5210_p7)
}
  0x88   :  { %114 = dma.hbm_to_vmem [thread:$0]  %s6227_s8, 1024, %s109_s4, [#allocation15], %s5295_s23, %s5295_s23, %s5296_s24  }
  0x89   :  { %s5214_s17 = scalar_lea.hbm %s6230_s11, 1024 }
  0x8a   :  { %p5215_p8 = scmp.ne.s32.totalorder %s6230_s11, %s5214_s17  ;;  %p5218_p9 = scmp.lt.u32.totalorder %s5214_s17, %s6230_s11 }
  0x8c   :  { %p5220_p10 = pnand %p5218_p9, %p5215_p8 }
  0x8e   :  { %5223 = shalt.err (!%p5220_p10)
}
  0x8f   :  { %s5224_s20 = scalar_lea.vmem %s135_s21, 1024  ;;  %p5229_p12 = scmp.lt.s32.totalorder %s135_s21, %s135_s21 }
  0x90   :  { %p5225_p11 = scmp.ne.s32.totalorder %s135_s21, %s5224_s20  ;;  %p5230_p13 = scmp.lt.s32.totalorder %s5224_s20, %s5224_s20 }
  0x92   :  { %p5231_p0 = por %p5230_p13, %p5229_p12 }
  0x94   :  { %p5232_p1 = pnand %p5231_p0, %p5225_p11 }
  0x96   :  { %5235 = shalt.err (!%p5232_p1)
}
  0x97   :  { %140 = dma.hbm_to_vmem [thread:$0]  %s6230_s11, 1024, %s135_s21, [#allocation18], %s5295_s23, %s5295_s23, %s5296_s24  }
  0x98   :  { %5280 = dma.done.wait [#allocation6], 256  }
  0x99   :  { %5281 = vsyncadd [#allocation6], 4294967040 }
  0x9a   :  { %5282 = dma.done.wait [#allocation9], 1536  }
  0x9b   :  { %5283 = vsyncadd [#allocation9], 4294965760 }
  0x9c   :  { %5284 = dma.done.wait [#allocation12], 3072  }
  0x9d   :  { %5285 = vsyncadd [#allocation12], 4294964224 }
  0x9e   :  { %5286 = dma.done.wait [#allocation15], 1536  }
  0x9f   :  { %5287 = vsyncadd [#allocation15], 4294965760 }
  0xa0   :  { %5288 = dma.done.wait [#allocation18], 3072  }
  0xa1   :  { %5289 = vsyncadd [#allocation18], 4294964224  ;;  %v5307_v0 = vmov 0.0   ;;  %v173_v1 = vld [vmem:[#allocation8 + $0x8] sm:$0xff]  ;;  %v175_v2 = vld [vmem:[#allocation8 + $0x18] sm:$0xff]  ;;  %vm188_vm0 = vcmask 130048   ;;  %v178_v21 = vlaneseq }
  0xa2   :  { %259 = vmatprep.mubr.f32.mxu0 %v5307_v0  ;;  %352 = vmatprep.mubr.f32.mxu1 %v5307_v0  ;;  %v172_v3 = vld [vmem:[#allocation8] sm:$0xff]  ;;  %v4467_v4 = vpack.c.bf16 %v175_v2, %v173_v1  ;;  %v174_v5 = vld [vmem:[#allocation8 + $0x10] sm:$0xff]  ;;  %v277_v6 = vld [vmem:[#allocation10 + $0x8] sm:$0xff]  ;;  %vm366_vm1 = vcmask 1041408   ;;  %s5309_s24 = smov 32   ;;  %vm396_vm2 = vcmask 254976  }
  0xa3   :  { %v4469_v7 = vpack.c.bf16 %v174_v5, %v172_v3  ;;  %v279_v8 = vld [vmem:[#allocation10 + $0x18] sm:$0xff]  ;;  %v276_v9 = vld [vmem:[#allocation10] sm:$0xff]  ;;  %v278_v10 = vld [vmem:[#allocation10 + $0x10] sm:$0xff]  ;;  %v179_v22 = vshrl.u32 %v178_v21, 7  ;;  %vm284_vm3 = vcmask 261120   ;;  %vm401_vm4 = vcmask 519426  }
  0xa4   :  { %4468 = vmatprep.subr.bf16.mxu0 %v4467_v4  ;;  %v5522_v11 = vpack.c.bf16 %v279_v8, %v277_v6  ;;  %v5524_v12 = vpack.c.bf16 %v278_v10, %v276_v9  ;;  %v281_v13 = vld [vmem:[#allocation10 + $0x28] sm:$0xff]  ;;  %v283_v14 = vld [vmem:[#allocation10 + $0x38] sm:$0xff]  ;;  %v170_v15 = vld [vmem:[#allocation5] sm:$0xff]  ;;  %vm1243_vm5 = vcmask 523264   ;;  %vm2262_vm6 = vcmask 517120   ;;  %s5311_s0 = smov [#allocation20]  }
  0xa5   :  { %4470 = vmatpush1.bf16.msra.mxu0 %v4469_v7  ;;  %v5526_v16 = vpack.c.bf16 %v283_v14, %v281_v13  ;;  %v280_v17 = vld [vmem:[#allocation10 + $0x20] sm:$0xff]  ;;  %v282_v18 = vld [vmem:[#allocation10 + $0x30] sm:$0xff]  ;;  %v171_v20 = vld [vmem:[#allocation5 + $0x8] sm:$0xff]  ;;  %v5550_v23 = vsub.s32 0, %v179_v22  ;;  %v5555_v25 = vsub.s32 1, %v179_v22  ;;  %vm2267_vm7 = vcmask 779776  }
  0xa6   :  { %4472 = vmatprep.subr.bf16.mxu1 %v5522_v11  ;;  %4480 = vmatprep.subr.bf16.mxu0 %v5522_v11  ;;  %v5531_v19 = vpack.c.bf16 %v282_v18, %v280_v17  ;;  %v176_v24 = vld [vmem:[%s6222_s3] sm:$0x3]  ;;  %s5308_s3 = smov 64   ;;  %vm2269_vm8 = vcmask 1044226   ;;  %s4370_s30 = sshll.u32 %s5311_s0, 4  ;;  %s4371_s30 = int_to_ptr.vmem [resolvable:$true] %s4370_s30 }
  0xa7   :  { %4474 = vmatpush1.bf16.msra.mxu1 %v5524_v12  ;;  %v181_v26 = vrot.slane %v176_v24, %v5550_v23  ;;  %v185_v27 = vrot.slane %v176_v24, %v5555_v25  ;;  %s5236_s26 = scalar_lea.vmem %s4371_s30, 32  ;;  %p5241_p3 = scmp.lt.s32.totalorder %s4371_s30, %s4371_s30 }
  0xa8   :  { %4397 = vmatmul.mubr.msk.f32.vlgmr.msra.gmra.mrb[0].mxu0 %vm188_vm0, %v170_v15  ;;  %4476 = vmatprep.subr.bf16.mxu1 %v5526_v16  ;;  %p5237_p2 = scmp.ne.s32.totalorder %s4371_s30, %s5236_s26  ;;  %p5242_p4 = scmp.lt.s32.totalorder %s5236_s26, %s5236_s26 }
  0xa9   :  { %265 = vmatprep.mubr.f32.mxu0 %v5307_v0  ;;  %4482 = vmatpush1.bf16.msra.mxu0 %v5524_v12 }
  0xaa   :  { %4484 = vmatprep.subr.bf16.mxu0 %v5526_v16  ;;  %p5243_p5 = por %p5242_p4, %p5241_p3 }
  0xab   :  { %4478 = vmatpush1.bf16.msra.mxu1 %v5531_v19 }
  0xac   :  { %4398 = vmatmul.mubr.msk.f32.gmra.mrb[2].mxu0 %vm188_vm0, %v171_v20  ;;  %4488 = vmatprep.subr.bf16.mxu1 %v5522_v11  ;;  %p5244_p6 = pnand %p5243_p5, %p5237_p2 }
  0xad   :  { %4486 = vmatpush1.bf16.msra.mxu0 %v5531_v19  ;;  %469 = vmatprep.mubr.f32.mxu0 %v5307_v0 }
  0xae   :  { %353 = vmatmul.mubr.f32.vlgmr.msra.gmra.mrb[0].mxu1 %v5307_v0  ;;  %4496 = vmatprep.subr.bf16.mxu0 %v5522_v11 }
  0xaf   :  { %4490 = vmatpush1.bf16.msra.mxu1 %v5524_v12  ;;  %586 = vmatprep.mubr.f32.mxu1 %v5307_v0 }
  0xb0   :  { %4492 = vmatprep.subr.bf16.mxu1 %v5526_v16 }
  0xb3   :  { %4494 = vmatpush1.bf16.msra.mxu1 %v5531_v19 }
  0xb4   :  { %4504 = vmatprep.subr.bf16.mxu1 %v5522_v11 }
 0x17b   :  { %v261_v28 = vpop.f32.mrb[0].mxu0 }
 0x17c   :  { %v262_v29 = vadd.f32 %v261_v28, %v181_v26  ;;  %v263_v30 = vpop.f32.mrb[1].mxu0 }
 0x17d   :  { %v264_v31 = vadd.f32 %v263_v30, %v185_v27 }
 0x17e   :  { %272 = vst [vmem:[#allocation2] sm:$0xff] %v262_v29 }
 0x17f   :  { %273 = vst [vmem:[#allocation2 + $0x8] sm:$0xff] %v264_v31  ;;  %v267_v32 = vpop.f32.mrb[2].mxu0 }
 0x180   :  { %v268_v33 = vadd.f32 %v267_v32, %v181_v26  ;;  %v269_v34 = vpop.f32.mrb[3].mxu0 }
 0x181   :  { %v270_v35 = vadd.f32 %v269_v34, %v185_v27  ;;  %v354_v36 = vpop.f32.mrb[0].mxu1 }
 0x182   :  { %274 = vst [vmem:[#allocation2 + $0x10] sm:$0xff] %v268_v33  ;;  %v356_v37 = vpop.f32.mrb[1].mxu1 }
 0x183   :  { %275 = vst [vmem:[#allocation2 + $0x18] sm:$0xff] %v270_v35 }
 0x185   :  { %v359_v38 = vld [vmem:[#allocation2] sm:$0x3]  ;;  %v476_v58 = vld [vmem:[#allocation2] sm:$0xc]  ;;  %v593_v22 = vld [vmem:[#allocation2] sm:$0x30] }
 0x186   :  { %v360_v41 = vadd.f32 %v359_v38, %v354_v36  ;;  %v478_v60 = vrot.slane %v476_v58, 2  ;;  %v595_v24 = vrot.slane %v593_v22, 4 }
 0x18a   :  { %v361_v39 = vld [vmem:[#allocation2 + $0x18] sm:$0xc0]  ;;  %v481_v59 = vld [vmem:[#allocation2 + $0x18] sm:$0x30]  ;;  %v598_v29 = vld [vmem:[#allocation2 + $0x18] sm:$0xc] }
 0x18b   :  { %v363_v40 = vrot.slane %v361_v39, 4  ;;  %v483_v62 = vrot.slane %v481_v59, 2 }
 0x18d   :  { %v365_v42 = vadd.f32 %v363_v40, %v356_v37 }
 0x18f   :  { %v367_v43 = vsel %vm366_vm1, %v360_v41, %v365_v42 }
 0x190   :  { %4782 = vtanh.f32 %v367_v43  ;;  %v4399_v45 = vmul.f32 -1.442695, %v367_v43 }
 0x192   :  { %4784 = vpow2.f32 %v4399_v45 }
 0x19a   :  { %v4783_v44 = vpop.eup %4782 }
 0x19b   :  { %377 = vrot.lane.b32.xlu0 %v4783_v44, %s5308_s3 }
 0x19c   :  { %v4785_v46 = vpop.eup %4784 }
 0x19d   :  { %v371_v47 = vadd.f32 1.0, %v4785_v46  ;;  %v707_v46 = vld [vmem:[#allocation2] sm:$0xc0] }
 0x19f   :  { %4786 = vrcp.f32 %v371_v47  ;;  %v712_v47 = vld [vmem:[#allocation2 + $0x18] sm:$0x3] }
 0x1a9   :  { %v4787_v48 = vpop.eup %4786 }
 0x1aa   :  { %v375_v51 = vmul.f32 0.0, %v4787_v48 }
 0x20d   :  { %v378_v49 = vpop.permute.xlu0 %377 }
 0x20e   :  { %v380_v50 = vmul.f32 %v4787_v48, %v378_v49 }
 0x210   :  { %382 = vrot.lane.b32.xlu0 %v380_v50, %s5309_s24  ;;  %v714_v50 = vrot.slane %v712_v47, 6 }
 0x282   :  { %v383_v52 = vpop.permute.xlu0 %382 }
 0x283   :  { %v385_v53 = vadd.f32 %v383_v52, %v375_v51 }
 0x285   :  { %4788 = vtanh.f32 %v385_v53 }
 0x28f   :  { %v4789_v54 = vpop.eup %4788 }
 0x290   :  { %388 = vrot.lane.b32.xlu1 %v4789_v54, %s5308_s3 }
 0x302   :  { %v389_v55 = vpop.permute.xlu1 %388 }
 0x303   :  { %v5563_v56 = vmul.f32 %v4787_v48, %v389_v55  ;;  %v709_v48 = vrot.slane %v707_v46, 6 }
 0x305   :  { %393 = vrot.lane.b32.xlu1 %v5563_v56, %s5309_s24 }
 0x377   :  { %v394_v57 = vpop.permute.xlu1 %393 }
 0x378   :  { %397 = vst.msk [vmem:[#allocation3] sm:$0x3] %vm396_vm2, %v394_v57  ;;  %4400 = vmatmul.mubr.msk.f32.vlgmr.msra.gmra.mrb[4].mxu0 %vm284_vm3, %v394_v57 }
 0x379   :  { %4498 = vmatpush1.bf16.msra.mxu0 %v5524_v12  ;;  %700 = vmatprep.mubr.f32.mxu0 %v5307_v0 }
 0x37a   :  { %4500 = vmatprep.subr.bf16.mxu0 %v5526_v16 }
 0x37d   :  { %4502 = vmatpush1.bf16.msra.mxu0 %v5531_v19 }
 0x37e   :  { %4512 = vmatprep.subr.bf16.mxu0 %v5522_v11 }
 0x44b   :  { %v471_v61 = vpop.f32.mrb[4].mxu0 }
 0x44c   :  { %v480_v63 = vadd.f32 %v478_v60, %v471_v61  ;;  %v473_v1 = vpop.f32.mrb[5].mxu0 }
 0x44d   :  { %v485_v2 = vadd.f32 %v483_v62, %v473_v1 }
 0x44f   :  { %v486_v3 = vsel %vm366_vm1, %v480_v63, %v485_v2 }
 0x450   :  { %4790 = vtanh.f32 %v486_v3  ;;  %v4401_v5 = vmul.f32 -1.442695, %v486_v3 }
 0x452   :  { %4792 = vpow2.f32 %v4401_v5 }
 0x45a   :  { %v4791_v4 = vpop.eup %4790 }
 0x45b   :  { %496 = vrot.lane.b32.xlu0 %v4791_v4, %s5308_s3 }
 0x45c   :  { %v4793_v6 = vpop.eup %4792 }
 0x45d   :  { %v490_v7 = vadd.f32 1.0, %v4793_v6  ;;  %v826_v6 = vld [vmem:[#allocation2 + $0x8] sm:$0xc0] }
 0x45f   :  { %4794 = vrcp.f32 %v490_v7 }
 0x469   :  { %v4795_v8 = vpop.eup %4794 }
 0x46a   :  { %v494_v13 = vmul.f32 %v4795_v8, %v385_v53 }
 0x4cd   :  { %v497_v9 = vpop.permute.xlu0 %496 }
 0x4ce   :  { %v499_v10 = vmul.f32 %v4795_v8, %v497_v9  ;;  %v828_v9 = vrot.slane %v826_v6, 4 }
 0x4d0   :  { %501 = vrot.lane.b32.xlu1 %v499_v10, %s5309_s24 }
 0x542   :  { %v502_v14 = vpop.permute.xlu1 %501 }
 0x543   :  { %v504_v15 = vadd.f32 %v502_v14, %v494_v13 }
 0x545   :  { %4796 = vtanh.f32 %v504_v15 }
 0x54f   :  { %v4797_v17 = vpop.eup %4796 }
 0x550   :  { %507 = vrot.lane.b32.xlu0 %v4797_v17, %s5308_s3 }
 0x5c2   :  { %v508_v18 = vpop.permute.xlu0 %507 }
 0x5c3   :  { %v5578_v20 = vmul.f32 %v4795_v8, %v508_v18  ;;  %v824_v8 = vld [vmem:[#allocation2 + $0x10] sm:$0x3] }
 0x5c5   :  { %512 = vrot.lane.b32.xlu1 %v5578_v20, %s5309_s24 }
 0x637   :  { %v513_v21 = vpop.permute.xlu1 %512 }
 0x638   :  { %515 = vst.msk [vmem:[#allocation3 + $0x2] sm:$0x3] %vm396_vm2, %v513_v21  ;;  %4402 = vmatmul.mubr.msk.f32.vlgmr.msra.gmra.mrb[2].mxu1 %vm284_vm3, %v513_v21 }
 0x639   :  { %4506 = vmatpush1.bf16.msra.mxu1 %v5524_v12  ;;  %817 = vmatprep.mubr.f32.mxu1 %v5307_v0 }
 0x63a   :  { %4508 = vmatprep.subr.bf16.mxu1 %v5526_v16 }
 0x63d   :  { %4510 = vmatpush1.bf16.msra.mxu1 %v5531_v19 }
 0x63e   :  { %4520 = vmatprep.subr.bf16.mxu1 %v5522_v11 }
 0x70b   :  { %v588_v26 = vpop.f32.mrb[2].mxu1 }
 0x70c   :  { %v597_v27 = vadd.f32 %v595_v24, %v588_v26  ;;  %v590_v28 = vpop.f32.mrb[3].mxu1 }
 0x70d   :  { %v599_v30 = vadd.f32 %v598_v29, %v590_v28 }
 0x70f   :  { %v600_v31 = vsel %vm366_vm1, %v597_v27, %v599_v30 }
 0x710   :  { %4798 = vtanh.f32 %v600_v31  ;;  %v4403_v33 = vmul.f32 -1.442695, %v600_v31 }
 0x712   :  { %4800 = vpow2.f32 %v4403_v33 }
 0x71a   :  { %v4799_v32 = vpop.eup %4798 }
 0x71b   :  { %610 = vrot.lane.b32.xlu0 %v4799_v32, %s5308_s3 }
 0x71c   :  { %v4801_v34 = vpop.eup %4800 }
 0x71d   :  { %v604_v35 = vadd.f32 1.0, %v4801_v34 }
 0x71f   :  { %4802 = vrcp.f32 %v604_v35  ;;  %v938_v35 = vld [vmem:[#allocation2 + $0x10] sm:$0xc] }
 0x729   :  { %v4803_v36 = vpop.eup %4802 }
 0x72a   :  { %v608_v39 = vmul.f32 %v4803_v36, %v504_v15 }
 0x78d   :  { %v611_v37 = vpop.permute.xlu0 %610 }
 0x78e   :  { %v613_v38 = vmul.f32 %v4803_v36, %v611_v37  ;;  %v940_v37 = vrot.slane %v938_v35, 2 }
 0x790   :  { %615 = vrot.lane.b32.xlu1 %v613_v38, %s5309_s24 }
 0x802   :  { %v616_v40 = vpop.permute.xlu1 %615 }
 0x803   :  { %v618_v41 = vadd.f32 %v616_v40, %v608_v39 }
 0x805   :  { %4804 = vtanh.f32 %v618_v41 }
 0x80f   :  { %v4805_v42 = vpop.eup %4804 }
 0x810   :  { %621 = vrot.lane.b32.xlu0 %v4805_v42, %s5308_s3 }
 0x882   :  { %v622_v43 = vpop.permute.xlu0 %621 }
 0x883   :  { %v5593_v44 = vmul.f32 %v4803_v36, %v622_v43  ;;  %v943_v36 = vld [vmem:[#allocation2 + $0x8] sm:$0x30] }
 0x884   :  { %v945_v39 = vrot.slane %v943_v36, 2 }
 0x885   :  { %626 = vrot.lane.b32.xlu1 %v5593_v44, %s5309_s24 }
 0x8f7   :  { %v627_v45 = vpop.permute.xlu1 %626 }
 0x8f8   :  { %629 = vst.msk [vmem:[#allocation3 + $0x4] sm:$0x3] %vm396_vm2, %v627_v45  ;;  %4404 = vmatmul.mubr.msk.f32.vlgmr.msra.gmra.mrb[6].mxu0 %vm284_vm3, %v627_v45 }
 0x8f9   :  { %4514 = vmatpush1.bf16.msra.mxu0 %v5524_v12  ;;  %931 = vmatprep.mubr.f32.mxu0 %v5307_v0 }
 0x8fa   :  { %4516 = vmatprep.subr.bf16.mxu0 %v5526_v16 }
 0x8fd   :  { %4518 = vmatpush1.bf16.msra.mxu0 %v5531_v19 }
 0x8fe   :  { %4528 = vmatprep.subr.bf16.mxu0 %v5522_v11 }
 0x9cb   :  { %v702_v49 = vpop.f32.mrb[6].mxu0 }
 0x9cc   :  { %v711_v51 = vadd.f32 %v709_v48, %v702_v49  ;;  %v704_v52 = vpop.f32.mrb[7].mxu0 }
 0x9cd   :  { %v716_v53 = vadd.f32 %v714_v50, %v704_v52 }
 0x9cf   :  { %v717_v54 = vsel %vm366_vm1, %v711_v51, %v716_v53 }
 0x9d0   :  { %4806 = vtanh.f32 %v717_v54  ;;  %v4405_v57 = vmul.f32 -1.442695, %v717_v54 }
 0x9d2   :  { %4808 = vpow2.f32 %v4405_v57  ;;  %v1055_v57 = vld [vmem:[#allocation2 + $0x10] sm:$0x30] }
 0x9da   :  { %v4807_v55 = vpop.eup %4806 }
 0x9db   :  { %727 = vrot.lane.b32.xlu0 %v4807_v55, %s5308_s3 }
 0x9dc   :  { %v4809_v58 = vpop.eup %4808 }
 0x9dd   :  { %v721_v59 = vadd.f32 1.0, %v4809_v58  ;;  %v1057_v58 = vrot.slane %v1055_v57, 4 }
 0x9df   :  { %4810 = vrcp.f32 %v721_v59 }
 0x9e9   :  { %v4811_v11 = vpop.eup %4810 }
 0x9ea   :  { %v725_v62 = vmul.f32 %v4811_v11, %v618_v41 }
 0xa4d   :  { %v728_v60 = vpop.permute.xlu0 %727 }
 0xa4e   :  { %v730_v61 = vmul.f32 %v4811_v11, %v728_v60 }
 0xa50   :  { %732 = vrot.lane.b32.xlu1 %v730_v61, %s5309_s24  ;;  %v1060_v61 = vld [vmem:[#allocation2 + $0x8] sm:$0xc] }
 0xac2   :  { %v733_v63 = vpop.permute.xlu1 %732 }
 0xac3   :  { %v735_v1 = vadd.f32 %v733_v63, %v725_v62 }
 0xac5   :  { %4812 = vtanh.f32 %v735_v1 }
 0xacf   :  { %v4813_v2 = vpop.eup %4812 }
 0xad0   :  { %738 = vrot.lane.b32.xlu0 %v4813_v2, %s5308_s3 }
 0xb42   :  { %v739_v3 = vpop.permute.xlu0 %738 }
 0xb43   :  { %v5608_v4 = vmul.f32 %v4811_v11, %v739_v3 }
 0xb45   :  { %743 = vrot.lane.b32.xlu1 %v5608_v4, %s5309_s24 }
 0xbb7   :  { %v744_v5 = vpop.permute.xlu1 %743 }
 0xbb8   :  { %746 = vst.msk [vmem:[#allocation3 + $0x6] sm:$0x3] %vm396_vm2, %v744_v5  ;;  %4406 = vmatmul.mubr.msk.f32.vlgmr.msra.gmra.mrb[4].mxu1 %vm284_vm3, %v744_v5 }
 0xbb9   :  { %4522 = vmatpush1.bf16.msra.mxu1 %v5524_v12  ;;  %1048 = vmatprep.mubr.f32.mxu1 %v5307_v0 }
 0xbba   :  { %4524 = vmatprep.subr.bf16.mxu1 %v5526_v16 }
 0xbbd   :  { %4526 = vmatpush1.bf16.msra.mxu1 %v5531_v19 }
 0xc8b   :  { %v819_v7 = vpop.f32.mrb[4].mxu1 }
 0xc8c   :  { %v825_v10 = vadd.f32 %v824_v8, %v819_v7  ;;  %v821_v13 = vpop.f32.mrb[5].mxu1 }
 0xc8d   :  { %v830_v14 = vadd.f32 %v828_v9, %v821_v13 }
 0xc8f   :  { %v831_v15 = vsel %vm366_vm1, %v825_v10, %v830_v14 }
 0xc90   :  { %4814 = vtanh.f32 %v831_v15  ;;  %v4407_v18 = vmul.f32 -1.442695, %v831_v15 }
 0xc92   :  { %4816 = vpow2.f32 %v4407_v18 }
 0xc9a   :  { %v4815_v17 = vpop.eup %4814 }
 0xc9b   :  { %841 = vrot.lane.b32.xlu0 %v4815_v17, %s5308_s3 }
 0xc9c   :  { %v4817_v21 = vpop.eup %4816 }
 0xc9d   :  { %v835_v22 = vadd.f32 1.0, %v4817_v21  ;;  %v1169_v21 = vld [vmem:[#allocation2 + $0x10] sm:$0xc0] }
 0xc9f   :  { %4818 = vrcp.f32 %v835_v22  ;;  %v1174_v22 = vld [vmem:[#allocation2 + $0x8] sm:$0x3] }
 0xca9   :  { %v4819_v24 = vpop.eup %4818 }
 0xcaa   :  { %v839_v28 = vmul.f32 %v4819_v24, %v735_v1 }
 0xd0d   :  { %v842_v26 = vpop.permute.xlu0 %841 }
 0xd0e   :  { %v844_v27 = vmul.f32 %v4819_v24, %v842_v26 }
 0xd10   :  { %846 = vrot.lane.b32.xlu1 %v844_v27, %s5309_s24  ;;  %v1176_v27 = vrot.slane %v1174_v22, 6 }
 0xd82   :  { %v847_v29 = vpop.permute.xlu1 %846 }
 0xd83   :  { %v849_v30 = vadd.f32 %v847_v29, %v839_v28 }
 0xd85   :  { %4820 = vtanh.f32 %v849_v30 }
 0xd8f   :  { %v4821_v31 = vpop.eup %4820 }
 0xd90   :  { %852 = vrot.lane.b32.xlu0 %v4821_v31, %s5308_s3 }
 0xe02   :  { %v853_v32 = vpop.permute.xlu0 %852 }
 0xe03   :  { %v5622_v33 = vmul.f32 %v4819_v24, %v853_v32  ;;  %v1171_v24 = vrot.slane %v1169_v21, 6  ;;  %v1335_v21 = vld [vmem:[#allocation13 + $0x20] sm:$0xff] }
 0xe05   :  { %857 = vrot.lane.b32.xlu1 %v5622_v33, %s5309_s24 }
 0xe77   :  { %v5626_v34 = vpop.permute.xlu1 %857 }
 0xe78   :  { %4408 = vmatmul.mubr.msk.f32.vlgmr.msra.gmra.mrb[8].mxu0 %vm284_vm3, %v5626_v34 }
 0xe79   :  { %4530 = vmatpush1.bf16.msra.mxu0 %v5524_v12  ;;  %1162 = vmatprep.mubr.f32.mxu0 %v5307_v0 }
 0xe7a   :  { %4532 = vmatprep.subr.bf16.mxu0 %v5526_v16 }
 0xe7d   :  { %4534 = vmatpush1.bf16.msra.mxu0 %v5531_v19 }
 0xf4b   :  { %v933_v38 = vpop.f32.mrb[8].mxu0 }
 0xf4c   :  { %v942_v40 = vadd.f32 %v940_v37, %v933_v38  ;;  %v935_v41 = vpop.f32.mrb[9].mxu0 }
 0xf4d   :  { %v947_v42 = vadd.f32 %v945_v39, %v935_v41 }
 0xf4f   :  { %v948_v43 = vsel %vm366_vm1, %v942_v40, %v947_v42 }
 0xf50   :  { %4822 = vtanh.f32 %v948_v43  ;;  %v4409_v12 = vmul.f32 -1.442695, %v948_v43 }
 0xf52   :  { %4824 = vpow2.f32 %v4409_v12  ;;  %v1216_v12 = vld [vmem:[#allocation11 + $0x8] sm:$0xff] }
 0xf5a   :  { %v4823_v45 = vpop.eup %4822 }
 0xf5b   :  { %958 = vrot.lane.b32.xlu0 %v4823_v45, %s5308_s3 }
 0xf5c   :  { %v4825_v46 = vpop.eup %4824 }
 0xf5d   :  { %v952_v16 = vadd.f32 1.0, %v4825_v46  ;;  %v1218_v46 = vld [vmem:[#allocation11 + $0x18] sm:$0xff] }
 0xf5f   :  { %4826 = vrcp.f32 %v952_v16  ;;  %v4535_v16 = vpack.c.bf16 %v1218_v46, %v1216_v12 }
 0xf61   :  { %4536 = vmatprep.subr.bf16.mxu1 %v4535_v16 }
 0xf69   :  { %v4827_v19 = vpop.eup %4826 }
 0xf6a   :  { %v956_v49 = vmul.f32 %v4827_v19, %v849_v30 }
 0xfcd   :  { %v959_v47 = vpop.permute.xlu0 %958 }
 0xfce   :  { %v961_v48 = vmul.f32 %v4827_v19, %v959_v47  ;;  %v1222_v47 = vld [vmem:[#allocation11 + $0x38] sm:$0xff] }
 0xfd0   :  { %963 = vrot.lane.b32.xlu1 %v961_v48, %s5309_s24 }
0x1042   :  { %v964_v50 = vpop.permute.xlu1 %963 }
0x1043   :  { %v966_v51 = vadd.f32 %v964_v50, %v956_v49 }
0x1045   :  { %4828 = vtanh.f32 %v966_v51 }
0x104f   :  { %v4829_v52 = vpop.eup %4828 }
0x1050   :  { %969 = vrot.lane.b32.xlu0 %v4829_v52, %s5308_s3  ;;  %v1221_v52 = vld [vmem:[#allocation11 + $0x30] sm:$0xff] }
0x10c2   :  { %v970_v53 = vpop.permute.xlu0 %969 }
0x10c3   :  { %v5638_v54 = vmul.f32 %v4827_v19, %v970_v53  ;;  %v1217_v19 = vld [vmem:[#allocation11 + $0x10] sm:$0xff] }
0x10c5   :  { %974 = vrot.lane.b32.xlu1 %v5638_v54, %s5309_s24 }
0x1137   :  { %v5642_v55 = vpop.permute.xlu1 %974 }
0x1138   :  { %4410 = vmatmul.mubr.msk.f32.vlgmr.msra.gmra.mrb[6].mxu1 %vm284_vm3, %v5642_v55 }
0x1139   :  { %1314 = vmatprep.mubr.f32.mxu1 %v5307_v0 }
0x120b   :  { %v1050_v59 = vpop.f32.mrb[6].mxu1 }
0x120c   :  { %v1059_v11 = vadd.f32 %v1057_v58, %v1050_v59  ;;  %v1052_v60 = vpop.f32.mrb[7].mxu1  ;;  %v1224_v59 = vld [vmem:[#allocation11 + $0x48] sm:$0xff] }
0x120d   :  { %v1061_v62 = vadd.f32 %v1060_v61, %v1052_v60  ;;  %v1223_v60 = vld [vmem:[#allocation11 + $0x40] sm:$0xff] }
0x120f   :  { %v1062_v63 = vsel %vm366_vm1, %v1059_v11, %v1061_v62  ;;  %v1226_v11 = vld [vmem:[#allocation11 + $0x58] sm:$0xff]  ;;  %v1225_v62 = vld [vmem:[#allocation11 + $0x50] sm:$0xff] }
0x1210   :  { %4830 = vtanh.f32 %v1062_v63  ;;  %v4411_v2 = vmul.f32 -1.442695, %v1062_v63  ;;  %v4543_v61 = vpack.c.bf16 %v1226_v11, %v1224_v59  ;;  %v4545_v63 = vpack.c.bf16 %v1225_v62, %v1223_v60 }
0x1212   :  { %4832 = vpow2.f32 %v4411_v2  ;;  %v1230_v2 = vld [vmem:[#allocation11 + $0x78] sm:$0xff] }
0x121a   :  { %v4831_v1 = vpop.eup %4830 }
0x121b   :  { %1072 = vrot.lane.b32.xlu0 %v4831_v1, %s5308_s3  ;;  %v1228_v1 = vld [vmem:[#allocation11 + $0x68] sm:$0xff] }
0x121c   :  { %v4833_v3 = vpop.eup %4832 }
0x121d   :  { %v1066_v5 = vadd.f32 1.0, %v4833_v3  ;;  %v1227_v3 = vld [vmem:[#allocation11 + $0x60] sm:$0xff] }
0x121f   :  { %4834 = vrcp.f32 %v1066_v5  ;;  %v4547_v5 = vpack.c.bf16 %v1230_v2, %v1228_v1 }
0x1229   :  { %v4835_v6 = vpop.eup %4834 }
0x122a   :  { %v1070_v9 = vmul.f32 %v4835_v6, %v966_v51  ;;  %v1219_v51 = vld [vmem:[#allocation11 + $0x20] sm:$0xff] }
0x122b   :  { %v4541_v57 = vpack.c.bf16 %v1221_v52, %v1219_v51 }
0x128d   :  { %v1073_v7 = vpop.permute.xlu0 %1072 }
0x128e   :  { %v1075_v8 = vmul.f32 %v4835_v6, %v1073_v7  ;;  %v1334_v7 = vld [vmem:[#allocation13 + $0x18] sm:$0xff] }
0x1290   :  { %1077 = vrot.lane.b32.xlu1 %v1075_v8, %s5309_s24  ;;  %v1331_v8 = vld [vmem:[#allocation13] sm:$0xff] }
0x1302   :  { %v1078_v10 = vpop.permute.xlu1 %1077 }
0x1303   :  { %v1080_v13 = vadd.f32 %v1078_v10, %v1070_v9  ;;  %v1333_v9 = vld [vmem:[#allocation13 + $0x10] sm:$0xff] }
0x1305   :  { %4836 = vtanh.f32 %v1080_v13 }
0x130f   :  { %v4837_v14 = vpop.eup %4836 }
0x1310   :  { %1083 = vrot.lane.b32.xlu0 %v4837_v14, %s5308_s3 }
0x1382   :  { %v1084_v15 = vpop.permute.xlu0 %1083 }
0x1383   :  { %v1086_v17 = vmul.f32 %v4835_v6, %v1084_v15  ;;  %v1336_v15 = vld [vmem:[#allocation13 + $0x28] sm:$0xff] }
0x1385   :  { %1088 = vrot.lane.b32.xlu1 %v1086_v17, %s5309_s24 }
0x13f7   :  { %v5652_v18 = vpop.permute.xlu1 %1088 }
0x13f8   :  { %4412 = vmatmul.mubr.msk.f32.vlgmr.msra.gmra.mrb[10].mxu0 %vm284_vm3, %v5652_v18 }
0x13f9   :  { %1403 = vmatprep.mubr.f32.mxu0 %v5307_v0 }
0x14cb   :  { %v1164_v26 = vpop.f32.mrb[10].mxu0 }
0x14cc   :  { %v1173_v28 = vadd.f32 %v1171_v24, %v1164_v26  ;;  %v1166_v29 = vpop.f32.mrb[11].mxu0  ;;  %v1337_v26 = vld [vmem:[#allocation13 + $0x30] sm:$0xff] }
0x14cd   :  { %v1178_v30 = vadd.f32 %v1176_v27, %v1166_v29  ;;  %v5702_v27 = vpack.c.bf16 %v1337_v26, %v1335_v21 }
0x14cf   :  { %v1179_v31 = vsel %vm366_vm1, %v1173_v28, %v1178_v30 }
0x14d0   :  { %4838 = vtanh.f32 %v1179_v31  ;;  %v4413_v35 = vmul.f32 -1.442695, %v1179_v31 }
0x14d2   :  { %4840 = vpow2.f32 %v4413_v35  ;;  %v1231_v35 = vld [vmem:[%s6225_s6] sm:$0x3] }
0x14da   :  { %v4839_v32 = vpop.eup %4838 }
0x14db   :  { %1189 = vrot.lane.b32.xlu0 %v4839_v32, %s5308_s3 }
0x14dc   :  { %v4841_v36 = vpop.eup %4840 }
0x14dd   :  { %v1183_v37 = vadd.f32 1.0, %v4841_v36  ;;  %v1236_v36 = vrot.slane %v1231_v35, %v5550_v23 }
0x14df   :  { %4842 = vrcp.f32 %v1183_v37  ;;  %v1240_v37 = vrot.slane %v1231_v35, %v5555_v25 }
0x14e9   :  { %v5659_v38 = vpop.eup %4842 }
0x14ea   :  { %v1187_v41 = vmul.f32 %v5659_v38, %v1080_v13  ;;  %v5687_v13 = vpack.c.bf16 %v1333_v9, %v1331_v8 }
0x154d   :  { %v1190_v39 = vpop.permute.xlu0 %1189 }
0x154e   :  { %v1192_v40 = vmul.f32 %v5659_v38, %v1190_v39 }
0x1550   :  { %1194 = vrot.lane.b32.xlu1 %v1192_v40, %s5309_s24 }
0x1554   :  { %861 = vrot.lane.b32.xlu1 %v5622_v33, %s5308_s3 }
0x1558   :  { %1092 = vrot.lane.b32.xlu1 %v1086_v17, %s5308_s3  ;;  %v1338_v17 = vld [vmem:[#allocation13 + $0x38] sm:$0xff] }
0x1559   :  { %v5699_v24 = vpack.c.bf16 %v1338_v17, %v1336_v15 }
0x155c   :  { %398 = vrot.lane.b32.xlu1 %v5563_v56, %s5308_s3  ;;  %v1215_v56 = vld [vmem:[#allocation11] sm:$0xff] }
0x155d   :  { %v4537_v49 = vpack.c.bf16 %v1217_v19, %v1215_v56 }
0x155f   :  { %4538 = vmatpush1.bf16.msra.mxu1 %v4537_v49 }
0x1560   :  { %630 = vrot.lane.b32.xlu1 %v5593_v44, %s5308_s3  ;;  %v1220_v44 = vld [vmem:[#allocation11 + $0x28] sm:$0xff] }
0x1561   :  { %v4539_v50 = vpack.c.bf16 %v1222_v47, %v1220_v44 }
0x1563   :  { %4540 = vmatprep.subr.bf16.mxu1 %v4539_v50 }
0x1564   :  { %4542 = vmatpush1.bf16.msra.mxu1 %v4541_v57 }
0x1565   :  { %4544 = vmatprep.subr.bf16.mxu1 %v4543_v61 }
0x1568   :  { %4546 = vmatpush1.bf16.msra.mxu1 %v4545_v63 }
0x1569   :  { %4548 = vmatprep.subr.bf16.mxu1 %v4547_v5 }
0x15c2   :  { %v1195_v42 = vpop.permute.xlu1 %1194 }
0x15c3   :  { %v5671_v43 = vadd.f32 %v1195_v42, %v1187_v41 }
0x15c5   :  { %4844 = vtanh.f32 %v5671_v43 }
0x15c6   :  { %v862_v45 = vpop.permute.xlu1 %861 }
0x15c7   :  { %864 = vst.msk [vmem:[#allocation3 + $0x4] sm:$0xc] %vm401_vm4, %v862_v45 }
0x15ca   :  { %v1093_v33 = vpop.permute.xlu1 %1092 }
0x15cb   :  { %1095 = vst.msk [vmem:[#allocation3] sm:$0xc] %vm401_vm4, %v1093_v33 }
0x15ce   :  { %v399_v48 = vpop.permute.xlu1 %398 }
0x15cf   :  { %v4845_v53 = vpop.eup %4844  ;;  %402 = vst.msk [vmem:[#allocation3 + $0xc] sm:$0xc] %vm401_vm4, %v399_v48 }
0x15d0   :  { %1200 = vrot.lane.b32.xlu0 %v4845_v53, %s5308_s3 }
0x15d2   :  { %v631_v58 = vpop.permute.xlu1 %630 }
0x15d3   :  { %633 = vst.msk [vmem:[#allocation3 + $0x8] sm:$0xc] %vm401_vm4, %v631_v58 }
0x15d4   :  { %977 = vst.msk [vmem:[#allocation3 + $0xa] sm:$0x3] %vm396_vm2, %v5642_v55  ;;  %978 = vrot.lane.b32.xlu0 %v5638_v54, %s5308_s3  ;;  %v1229_v55 = vld [vmem:[#allocation11 + $0x70] sm:$0xff]  ;;  %v1332_v54 = vld [vmem:[#allocation13 + $0x8] sm:$0xff] }
0x15d5   :  { %v4549_v6 = vpack.c.bf16 %v1229_v55, %v1227_v3 }
0x15d7   :  { %4550 = vmatpush1.bf16.msra.mxu1 %v4549_v6 }
0x15d8   :  { %516 = vrot.lane.b32.xlu0 %v5578_v20, %s5308_s3  ;;  %v5685_v20 = vpack.c.bf16 %v1334_v7, %v1332_v54 }
0x15da   :  { %4552 = vmatprep.subr.bf16.mxu0 %v5685_v20  ;;  %4568 = vmatprep.subr.bf16.mxu1 %v5685_v20 }
0x15db   :  { %4554 = vmatpush1.bf16.msra.mxu0 %v5687_v13 }
0x15dc   :  { %4556 = vmatprep.subr.bf16.mxu0 %v5699_v24 }
0x15df   :  { %4558 = vmatpush1.bf16.msra.mxu0 %v5702_v27 }
0x15e0   :  { %4560 = vmatprep.subr.bf16.mxu0 %v5685_v20 }
0x15e2   :  { %1404 = vmatmul.mubr.f32.vlgmr.msra.gmra.mrb[12].mxu0 %v5307_v0 }
0x15e3   :  { %4562 = vmatpush1.bf16.msra.mxu0 %v5687_v13  ;;  %1517 = vmatprep.mubr.f32.mxu0 %v5307_v0 }
0x15e4   :  { %4564 = vmatprep.subr.bf16.mxu0 %v5699_v24 }
0x15e7   :  { %4566 = vmatpush1.bf16.msra.mxu0 %v5702_v27 }
0x15e8   :  { %4576 = vmatprep.subr.bf16.mxu0 %v5685_v20 }
0x1642   :  { %v1201_v10 = vpop.permute.xlu0 %1200 }
0x1643   :  { %v5690_v14 = vmul.f32 %v5659_v38, %v1201_v10 }
0x1645   :  { %1205 = vrot.lane.b32.xlu1 %v5690_v14, %s5309_s24  ;;  %1209 = vrot.lane.b32.xlu0 %v5690_v14, %s5308_s3 }
0x1646   :  { %v979_v22 = vpop.permute.xlu0 %978 }
0x1647   :  { %981 = vst.msk [vmem:[#allocation3 + $0x2] sm:$0xc] %vm401_vm4, %v979_v22 }
0x1649   :  { %747 = vrot.lane.b32.xlu0 %v5608_v4, %s5308_s3 }
0x164a   :  { %v517_v28 = vpop.permute.xlu0 %516 }
0x164b   :  { %519 = vst.msk [vmem:[#allocation3 + $0xa] sm:$0xc] %vm401_vm4, %v517_v28 }
0x164c   :  { %1091 = vst.msk [vmem:[#allocation3 + $0xc] sm:$0x3] %vm396_vm2, %v5652_v18 }
0x16b7   :  { %v5718_v4 = vpop.permute.xlu1 %1205  ;;  %v1210_v29 = vpop.permute.xlu0 %1209 }
0x16b8   :  { %1208 = vst.msk [vmem:[#allocation3 + $0xe] sm:$0x3] %vm396_vm2, %v5718_v4 }
0x16b9   :  { %1212 = vst.msk [vmem:[#allocation3 - $0x2] sm:$0xc] %vm401_vm4, %v1210_v29 }
0x16bb   :  { %v748_v18 = vpop.permute.xlu0 %747 }
0x16bc   :  { %750 = vst.msk [vmem:[#allocation3 + $0x6] sm:$0xc] %vm401_vm4, %v748_v18 }
0x16bd   :  { %860 = vst.msk [vmem:[#allocation3 + $0x8] sm:$0x3] %vm396_vm2, %v5626_v34  ;;  %v1405_v34 = vpop.f32.mrb[12].mxu0 }
0x16be   :  { %v1407_v32 = vpop.f32.mrb[13].mxu0 }
0x16c0   :  { %v1213_v30 = vld [vmem:[#allocation3] sm:$0xff] }
0x16c1   :  { %4414 = vmatmul.mubr.msk.f32.vlgmr.msra.gmra.mrb[8].mxu1 %vm1243_vm5, %v1213_v30 }
0x16c2   :  { %1320 = vmatprep.mubr.f32.mxu1 %v5307_v0  ;;  %4570 = vmatpush1.bf16.msra.mxu1 %v5687_v13 }
0x16c3   :  { %4572 = vmatprep.subr.bf16.mxu1 %v5699_v24 }
0x16c4   :  { %v1214_v31 = vld [vmem:[#allocation3 + $0x8] sm:$0xff] }
0x16c5   :  { %4415 = vmatmul.mubr.msk.f32.gmra.mrb[10].mxu1 %vm1243_vm5, %v1214_v31 }
0x16c6   :  { %4574 = vmatpush1.bf16.msra.mxu1 %v5702_v27  ;;  %1634 = vmatprep.mubr.f32.mxu1 %v5307_v0 }
0x16c7   :  { %4584 = vmatprep.subr.bf16.mxu1 %v5685_v20 }
0x1794   :  { %v1316_v38 = vpop.f32.mrb[8].mxu1 }
0x1795   :  { %v1317_v39 = vadd.f32 %v1316_v38, %v1236_v36  ;;  %v1318_v40 = vpop.f32.mrb[9].mxu1 }
0x1796   :  { %v1319_v41 = vadd.f32 %v1318_v40, %v1240_v37 }
0x1797   :  { %1327 = vst [vmem:[#allocation2] sm:$0xff] %v1317_v39 }
0x1798   :  { %1328 = vst [vmem:[#allocation2 + $0x8] sm:$0xff] %v1319_v41  ;;  %v1322_v42 = vpop.f32.mrb[10].mxu1 }
0x1799   :  { %v1323_v45 = vadd.f32 %v1322_v42, %v1236_v36  ;;  %v1324_v33 = vpop.f32.mrb[11].mxu1 }
0x179a   :  { %v1325_v12 = vadd.f32 %v1324_v33, %v1240_v37 }
0x179b   :  { %1329 = vst [vmem:[#allocation2 + $0x10] sm:$0xff] %v1323_v45 }
0x179c   :  { %1330 = vst [vmem:[#allocation2 + $0x18] sm:$0xff] %v1325_v12 }
0x179e   :  { %v1410_v46 = vld [vmem:[#allocation2] sm:$0x3]  ;;  %v1524_v1 = vld [vmem:[#allocation2] sm:$0xc]  ;;  %v1641_v35 = vld [vmem:[#allocation2] sm:$0x30] }
0x179f   :  { %v1411_v19 = vadd.f32 %v1410_v46, %v1405_v34  ;;  %v1526_v3 = vrot.slane %v1524_v1, 2  ;;  %v1643_v36 = vrot.slane %v1641_v35, 4 }
0x17a3   :  { %v1412_v56 = vld [vmem:[#allocation2 + $0x18] sm:$0xc0]  ;;  %v1529_v2 = vld [vmem:[#allocation2 + $0x18] sm:$0x30]  ;;  %v1646_v40 = vld [vmem:[#allocation2 + $0x18] sm:$0xc] }
0x17a4   :  { %v1414_v16 = vrot.slane %v1412_v56, 4  ;;  %v1531_v55 = vrot.slane %v1529_v2, 2 }
0x17a6   :  { %v1416_v44 = vadd.f32 %v1414_v16, %v1407_v32 }
0x17a8   :  { %v1417_v47 = vsel %vm366_vm1, %v1411_v19, %v1416_v44 }
0x17a9   :  { %4846 = vtanh.f32 %v1417_v47  ;;  %v4416_v49 = vmul.f32 -1.442695, %v1417_v47 }
0x17ab   :  { %4848 = vpow2.f32 %v4416_v49 }
0x17b3   :  { %v4847_v48 = vpop.eup %4846 }
0x17b4   :  { %1427 = vrot.lane.b32.xlu0 %v4847_v48, %s5308_s3 }
0x17b5   :  { %v4849_v50 = vpop.eup %4848 }
0x17b6   :  { %v1421_v51 = vadd.f32 1.0, %v4849_v50 }
0x17b8   :  { %4850 = vrcp.f32 %v1421_v51 }
0x17c2   :  { %v4851_v52 = vpop.eup %4850 }
0x17c3   :  { %v1425_v58 = vmul.f32 0.0, %v4851_v52 }
0x1826   :  { %v1428_v53 = vpop.permute.xlu0 %1427 }
0x1827   :  { %v1430_v57 = vmul.f32 %v4851_v52, %v1428_v53  ;;  %v1755_v53 = vld [vmem:[#allocation2] sm:$0xc0] }
0x1829   :  { %1432 = vrot.lane.b32.xlu1 %v1430_v57, %s5309_s24  ;;  %v1760_v57 = vld [vmem:[#allocation2 + $0x18] sm:$0x3] }
0x189b   :  { %v1433_v59 = vpop.permute.xlu1 %1432 }
0x189c   :  { %v1435_v11 = vadd.f32 %v1433_v59, %v1425_v58  ;;  %v1757_v58 = vrot.slane %v1755_v53, 6 }
0x189e   :  { %4852 = vtanh.f32 %v1435_v11 }
0x18a8   :  { %v4853_v60 = vpop.eup %4852 }
0x18a9   :  { %1438 = vrot.lane.b32.xlu0 %v4853_v60, %s5308_s3 }
0x191b   :  { %v1439_v61 = vpop.permute.xlu0 %1438 }
0x191c   :  { %v5743_v62 = vmul.f32 %v4851_v52, %v1439_v61 }
0x191e   :  { %1443 = vrot.lane.b32.xlu1 %v5743_v62, %s5309_s24 }
0x1990   :  { %v1444_v63 = vpop.permute.xlu1 %1443 }
0x1991   :  { %4417 = vmatmul.mubr.msk.f32.vlgmr.msra.gmra.mrb[14].mxu0 %vm284_vm3, %v1444_v63 }
0x1992   :  { %4578 = vmatpush1.bf16.msra.mxu0 %v5687_v13  ;;  %1748 = vmatprep.mubr.f32.mxu0 %v5307_v0 }
0x1993   :  { %4580 = vmatprep.subr.bf16.mxu0 %v5699_v24 }
0x1996   :  { %4582 = vmatpush1.bf16.msra.mxu0 %v5702_v27 }
0x1997   :  { %4592 = vmatprep.subr.bf16.mxu0 %v5685_v20 }
0x1a64   :  { %v1519_v5 = vpop.f32.mrb[14].mxu0 }
0x1a65   :  { %v1528_v6 = vadd.f32 %v1526_v3, %v1519_v5  ;;  %v1521_v54 = vpop.f32.mrb[15].mxu0 }
0x1a66   :  { %v1533_v7 = vadd.f32 %v1531_v55, %v1521_v54 }
0x1a68   :  { %v1534_v8 = vsel %vm366_vm1, %v1528_v6, %v1533_v7 }
0x1a69   :  { %4854 = vtanh.f32 %v1534_v8  ;;  %v4418_v10 = vmul.f32 -1.442695, %v1534_v8 }
0x1a6b   :  { %4856 = vpow2.f32 %v4418_v10 }
0x1a73   :  { %v4855_v9 = vpop.eup %4854 }
0x1a74   :  { %1544 = vrot.lane.b32.xlu0 %v4855_v9, %s5308_s3 }
0x1a75   :  { %v4857_v15 = vpop.eup %4856 }
0x1a76   :  { %v1538_v17 = vadd.f32 1.0, %v4857_v15 }
0x1a78   :  { %4858 = vrcp.f32 %v1538_v17 }
0x1a82   :  { %v4859_v21 = vpop.eup %4858 }
0x1a83   :  { %v1542_v28 = vmul.f32 %v4859_v21, %v1435_v11  ;;  %v1762_v11 = vrot.slane %v1760_v57, 6 }
0x1ae6   :  { %v1545_v22 = vpop.permute.xlu0 %1544 }
0x1ae7   :  { %v1547_v26 = vmul.f32 %v4859_v21, %v1545_v22  ;;  %v1874_v22 = vld [vmem:[#allocation2 + $0x8] sm:$0xc0] }
0x1ae9   :  { %1549 = vrot.lane.b32.xlu1 %v1547_v26, %s5309_s24 }
0x1b5b   :  { %v1550_v29 = vpop.permute.xlu1 %1549 }
0x1b5c   :  { %v1552_v18 = vadd.f32 %v1550_v29, %v1542_v28  ;;  %v1872_v28 = vld [vmem:[#allocation2 + $0x10] sm:$0x3]  ;;  %v1876_v29 = vrot.slane %v1874_v22, 4 }
0x1b5e   :  { %4860 = vtanh.f32 %v1552_v18 }
0x1b68   :  { %v4861_v30 = vpop.eup %4860 }
0x1b69   :  { %1555 = vrot.lane.b32.xlu0 %v4861_v30, %s5308_s3 }
0x1bdb   :  { %v1556_v31 = vpop.permute.xlu0 %1555 }
0x1bdc   :  { %v5757_v34 = vmul.f32 %v4859_v21, %v1556_v31 }
0x1bde   :  { %1560 = vrot.lane.b32.xlu1 %v5757_v34, %s5309_s24 }
0x1c50   :  { %v1561_v32 = vpop.permute.xlu1 %1560 }
0x1c51   :  { %4419 = vmatmul.mubr.msk.f32.vlgmr.msra.gmra.mrb[12].mxu1 %vm284_vm3, %v1561_v32 }
0x1c52   :  { %4586 = vmatpush1.bf16.msra.mxu1 %v5687_v13  ;;  %1865 = vmatprep.mubr.f32.mxu1 %v5307_v0 }
0x1c53   :  { %4588 = vmatprep.subr.bf16.mxu1 %v5699_v24 }
0x1c56   :  { %4590 = vmatpush1.bf16.msra.mxu1 %v5702_v27 }
0x1c57   :  { %4600 = vmatprep.subr.bf16.mxu1 %v5685_v20 }
0x1d24   :  { %v1636_v37 = vpop.f32.mrb[12].mxu1 }
0x1d25   :  { %v1645_v38 = vadd.f32 %v1643_v36, %v1636_v37  ;;  %v1638_v39 = vpop.f32.mrb[13].mxu1 }
0x1d26   :  { %v1647_v41 = vadd.f32 %v1646_v40, %v1638_v39 }
0x1d28   :  { %v1648_v42 = vsel %vm366_vm1, %v1645_v38, %v1647_v41 }
0x1d29   :  { %4862 = vtanh.f32 %v1648_v42  ;;  %v4420_v33 = vmul.f32 -1.442695, %v1648_v42 }
0x1d2b   :  { %4864 = vpow2.f32 %v4420_v33 }
0x1d33   :  { %v4863_v45 = vpop.eup %4862 }
0x1d34   :  { %1658 = vrot.lane.b32.xlu0 %v4863_v45, %s5308_s3 }
0x1d35   :  { %v4865_v12 = vpop.eup %4864 }
0x1d36   :  { %v1652_v46 = vadd.f32 1.0, %v4865_v12 }
0x1d38   :  { %4866 = vrcp.f32 %v1652_v46 }
0x1d42   :  { %v4867_v56 = vpop.eup %4866 }
0x1d43   :  { %v1656_v44 = vmul.f32 %v4867_v56, %v1552_v18 }
0x1da6   :  { %v1659_v16 = vpop.permute.xlu0 %1658 }
0x1da7   :  { %v1661_v19 = vmul.f32 %v4867_v56, %v1659_v16 }
0x1da9   :  { %1663 = vrot.lane.b32.xlu1 %v1661_v19, %s5309_s24  ;;  %v1986_v19 = vld [vmem:[#allocation2 + $0x10] sm:$0xc] }
0x1e1b   :  { %v1664_v47 = vpop.permute.xlu1 %1663 }
0x1e1c   :  { %v1666_v48 = vadd.f32 %v1664_v47, %v1656_v44  ;;  %v1991_v44 = vld [vmem:[#allocation2 + $0x8] sm:$0x30]  ;;  %v1988_v47 = vrot.slane %v1986_v19, 2  ;;  %v2376_v19 = vld [vmem:[#allocation16] sm:$0xff] }
0x1e1e   :  { %4868 = vtanh.f32 %v1666_v48 }
0x1e28   :  { %v4869_v49 = vpop.eup %4868 }
0x1e29   :  { %1669 = vrot.lane.b32.xlu0 %v4869_v49, %s5308_s3  ;;  %v1993_v49 = vrot.slane %v1991_v44, 2  ;;  %v2378_v44 = vld [vmem:[#allocation16 + $0x10] sm:$0xff] }
0x1e9b   :  { %v1670_v50 = vpop.permute.xlu0 %1669 }
0x1e9c   :  { %v5771_v51 = vmul.f32 %v4867_v56, %v1670_v50 }
0x1e9e   :  { %1674 = vrot.lane.b32.xlu1 %v5771_v51, %s5309_s24 }
0x1f10   :  { %v1675_v52 = vpop.permute.xlu1 %1674 }
0x1f11   :  { %4421 = vmatmul.mubr.msk.f32.vlgmr.msra.gmra.mrb[16].mxu0 %vm284_vm3, %v1675_v52 }
0x1f12   :  { %4594 = vmatpush1.bf16.msra.mxu0 %v5687_v13  ;;  %1979 = vmatprep.mubr.f32.mxu0 %v5307_v0 }
0x1f13   :  { %4596 = vmatprep.subr.bf16.mxu0 %v5699_v24 }
0x1f16   :  { %4598 = vmatpush1.bf16.msra.mxu0 %v5702_v27 }
0x1f17   :  { %4608 = vmatprep.subr.bf16.mxu0 %v5685_v20 }
0x1fe4   :  { %v1750_v59 = vpop.f32.mrb[16].mxu0 }
0x1fe5   :  { %v1759_v60 = vadd.f32 %v1757_v58, %v1750_v59  ;;  %v1752_v61 = vpop.f32.mrb[17].mxu0 }
0x1fe6   :  { %v1764_v63 = vadd.f32 %v1762_v11, %v1752_v61 }
0x1fe8   :  { %v1765_v1 = vsel %vm366_vm1, %v1759_v60, %v1764_v63 }
0x1fe9   :  { %4870 = vtanh.f32 %v1765_v1  ;;  %v4422_v3 = vmul.f32 -1.442695, %v1765_v1 }
0x1feb   :  { %4872 = vpow2.f32 %v4422_v3 }
0x1ff3   :  { %v4871_v2 = vpop.eup %4870 }
0x1ff4   :  { %1775 = vrot.lane.b32.xlu0 %v4871_v2, %s5308_s3 }
0x1ff5   :  { %v4873_v5 = vpop.eup %4872 }
0x1ff6   :  { %v1769_v55 = vadd.f32 1.0, %v4873_v5 }
0x1ff8   :  { %4874 = vrcp.f32 %v1769_v55 }
0x2002   :  { %v4875_v20 = vpop.eup %4874 }
0x2003   :  { %v1773_v7 = vmul.f32 %v4875_v20, %v1666_v48 }
0x2066   :  { %v1776_v6 = vpop.permute.xlu0 %1775 }
0x2067   :  { %v1778_v54 = vmul.f32 %v4875_v20, %v1776_v6 }
0x2069   :  { %1780 = vrot.lane.b32.xlu1 %v1778_v54, %s5309_s24 }
0x20db   :  { %v1781_v8 = vpop.permute.xlu1 %1780 }
0x20dc   :  { %v1783_v9 = vadd.f32 %v1781_v8, %v1773_v7 }
0x20de   :  { %4876 = vtanh.f32 %v1783_v9 }
0x20e8   :  { %v4877_v10 = vpop.eup %4876 }
0x20e9   :  { %1786 = vrot.lane.b32.xlu0 %v4877_v10, %s5308_s3 }
0x215b   :  { %v1787_v15 = vpop.permute.xlu0 %1786 }
0x215c   :  { %v5785_v17 = vmul.f32 %v4875_v20, %v1787_v15  ;;  %v2103_v20 = vld [vmem:[#allocation2 + $0x10] sm:$0x30] }
0x215d   :  { %v2105_v6 = vrot.slane %v2103_v20, 4 }
0x215e   :  { %1791 = vrot.lane.b32.xlu1 %v5785_v17, %s5309_s24 }
0x21d0   :  { %v1792_v21 = vpop.permute.xlu1 %1791 }
0x21d1   :  { %4423 = vmatmul.mubr.msk.f32.vlgmr.msra.gmra.mrb[14].mxu1 %vm284_vm3, %v1792_v21 }
0x21d2   :  { %4602 = vmatpush1.bf16.msra.mxu1 %v5687_v13  ;;  %2096 = vmatprep.mubr.f32.mxu1 %v5307_v0 }
0x21d3   :  { %4604 = vmatprep.subr.bf16.mxu1 %v5699_v24 }
0x21d6   :  { %4606 = vmatpush1.bf16.msra.mxu1 %v5702_v27 }
0x22a4   :  { %v1867_v26 = vpop.f32.mrb[14].mxu1 }
0x22a5   :  { %v1873_v18 = vadd.f32 %v1872_v28, %v1867_v26  ;;  %v1869_v30 = vpop.f32.mrb[15].mxu1 }
0x22a6   :  { %v1878_v31 = vadd.f32 %v1876_v29, %v1869_v30 }
0x22a8   :  { %v1879_v32 = vsel %vm366_vm1, %v1873_v18, %v1878_v31 }
0x22a9   :  { %4878 = vtanh.f32 %v1879_v32  ;;  %v4424_v36 = vmul.f32 -1.442695, %v1879_v32 }
0x22ab   :  { %4880 = vpow2.f32 %v4424_v36  ;;  %v2274_v36 = vld [vmem:[#allocation14 + $0x8] sm:$0xff] }
0x22b3   :  { %v4879_v35 = vpop.eup %4878 }
0x22b4   :  { %1889 = vrot.lane.b32.xlu0 %v4879_v35, %s5308_s3 }
0x22b5   :  { %v4881_v37 = vpop.eup %4880 }
0x22b6   :  { %v1883_v38 = vadd.f32 1.0, %v4881_v37  ;;  %v2276_v37 = vld [vmem:[#allocation14 + $0x18] sm:$0xff] }
0x22b8   :  { %4882 = vrcp.f32 %v1883_v38  ;;  %v2273_v38 = vld [vmem:[#allocation14] sm:$0xff] }
0x22c2   :  { %v4883_v39 = vpop.eup %4882 }
0x22c3   :  { %v1887_v42 = vmul.f32 %v4883_v39, %v1783_v9  ;;  %v2108_v9 = vld [vmem:[#allocation2 + $0x8] sm:$0xc] }
0x2326   :  { %v1890_v40 = vpop.permute.xlu0 %1889 }
0x2327   :  { %v1892_v41 = vmul.f32 %v4883_v39, %v1890_v40  ;;  %v2275_v40 = vld [vmem:[#allocation14 + $0x10] sm:$0xff] }
0x2329   :  { %1894 = vrot.lane.b32.xlu1 %v1892_v41, %s5309_s24  ;;  %v4617_v41 = vpack.c.bf16 %v2275_v40, %v2273_v38 }
0x239b   :  { %v1895_v45 = vpop.permute.xlu1 %1894 }
0x239c   :  { %v1897_v33 = vadd.f32 %v1895_v45, %v1887_v42  ;;  %v2377_v42 = vld [vmem:[#allocation16 + $0x8] sm:$0xff]  ;;  %v2379_v45 = vld [vmem:[#allocation16 + $0x18] sm:$0xff] }
0x239e   :  { %4884 = vtanh.f32 %v1897_v33 }
0x23a8   :  { %v4885_v12 = vpop.eup %4884 }
0x23a9   :  { %1900 = vrot.lane.b32.xlu0 %v4885_v12, %s5308_s3  ;;  %v2271_v12 = vld [vmem:[#allocation5] sm:$0xff] }
0x241b   :  { %v1901_v46 = vpop.permute.xlu0 %1900 }
0x241c   :  { %v5798_v56 = vmul.f32 %v4883_v39, %v1901_v46  ;;  %v4615_v39 = vpack.c.bf16 %v2276_v37, %v2274_v36  ;;  %v2272_v46 = vld [vmem:[#allocation5 + $0x8] sm:$0xff] }
0x241e   :  { %1905 = vrot.lane.b32.xlu1 %v5798_v56, %s5309_s24  ;;  %4616 = vmatprep.subr.bf16.mxu1 %v4615_v39 }
0x2490   :  { %v1906_v16 = vpop.permute.xlu1 %1905 }
0x2491   :  { %4425 = vmatmul.mubr.msk.f32.vlgmr.msra.gmra.mrb[18].mxu0 %vm284_vm3, %v1906_v16 }
0x2492   :  { %4610 = vmatpush1.bf16.msra.mxu0 %v5687_v13  ;;  %2210 = vmatprep.mubr.f32.mxu0 %v5307_v0 }
0x2493   :  { %4612 = vmatprep.subr.bf16.mxu0 %v5699_v24 }
0x2496   :  { %4614 = vmatpush1.bf16.msra.mxu0 %v5702_v27 }
0x2564   :  { %v1981_v48 = vpop.f32.mrb[18].mxu0 }
0x2565   :  { %v1990_v50 = vadd.f32 %v1988_v47, %v1981_v48  ;;  %v1983_v52 = vpop.f32.mrb[19].mxu0  ;;  %v5832_v47 = vpack.c.bf16 %v2378_v44, %v2376_v19  ;;  %v2381_v48 = vld [vmem:[#allocation16 + $0x28] sm:$0xff] }
0x2566   :  { %v1995_v53 = vadd.f32 %v1993_v49, %v1983_v52  ;;  %v2383_v49 = vld [vmem:[#allocation16 + $0x38] sm:$0xff]  ;;  %v2380_v52 = vld [vmem:[#allocation16 + $0x20] sm:$0xff] }
0x2568   :  { %v1996_v57 = vsel %vm366_vm1, %v1990_v50, %v1995_v53  ;;  %v5834_v50 = vpack.c.bf16 %v2383_v49, %v2381_v48  ;;  %v2382_v53 = vld [vmem:[#allocation16 + $0x30] sm:$0xff] }
0x2569   :  { %4886 = vtanh.f32 %v1996_v57  ;;  %v4426_v13 = vmul.f32 -1.442695, %v1996_v57  ;;  %v5838_v57 = vpack.c.bf16 %v2382_v53, %v2380_v52 }
0x256b   :  { %4888 = vpow2.f32 %v4426_v13 }
0x2573   :  { %v4887_v58 = vpop.eup %4886 }
0x2574   :  { %2006 = vrot.lane.b32.xlu0 %v4887_v58, %s5308_s3 }
0x2575   :  { %v4889_v59 = vpop.eup %4888 }
0x2576   :  { %v2000_v24 = vadd.f32 1.0, %v4889_v59  ;;  %v2277_v59 = vld [vmem:[%s6228_s9] sm:$0x3] }
0x2578   :  { %4890 = vrcp.f32 %v2000_v24  ;;  %v2282_v24 = vrot.slane %v2277_v59, %v5550_v23 }
0x2582   :  { %v4891_v27 = vpop.eup %4890 }
0x2583   :  { %v2004_v61 = vmul.f32 %v4891_v27, %v1897_v33  ;;  %v5823_v33 = vpack.c.bf16 %v2379_v45, %v2377_v42 }
0x2585   :  { %4620 = vmatprep.subr.bf16.mxu0 %v5823_v33 }
0x25e6   :  { %v2007_v11 = vpop.permute.xlu0 %2006 }
0x25e7   :  { %v2009_v60 = vmul.f32 %v4891_v27, %v2007_v11 }
0x25e9   :  { %2011 = vrot.lane.b32.xlu1 %v2009_v60, %s5309_s24 }
0x265b   :  { %v2012_v63 = vpop.permute.xlu1 %2011 }
0x265c   :  { %v2014_v1 = vadd.f32 %v2012_v63, %v2004_v61 }
0x265e   :  { %4892 = vtanh.f32 %v2014_v1 }
0x2668   :  { %v4893_v2 = vpop.eup %4892 }
0x2669   :  { %2017 = vrot.lane.b32.xlu0 %v4893_v2, %s5308_s3 }
0x26db   :  { %v2018_v3 = vpop.permute.xlu0 %2017 }
0x26dc   :  { %v5811_v5 = vmul.f32 %v4891_v27, %v2018_v3  ;;  %v2286_v27 = vrot.slane %v2277_v59, %v5555_v25 }
0x26de   :  { %2022 = vrot.lane.b32.xlu1 %v5811_v5, %s5309_s24 }
0x2750   :  { %v2023_v55 = vpop.permute.xlu1 %2022 }
0x2751   :  { %4427 = vmatmul.mubr.msk.f32.vlgmr.msra.gmra.mrb[16].mxu1 %vm284_vm3, %v2023_v55 }
0x2752   :  { %2359 = vmatprep.mubr.f32.mxu1 %v5307_v0  ;;  %4618 = vmatpush1.bf16.msra.mxu1 %v4617_v41 }
0x2753   :  { %4628 = vmatprep.subr.bf16.mxu1 %v5823_v33 }
0x2755   :  { %4431 = vmatmul.mubr.msk.f32.vlgmr.msra.gmra.mrb[18].mxu1 %vm188_vm0, %v2271_v12 }
0x2756   :  { %2365 = vmatprep.mubr.f32.mxu1 %v5307_v0  ;;  %4630 = vmatpush1.bf16.msra.mxu1 %v5832_v47 }
0x2757   :  { %4632 = vmatprep.subr.bf16.mxu1 %v5834_v50 }
0x2759   :  { %4432 = vmatmul.mubr.msk.f32.gmra.mrb[20].mxu1 %vm188_vm0, %v2272_v46 }
0x275a   :  { %2564 = vmatprep.mubr.f32.mxu1 %v5307_v0  ;;  %4634 = vmatpush1.bf16.msra.mxu1 %v5838_v57 }
0x275b   :  { %4644 = vmatprep.subr.bf16.mxu1 %v5823_v33 }
0x2824   :  { %v2098_v54 = vpop.f32.mrb[16].mxu1 }
0x2825   :  { %v2107_v7 = vadd.f32 %v2105_v6, %v2098_v54  ;;  %v2100_v8 = vpop.f32.mrb[17].mxu1  ;;  %v2217_v6 = vld [vmem:[#allocation2 + $0x10] sm:$0xc0] }
0x2826   :  { %v2109_v10 = vadd.f32 %v2108_v9, %v2100_v8 }
0x2828   :  { %v2110_v15 = vsel %vm366_vm1, %v2107_v7, %v2109_v10  ;;  %v2361_v11 = vpop.f32.mrb[18].mxu1  ;;  %v2219_v7 = vrot.slane %v2217_v6, 6 }
0x2829   :  { %4894 = vtanh.f32 %v2110_v15  ;;  %v4428_v22 = vmul.f32 -1.442695, %v2110_v15  ;;  %v2362_v60 = vadd.f32 %v2361_v11, %v2282_v24  ;;  %v2363_v61 = vpop.f32.mrb[19].mxu1 }
0x282a   :  { %v2364_v63 = vadd.f32 %v2363_v61, %v2286_v27 }
0x282b   :  { %4896 = vpow2.f32 %v4428_v22  ;;  %2372 = vst [vmem:[#allocation2] sm:$0xff] %v2362_v60 }
0x282c   :  { %v2367_v2 = vpop.f32.mrb[20].mxu1 }
0x282d   :  { %v2368_v3 = vadd.f32 %v2367_v2, %v2282_v24  ;;  %v2369_v55 = vpop.f32.mrb[21].mxu1 }
0x282e   :  { %v2370_v20 = vadd.f32 %v2369_v55, %v2286_v27 }
0x282f   :  { %2374 = vst [vmem:[#allocation2 + $0x10] sm:$0xff] %v2368_v3 }
0x2830   :  { %2375 = vst [vmem:[#allocation2 + $0x18] sm:$0xff] %v2370_v20 }
0x2833   :  { %v4895_v21 = vpop.eup %4894 }
0x2834   :  { %2120 = vrot.lane.b32.xlu0 %v4895_v21, %s5308_s3 }
0x2835   :  { %v4897_v26 = vpop.eup %4896 }
0x2836   :  { %v2114_v28 = vadd.f32 1.0, %v4897_v26 }
0x2837   :  { %v2459_v22 = vld [vmem:[#allocation2 + $0x18] sm:$0xc0]  ;;  %v2576_v49 = vld [vmem:[#allocation2 + $0x18] sm:$0x30] }
0x2838   :  { %4898 = vrcp.f32 %v2114_v28 }
0x2842   :  { %v4899_v29 = vpop.eup %4898 }
0x2843   :  { %v2118_v31 = vmul.f32 %v4899_v29, %v2014_v1  ;;  %v2222_v1 = vld [vmem:[#allocation2 + $0x8] sm:$0x3] }
0x2844   :  { %2373 = vst [vmem:[#allocation2 + $0x8] sm:$0xff] %v2364_v63  ;;  %v2224_v9 = vrot.slane %v2222_v1, 6 }
0x28a6   :  { %v2121_v18 = vpop.permute.xlu0 %2120 }
0x28a7   :  { %v2123_v30 = vmul.f32 %v4899_v29, %v2121_v18 }
0x28a9   :  { %2125 = vrot.lane.b32.xlu1 %v2123_v30, %s5309_s24 }
0x291b   :  { %v2126_v32 = vpop.permute.xlu1 %2125 }
0x291c   :  { %v5820_v35 = vadd.f32 %v2126_v32, %v2118_v31 }
0x291e   :  { %4900 = vtanh.f32 %v5820_v35 }
0x2928   :  { %v4901_v16 = vpop.eup %4900 }
0x2929   :  { %2131 = vrot.lane.b32.xlu0 %v4901_v16, %s5308_s3 }
0x299b   :  { %v2132_v58 = vpop.permute.xlu0 %2131 }
0x299c   :  { %v5842_v13 = vmul.f32 %v4899_v29, %v2132_v58  ;;  %v2457_v29 = vld [vmem:[#allocation2] sm:$0x3]  ;;  %v2578_v58 = vrot.slane %v2576_v49, 2 }
0x299e   :  { %2136 = vrot.lane.b32.xlu1 %v5842_v13, %s5309_s24 }
0x2a10   :  { %v2137_v54 = vpop.permute.xlu1 %2136 }
0x2a11   :  { %4429 = vmatmul.mubr.msk.f32.vlgmr.msra.gmra.mrb[20].mxu0 %vm284_vm3, %v2137_v54 }
0x2a12   :  { %4622 = vmatpush1.bf16.msra.mxu0 %v5832_v47  ;;  %2450 = vmatprep.mubr.f32.mxu0 %v5307_v0 }
0x2a13   :  { %4624 = vmatprep.subr.bf16.mxu0 %v5834_v50 }
0x2a16   :  { %4626 = vmatpush1.bf16.msra.mxu0 %v5838_v57 }
0x2a17   :  { %4636 = vmatprep.subr.bf16.mxu0 %v5823_v33 }
0x2a19   :  { %4433 = vmatmul.mubr.msk.f32.vlgmr.msra.gmra.mrb[22].mxu0 %vm284_vm3, %v5718_v4  ;;  %v2461_v4 = vrot.slane %v2459_v22, 4 }
0x2a1a   :  { %4638 = vmatpush1.bf16.msra.mxu0 %v5832_v47  ;;  %2681 = vmatprep.mubr.f32.mxu0 %v5307_v0 }
0x2a1b   :  { %4640 = vmatprep.subr.bf16.mxu0 %v5834_v50 }
0x2a1e   :  { %4642 = vmatpush1.bf16.msra.mxu0 %v5838_v57 }
0x2a1f   :  { %4652 = vmatprep.subr.bf16.mxu0 %v5823_v33 }
0x2ae4   :  { %v2212_v8 = vpop.f32.mrb[20].mxu0 }
0x2ae5   :  { %v2221_v10 = vadd.f32 %v2219_v7, %v2212_v8  ;;  %v2214_v15 = vpop.f32.mrb[21].mxu0 }
0x2ae6   :  { %v2226_v21 = vadd.f32 %v2224_v9, %v2214_v15  ;;  %v2688_v15 = vld [vmem:[#allocation2] sm:$0x30] }
0x2ae8   :  { %v5865_v26 = vsel %vm366_vm1, %v2221_v10, %v2226_v21  ;;  %v2690_v21 = vrot.slane %v2688_v15, 4 }
0x2aec   :  { %v2452_v28 = vpop.f32.mrb[22].mxu0 }
0x2aed   :  { %v2458_v18 = vadd.f32 %v2457_v29, %v2452_v28  ;;  %v2454_v30 = vpop.f32.mrb[23].mxu0  ;;  %v2693_v29 = vld [vmem:[#allocation2 + $0x18] sm:$0xc] }
0x2aee   :  { %v2463_v31 = vadd.f32 %v2461_v4, %v2454_v30 }
0x2af0   :  { %v2464_v32 = vsel %vm366_vm1, %v2458_v18, %v2463_v31 }
0x2af1   :  { %4902 = vtanh.f32 %v2464_v32  ;;  %v4434_v37 = vmul.f32 -1.442695, %v2464_v32 }
0x2af3   :  { %4904 = vpow2.f32 %v4434_v37 }
0x2afb   :  { %v4903_v36 = vpop.eup %4902 }
0x2afc   :  { %2474 = vrot.lane.b32.xlu0 %v4903_v36, %s5308_s3 }
0x2afd   :  { %v4905_v38 = vpop.eup %4904 }
0x2afe   :  { %v2468_v39 = vadd.f32 1.0, %v4905_v38 }
0x2b00   :  { %4906 = vrcp.f32 %v2468_v39 }
0x2b0a   :  { %v4907_v40 = vpop.eup %4906 }
0x2b0b   :  { %v2472_v45 = vmul.f32 %v4907_v40, %v5671_v43  ;;  %v2571_v43 = vld [vmem:[#allocation2] sm:$0xc] }
0x2b0c   :  { %v2573_v52 = vrot.slane %v2571_v43, 2  ;;  %v2807_v43 = vld [vmem:[#allocation2 + $0x18] sm:$0x3] }
0x2b6e   :  { %v2475_v41 = vpop.permute.xlu0 %2474 }
0x2b6f   :  { %v2477_v42 = vmul.f32 %v4907_v40, %v2475_v41 }
0x2b71   :  { %2479 = vrot.lane.b32.xlu1 %v2477_v42, %s5309_s24 }
0x2be3   :  { %v2480_v12 = vpop.permute.xlu1 %2479 }
0x2be4   :  { %v2482_v46 = vadd.f32 %v2480_v12, %v2472_v45 }
0x2be6   :  { %4908 = vtanh.f32 %v2482_v46 }
0x2bf0   :  { %v4909_v16 = vpop.eup %4908 }
0x2bf1   :  { %2485 = vrot.lane.b32.xlu0 %v4909_v16, %s5308_s3 }
0x2c63   :  { %v2486_v19 = vpop.permute.xlu0 %2485 }
0x2c64   :  { %v5872_v44 = vmul.f32 %v4907_v40, %v2486_v19 }
0x2c66   :  { %2490 = vrot.lane.b32.xlu1 %v5872_v44, %s5309_s24 }
0x2cd8   :  { %v2491_v48 = vpop.permute.xlu1 %2490 }
0x2cd9   :  { %2493 = vst.msk [vmem:[#allocation3] sm:$0x3] %vm396_vm2, %v2491_v48  ;;  %4435 = vmatmul.mubr.msk.f32.vlgmr.msra.gmra.mrb[22].mxu1 %vm284_vm3, %v2491_v48  ;;  %v2802_v48 = vld [vmem:[#allocation2] sm:$0xc0] }
0x2cda   :  { %4646 = vmatpush1.bf16.msra.mxu1 %v5832_v47  ;;  %2795 = vmatprep.mubr.f32.mxu1 %v5307_v0  ;;  %v2804_v49 = vrot.slane %v2802_v48, 6  ;;  %v3033_v48 = vld [vmem:[#allocation2 + $0x10] sm:$0xc] }
0x2cdb   :  { %4648 = vmatprep.subr.bf16.mxu1 %v5834_v50 }
0x2cde   :  { %4650 = vmatpush1.bf16.msra.mxu1 %v5838_v57 }
0x2cdf   :  { %4660 = vmatprep.subr.bf16.mxu1 %v5823_v33 }
0x2dac   :  { %v2566_v53 = vpop.f32.mrb[22].mxu1 }
0x2dad   :  { %v2575_v59 = vadd.f32 %v2573_v52, %v2566_v53  ;;  %v2568_v24 = vpop.f32.mrb[23].mxu1  ;;  %v2809_v53 = vrot.slane %v2807_v43, 6  ;;  %v3038_v43 = vld [vmem:[#allocation2 + $0x8] sm:$0x30] }
0x2dae   :  { %v2580_v27 = vadd.f32 %v2578_v58, %v2568_v24 }
0x2db0   :  { %v2581_v11 = vsel %vm366_vm1, %v2575_v59, %v2580_v27 }
0x2db1   :  { %4910 = vtanh.f32 %v2581_v11  ;;  %v4436_v61 = vmul.f32 -1.442695, %v2581_v11 }
0x2db3   :  { %4912 = vpow2.f32 %v4436_v61 }
0x2dbb   :  { %v4911_v60 = vpop.eup %4910 }
0x2dbc   :  { %2591 = vrot.lane.b32.xlu0 %v4911_v60, %s5308_s3 }
0x2dbd   :  { %v4913_v63 = vpop.eup %4912 }
0x2dbe   :  { %v2585_v1 = vadd.f32 1.0, %v4913_v63 }
0x2dc0   :  { %4914 = vrcp.f32 %v2585_v1 }
0x2dca   :  { %v4915_v2 = vpop.eup %4914 }
0x2dcb   :  { %v2589_v20 = vmul.f32 %v4915_v2, %v2482_v46 }
0x2e2e   :  { %v2592_v3 = vpop.permute.xlu0 %2591 }
0x2e2f   :  { %v2594_v55 = vmul.f32 %v4915_v2, %v2592_v3 }
0x2e31   :  { %2596 = vrot.lane.b32.xlu1 %v2594_v55, %s5309_s24 }
0x2ea3   :  { %v2597_v6 = vpop.permute.xlu1 %2596 }
0x2ea4   :  { %v2599_v54 = vadd.f32 %v2597_v6, %v2589_v20 }
0x2ea6   :  { %4916 = vtanh.f32 %v2599_v54 }
0x2eb0   :  { %v4917_v7 = vpop.eup %4916 }
0x2eb1   :  { %2602 = vrot.lane.b32.xlu0 %v4917_v7, %s5308_s3 }
0x2f23   :  { %v2603_v8 = vpop.permute.xlu0 %2602 }
0x2f24   :  { %v5887_v9 = vmul.f32 %v4915_v2, %v2603_v8 }
0x2f26   :  { %2607 = vrot.lane.b32.xlu1 %v5887_v9, %s5309_s24 }
0x2f98   :  { %v2608_v10 = vpop.permute.xlu1 %2607 }
0x2f99   :  { %2610 = vst.msk [vmem:[#allocation3 + $0x2] sm:$0x3] %vm396_vm2, %v2608_v10  ;;  %4437 = vmatmul.mubr.msk.f32.vlgmr.msra.gmra.mrb[24].mxu0 %vm284_vm3, %v2608_v10  ;;  %v2921_v10 = vld [vmem:[#allocation2 + $0x8] sm:$0xc0] }
0x2f9a   :  { %4654 = vmatpush1.bf16.msra.mxu0 %v5832_v47  ;;  %2912 = vmatprep.mubr.f32.mxu0 %v5307_v0 }
0x2f9b   :  { %4656 = vmatprep.subr.bf16.mxu0 %v5834_v50 }
0x2f9e   :  { %4658 = vmatpush1.bf16.msra.mxu0 %v5838_v57 }
0x2f9f   :  { %4668 = vmatprep.subr.bf16.mxu0 %v5823_v33 }
0x306c   :  { %v2683_v22 = vpop.f32.mrb[24].mxu0 }
0x306d   :  { %v2692_v4 = vadd.f32 %v2690_v21, %v2683_v22  ;;  %v2685_v28 = vpop.f32.mrb[25].mxu0  ;;  %v2919_v21 = vld [vmem:[#allocation2 + $0x10] sm:$0x3]  ;;  %v2923_v22 = vrot.slane %v2921_v10, 4 }
0x306e   :  { %v2694_v18 = vadd.f32 %v2693_v29, %v2685_v28 }
0x3070   :  { %v2695_v30 = vsel %vm366_vm1, %v2692_v4, %v2694_v18 }
0x3071   :  { %4918 = vtanh.f32 %v2695_v30  ;;  %v4438_v32 = vmul.f32 -1.442695, %v2695_v30 }
0x3073   :  { %4920 = vpow2.f32 %v4438_v32 }
0x307b   :  { %v4919_v31 = vpop.eup %4918 }
0x307c   :  { %2705 = vrot.lane.b32.xlu0 %v4919_v31, %s5308_s3 }
0x307d   :  { %v4921_v36 = vpop.eup %4920 }
0x307e   :  { %v2699_v37 = vadd.f32 1.0, %v4921_v36 }
0x3080   :  { %4922 = vrcp.f32 %v2699_v37 }
0x308a   :  { %v4923_v38 = vpop.eup %4922 }
0x308b   :  { %v2703_v41 = vmul.f32 %v4923_v38, %v2599_v54 }
0x30ee   :  { %v2706_v39 = vpop.permute.xlu0 %2705 }
0x30ef   :  { %v2708_v40 = vmul.f32 %v4923_v38, %v2706_v39 }
0x30f1   :  { %2710 = vrot.lane.b32.xlu1 %v2708_v40, %s5309_s24 }
0x3163   :  { %v2711_v42 = vpop.permute.xlu1 %2710 }
0x3164   :  { %v2713_v45 = vadd.f32 %v2711_v42, %v2703_v41 }
0x3166   :  { %4924 = vtanh.f32 %v2713_v45 }
0x3170   :  { %v4925_v12 = vpop.eup %4924 }
0x3171   :  { %2716 = vrot.lane.b32.xlu0 %v4925_v12, %s5308_s3 }
0x31e3   :  { %v2717_v46 = vpop.permute.xlu0 %2716 }
0x31e4   :  { %v5902_v16 = vmul.f32 %v4923_v38, %v2717_v46 }
0x31e6   :  { %2721 = vrot.lane.b32.xlu1 %v5902_v16, %s5309_s24 }
0x3258   :  { %v2722_v19 = vpop.permute.xlu1 %2721 }
0x3259   :  { %2724 = vst.msk [vmem:[#allocation3 + $0x4] sm:$0x3] %vm396_vm2, %v2722_v19  ;;  %4439 = vmatmul.mubr.msk.f32.vlgmr.msra.gmra.mrb[24].mxu1 %vm284_vm3, %v2722_v19 }
0x325a   :  { %4662 = vmatpush1.bf16.msra.mxu1 %v5832_v47  ;;  %3026 = vmatprep.mubr.f32.mxu1 %v5307_v0 }
0x325b   :  { %4664 = vmatprep.subr.bf16.mxu1 %v5834_v50 }
0x325e   :  { %4666 = vmatpush1.bf16.msra.mxu1 %v5838_v57 }
0x325f   :  { %4676 = vmatprep.subr.bf16.mxu1 %v5823_v33 }
0x332c   :  { %v2797_v52 = vpop.f32.mrb[24].mxu1 }
0x332d   :  { %v2806_v58 = vadd.f32 %v2804_v49, %v2797_v52  ;;  %v2799_v59 = vpop.f32.mrb[25].mxu1  ;;  %v3035_v49 = vrot.slane %v3033_v48, 2  ;;  %v4430_v48 = vmul.f32 -1.442695, %v5865_v26 }
0x332e   :  { %v2811_v24 = vadd.f32 %v2809_v53, %v2799_v59  ;;  %v3040_v53 = vrot.slane %v3038_v43, 2 }
0x3330   :  { %v2812_v27 = vsel %vm366_vm1, %v2806_v58, %v2811_v24 }
0x3331   :  { %4926 = vtanh.f32 %v2812_v27  ;;  %v4440_v60 = vmul.f32 -1.442695, %v2812_v27 }
0x3333   :  { %4928 = vpow2.f32 %v4440_v60 }
0x333b   :  { %v4927_v11 = vpop.eup %4926 }
0x333c   :  { %2822 = vrot.lane.b32.xlu0 %v4927_v11, %s5308_s3 }
0x333d   :  { %v4929_v61 = vpop.eup %4928 }
0x333e   :  { %v2816_v63 = vadd.f32 1.0, %v4929_v61 }
0x3340   :  { %4930 = vrcp.f32 %v2816_v63 }
0x334a   :  { %v4931_v33 = vpop.eup %4930 }
0x334b   :  { %v2820_v3 = vmul.f32 %v4931_v33, %v2713_v45 }
0x33ae   :  { %v2823_v1 = vpop.permute.xlu0 %2822 }
0x33af   :  { %v2825_v2 = vmul.f32 %v4931_v33, %v2823_v1 }
0x33b1   :  { %2827 = vrot.lane.b32.xlu1 %v2825_v2, %s5309_s24 }
0x3423   :  { %v2828_v55 = vpop.permute.xlu1 %2827 }
0x3424   :  { %v2830_v20 = vadd.f32 %v2828_v55, %v2820_v3 }
0x3426   :  { %4932 = vtanh.f32 %v2830_v20 }
0x3430   :  { %v4933_v6 = vpop.eup %4932 }
0x3431   :  { %2833 = vrot.lane.b32.xlu0 %v4933_v6, %s5308_s3 }
0x34a3   :  { %v2834_v54 = vpop.permute.xlu0 %2833 }
0x34a4   :  { %v5917_v7 = vmul.f32 %v4931_v33, %v2834_v54  ;;  %v3150_v54 = vld [vmem:[#allocation2 + $0x10] sm:$0x30] }
0x34a6   :  { %2838 = vrot.lane.b32.xlu1 %v5917_v7, %s5309_s24 }
0x3518   :  { %v2839_v8 = vpop.permute.xlu1 %2838 }
0x3519   :  { %2841 = vst.msk [vmem:[#allocation3 + $0x6] sm:$0x3] %vm396_vm2, %v2839_v8  ;;  %4441 = vmatmul.mubr.msk.f32.vlgmr.msra.gmra.mrb[26].mxu0 %vm284_vm3, %v2839_v8  ;;  %v3152_v8 = vrot.slane %v3150_v54, 4 }
0x351a   :  { %4670 = vmatpush1.bf16.msra.mxu0 %v5832_v47  ;;  %3143 = vmatprep.mubr.f32.mxu0 %v5307_v0 }
0x351b   :  { %4672 = vmatprep.subr.bf16.mxu0 %v5834_v50 }
0x351e   :  { %4674 = vmatpush1.bf16.msra.mxu0 %v5838_v57 }
0x35ec   :  { %v2914_v15 = vpop.f32.mrb[26].mxu0 }
0x35ed   :  { %v2920_v4 = vadd.f32 %v2919_v21, %v2914_v15  ;;  %v2916_v28 = vpop.f32.mrb[27].mxu0 }
0x35ee   :  { %v2925_v29 = vadd.f32 %v2923_v22, %v2916_v28  ;;  %v3155_v22 = vld [vmem:[#allocation2 + $0x8] sm:$0xc] }
0x35f0   :  { %v2926_v18 = vsel %vm366_vm1, %v2920_v4, %v2925_v29 }
0x35f1   :  { %4934 = vtanh.f32 %v2926_v18  ;;  %v4442_v31 = vmul.f32 -1.442695, %v2926_v18 }
0x35f3   :  { %4936 = vpow2.f32 %v4442_v31 }
0x35fb   :  { %v4935_v30 = vpop.eup %4934 }
0x35fc   :  { %2936 = vrot.lane.b32.xlu0 %v4935_v30, %s5308_s3 }
0x35fd   :  { %v4937_v32 = vpop.eup %4936 }
0x35fe   :  { %v2930_v36 = vadd.f32 1.0, %v4937_v32 }
0x3600   :  { %4938 = vrcp.f32 %v2930_v36 }
0x360a   :  { %v4939_v37 = vpop.eup %4938 }
0x360b   :  { %v2934_v40 = vmul.f32 %v4939_v37, %v2830_v20 }
0x366e   :  { %v2937_v38 = vpop.permute.xlu0 %2936 }
0x366f   :  { %v2939_v39 = vmul.f32 %v4939_v37, %v2937_v38 }
0x3671   :  { %2941 = vrot.lane.b32.xlu1 %v2939_v39, %s5309_s24 }
0x36e3   :  { %v2942_v41 = vpop.permute.xlu1 %2941 }
0x36e4   :  { %v2944_v42 = vadd.f32 %v2942_v41, %v2934_v40 }
0x36e6   :  { %4940 = vtanh.f32 %v2944_v42 }
0x36f0   :  { %v4941_v45 = vpop.eup %4940 }
0x36f1   :  { %2947 = vrot.lane.b32.xlu0 %v4941_v45, %s5308_s3 }
0x3763   :  { %v2948_v12 = vpop.permute.xlu0 %2947 }
0x3764   :  { %v5931_v46 = vmul.f32 %v4939_v37, %v2948_v12 }
0x3766   :  { %2952 = vrot.lane.b32.xlu1 %v5931_v46, %s5309_s24 }
0x37d8   :  { %v5935_v19 = vpop.permute.xlu1 %2952 }
0x37d9   :  { %4443 = vmatmul.mubr.msk.f32.vlgmr.msra.gmra.mrb[26].mxu1 %vm284_vm3, %v5935_v19 }
0x37da   :  { %4678 = vmatpush1.bf16.msra.mxu1 %v5832_v47  ;;  %3257 = vmatprep.mubr.f32.mxu1 %v5307_v0 }
0x37db   :  { %4680 = vmatprep.subr.bf16.mxu1 %v5834_v50 }
0x37de   :  { %4682 = vmatpush1.bf16.msra.mxu1 %v5838_v57 }
0x38ac   :  { %v3028_v52 = vpop.f32.mrb[26].mxu1 }
0x38ad   :  { %v3037_v58 = vadd.f32 %v3035_v49, %v3028_v52  ;;  %v3030_v59 = vpop.f32.mrb[27].mxu1 }
0x38ae   :  { %v3042_v24 = vadd.f32 %v3040_v53, %v3030_v59 }
0x38b0   :  { %v3043_v27 = vsel %vm366_vm1, %v3037_v58, %v3042_v24 }
0x38b1   :  { %4942 = vtanh.f32 %v3043_v27  ;;  %v4444_v47 = vmul.f32 -1.442695, %v3043_v27 }
0x38b3   :  { %4944 = vpow2.f32 %v4444_v47  ;;  %v3264_v47 = vld [vmem:[#allocation2 + $0x10] sm:$0xc0] }
0x38bb   :  { %v4943_v11 = vpop.eup %4942 }
0x38bc   :  { %3053 = vrot.lane.b32.xlu0 %v4943_v11, %s5308_s3 }
0x38bd   :  { %v4945_v60 = vpop.eup %4944 }
0x38be   :  { %v3047_v50 = vadd.f32 1.0, %v4945_v60  ;;  %v3269_v60 = vld [vmem:[#allocation2 + $0x8] sm:$0x3] }
0x38c0   :  { %4946 = vrcp.f32 %v3047_v50  ;;  %v3266_v50 = vrot.slane %v3264_v47, 6 }
0x38ca   :  { %v4947_v57 = vpop.eup %4946 }
0x38cb   :  { %v3051_v33 = vmul.f32 %v4947_v57, %v2944_v42 }
0x392e   :  { %v3054_v61 = vpop.permute.xlu0 %3053 }
0x392f   :  { %v3056_v63 = vmul.f32 %v4947_v57, %v3054_v61  ;;  %v3271_v61 = vrot.slane %v3269_v60, 6  ;;  %v3430_v60 = vld [vmem:[#allocation19 + $0x28] sm:$0xff] }
0x3931   :  { %3058 = vrot.lane.b32.xlu1 %v3056_v63, %s5309_s24 }
0x39a3   :  { %v3059_v1 = vpop.permute.xlu1 %3058 }
0x39a4   :  { %v3061_v2 = vadd.f32 %v3059_v1, %v3051_v33 }
0x39a6   :  { %4948 = vtanh.f32 %v3061_v2 }
0x39b0   :  { %v4949_v3 = vpop.eup %4948 }
0x39b1   :  { %3064 = vrot.lane.b32.xlu0 %v4949_v3, %s5308_s3 }
0x3a23   :  { %v3065_v55 = vpop.permute.xlu0 %3064 }
0x3a24   :  { %v3067_v20 = vmul.f32 %v4947_v57, %v3065_v55 }
0x3a26   :  { %3069 = vrot.lane.b32.xlu1 %v3067_v20, %s5309_s24 }
0x3a98   :  { %v5948_v6 = vpop.permute.xlu1 %3069 }
0x3a99   :  { %4445 = vmatmul.mubr.msk.f32.vlgmr.msra.gmra.mrb[28].mxu0 %vm284_vm3, %v5948_v6 }
0x3a9a   :  { %3408 = vmatprep.mubr.f32.mxu0 %v5307_v0 }
0x3b6c   :  { %v3145_v10 = vpop.f32.mrb[28].mxu0 }
0x3b6d   :  { %v3154_v15 = vadd.f32 %v3152_v8, %v3145_v10  ;;  %v3147_v21 = vpop.f32.mrb[29].mxu0 }
0x3b6e   :  { %v3156_v4 = vadd.f32 %v3155_v22, %v3147_v21 }
0x3b70   :  { %v3157_v28 = vsel %vm366_vm1, %v3154_v15, %v3156_v4 }
0x3b71   :  { %4950 = vtanh.f32 %v3157_v28  ;;  %v4446_v18 = vmul.f32 -1.442695, %v3157_v28 }
0x3b73   :  { %4952 = vpow2.f32 %v4446_v18  ;;  %v3311_v18 = vld [vmem:[#allocation17 + $0x8] sm:$0xff] }
0x3b7b   :  { %v4951_v29 = vpop.eup %4950 }
0x3b7c   :  { %3167 = vrot.lane.b32.xlu0 %v4951_v29, %s5308_s3 }
0x3b7d   :  { %v4953_v30 = vpop.eup %4952 }
0x3b7e   :  { %v3161_v31 = vadd.f32 1.0, %v4953_v30  ;;  %v3313_v30 = vld [vmem:[#allocation17 + $0x18] sm:$0xff] }
0x3b80   :  { %4954 = vrcp.f32 %v3161_v31  ;;  %v3310_v31 = vld [vmem:[#allocation17] sm:$0xff] }
0x3b8a   :  { %v4955_v32 = vpop.eup %4954 }
0x3b8b   :  { %v3165_v38 = vmul.f32 %v4955_v32, %v3061_v2 }
0x3bee   :  { %v3168_v36 = vpop.permute.xlu0 %3167 }
0x3bef   :  { %v3170_v37 = vmul.f32 %v4955_v32, %v3168_v36  ;;  %v3312_v36 = vld [vmem:[#allocation17 + $0x10] sm:$0xff] }
0x3bf1   :  { %3172 = vrot.lane.b32.xlu1 %v3170_v37, %s5309_s24  ;;  %v3315_v37 = vld [vmem:[#allocation17 + $0x28] sm:$0xff] }
0x3c63   :  { %v3173_v39 = vpop.permute.xlu1 %3172 }
0x3c64   :  { %v3175_v40 = vadd.f32 %v3173_v39, %v3165_v38  ;;  %v3317_v38 = vld [vmem:[#allocation17 + $0x38] sm:$0xff]  ;;  %v4685_v39 = vpack.c.bf16 %v3312_v36, %v3310_v31 }
0x3c66   :  { %4956 = vtanh.f32 %v3175_v40 }
0x3c67   :  { %4958 = vtanh.f32 %v5865_v26 }
0x3c68   :  { %4960 = vpow2.f32 %v4430_v48  ;;  %v3321_v48 = vld [vmem:[#allocation17 + $0x58] sm:$0xff] }
0x3c70   :  { %v4957_v41 = vpop.eup %4956 }
0x3c71   :  { %3178 = vrot.lane.b32.xlu0 %v4957_v41, %s5308_s3  ;;  %v4959_v12 = vpop.eup %4958  ;;  %v4687_v41 = vpack.c.bf16 %v3317_v38, %v3315_v37 }
0x3c72   :  { %v4961_v43 = vpop.eup %4960 }
0x3c73   :  { %v2231_v49 = vadd.f32 1.0, %v4961_v43  ;;  %v3426_v43 = vld [vmem:[#allocation19 + $0x8] sm:$0xff] }
0x3c75   :  { %4962 = vrcp.f32 %v2231_v49 }
0x3c7f   :  { %v5966_v53 = vpop.eup %4962 }
0x3c80   :  { %v2235_v24 = vmul.f32 %v5966_v53, %v5820_v35 }
0x3ce3   :  { %v3179_v42 = vpop.permute.xlu0 %3178 }
0x3ce4   :  { %v5958_v45 = vmul.f32 %v4955_v32, %v3179_v42  ;;  %v4683_v32 = vpack.c.bf16 %v3313_v30, %v3311_v18  ;;  %v3314_v42 = vld [vmem:[#allocation17 + $0x20] sm:$0xff] }
0x3ce6   :  { %3183 = vrot.lane.b32.xlu1 %v5958_v45, %s5309_s24  ;;  %4684 = vmatprep.subr.bf16.mxu0 %v4683_v32 }
0x3ce7   :  { %4686 = vmatpush1.bf16.msra.mxu0 %v4685_v39 }
0x3ce8   :  { %4688 = vmatprep.subr.bf16.mxu0 %v4687_v41 }
0x3cea   :  { %2237 = vrot.lane.b32.xlu1 %v4959_v12, %s5308_s3 }
0x3d58   :  { %v3184_v52 = vpop.permute.xlu1 %3183 }
0x3d59   :  { %4447 = vmatmul.mubr.msk.f32.vlgmr.msra.gmra.mrb[28].mxu1 %vm284_vm3, %v3184_v52 }
0x3d5a   :  { %3499 = vmatprep.mubr.f32.mxu1 %v5307_v0 }
0x3d5c   :  { %v2238_v58 = vpop.permute.xlu1 %2237 }
0x3d5d   :  { %v2240_v59 = vmul.f32 %v5966_v53, %v2238_v58  ;;  %v3318_v58 = vld [vmem:[#allocation17 + $0x40] sm:$0xff] }
0x3d5f   :  { %2242 = vrot.lane.b32.xlu1 %v2240_v59, %s5309_s24  ;;  %v3320_v59 = vld [vmem:[#allocation17 + $0x50] sm:$0xff] }
0x3dd1   :  { %v2243_v26 = vpop.permute.xlu1 %2242 }
0x3dd2   :  { %v5972_v27 = vadd.f32 %v2243_v26, %v2235_v24  ;;  %v3425_v26 = vld [vmem:[#allocation19] sm:$0xff] }
0x3dd4   :  { %4964 = vtanh.f32 %v5972_v27 }
0x3dde   :  { %v4965_v11 = vpop.eup %4964 }
0x3ddf   :  { %2248 = vrot.lane.b32.xlu1 %v4965_v11, %s5308_s3  ;;  %v3427_v11 = vld [vmem:[#allocation19 + $0x10] sm:$0xff] }
0x3de0   :  { %v6002_v47 = vpack.c.bf16 %v3427_v11, %v3425_v26 }
0x3de3   :  { %3073 = vrot.lane.b32.xlu1 %v3067_v20, %s5308_s3 }
0x3de7   :  { %2611 = vrot.lane.b32.xlu1 %v5887_v9, %s5308_s3 }
0x3e2c   :  { %v3259_v57 = vpop.f32.mrb[28].mxu1 }
0x3e2d   :  { %v3268_v63 = vadd.f32 %v3266_v50, %v3259_v57  ;;  %v3261_v35 = vpop.f32.mrb[29].mxu1  ;;  %v3432_v57 = vld [vmem:[#allocation19 + $0x38] sm:$0xff] }
0x3e2e   :  { %v3273_v33 = vadd.f32 %v3271_v61, %v3261_v35  ;;  %v3322_v61 = vld [vmem:[#allocation17 + $0x60] sm:$0xff]  ;;  %v6006_v35 = vpack.c.bf16 %v3432_v57, %v3430_v60 }
0x3e30   :  { %v3274_v1 = vsel %vm366_vm1, %v3268_v63, %v3273_v33  ;;  %v3324_v63 = vld [vmem:[#allocation17 + $0x70] sm:$0xff] }
0x3e31   :  { %4966 = vtanh.f32 %v3274_v1  ;;  %v4448_v20 = vmul.f32 -1.442695, %v3274_v1  ;;  %v4697_v33 = vpack.c.bf16 %v3324_v63, %v3322_v61  ;;  %v3429_v1 = vld [vmem:[#allocation19 + $0x20] sm:$0xff] }
0x3e33   :  { %4968 = vpow2.f32 %v4448_v20 }
0x3e3b   :  { %v4967_v2 = vpop.eup %4966 }
0x3e3c   :  { %3284 = vrot.lane.b32.xlu0 %v4967_v2, %s5308_s3  ;;  %v3431_v2 = vld [vmem:[#allocation19 + $0x30] sm:$0xff] }
0x3e3d   :  { %v4969_v54 = vpop.eup %4968 }
0x3e3e   :  { %v3278_v8 = vadd.f32 1.0, %v4969_v54 }
0x3e40   :  { %4970 = vrcp.f32 %v3278_v8 }
0x3e4a   :  { %v5986_v10 = vpop.eup %4970 }
0x3e4b   :  { %v3282_v22 = vmul.f32 %v5986_v10, %v3175_v40  ;;  %v3316_v40 = vld [vmem:[#allocation17 + $0x30] sm:$0xff] }
0x3e4c   :  { %v4689_v12 = vpack.c.bf16 %v3316_v40, %v3314_v42 }
0x3e4e   :  { %4690 = vmatpush1.bf16.msra.mxu0 %v4689_v12 }
0x3e51   :  { %v5981_v3 = vpop.permute.xlu1 %2248 }
0x3e55   :  { %v3074_v55 = vpop.permute.xlu1 %3073 }
0x3e56   :  { %3076 = vst.msk [vmem:[#allocation3 + $0x2] sm:$0xc] %vm401_vm4, %v3074_v55  ;;  %v6008_v55 = vpack.c.bf16 %v3431_v2, %v3429_v1 }
0x3e59   :  { %v2612_v9 = vpop.permute.xlu1 %2611 }
0x3e5a   :  { %2614 = vst.msk [vmem:[#allocation3 + $0xa] sm:$0xc] %vm401_vm4, %v2612_v9 }
0x3e5b   :  { %3186 = vst.msk [vmem:[#allocation3 + $0xc] sm:$0x3] %vm396_vm2, %v3184_v52  ;;  %v3428_v52 = vld [vmem:[#allocation19 + $0x18] sm:$0xff] }
0x3e5c   :  { %v6000_v24 = vpack.c.bf16 %v3428_v52, %v3426_v43 }
0x3e5e   :  { %4700 = vmatprep.subr.bf16.mxu1 %v6000_v24 }
0x3e5f   :  { %4702 = vmatpush1.bf16.msra.mxu1 %v6002_v47 }
0x3e60   :  { %4704 = vmatprep.subr.bf16.mxu1 %v6006_v35 }
0x3e63   :  { %4706 = vmatpush1.bf16.msra.mxu1 %v6008_v55 }
0x3e64   :  { %4708 = vmatprep.subr.bf16.mxu1 %v6000_v24 }
0x3eae   :  { %v3285_v15 = vpop.permute.xlu0 %3284 }
0x3eaf   :  { %v3287_v21 = vmul.f32 %v5986_v10, %v3285_v15  ;;  %v6026_v15 = vmul.f32 %v5966_v53, %v5981_v3 }
0x3eb1   :  { %3289 = vrot.lane.b32.xlu0 %v3287_v21, %s5309_s24 }
0x3f23   :  { %v3290_v4 = vpop.permute.xlu0 %3289 }
0x3f24   :  { %v3292_v28 = vadd.f32 %v3290_v4, %v3282_v22 }
0x3f26   :  { %4972 = vtanh.f32 %v3292_v28 }
0x3f30   :  { %v4973_v29 = vpop.eup %4972 }
0x3f31   :  { %3295 = vrot.lane.b32.xlu0 %v4973_v29, %s5308_s3 }
0x3f35   :  { %2956 = vrot.lane.b32.xlu0 %v5931_v46, %s5308_s3  ;;  %v3319_v46 = vld [vmem:[#allocation17 + $0x48] sm:$0xff] }
0x3f36   :  { %v4691_v49 = vpack.c.bf16 %v3321_v48, %v3319_v46 }
0x3f38   :  { %4692 = vmatprep.subr.bf16.mxu0 %v4691_v49 }
0x3f39   :  { %3187 = vrot.lane.b32.xlu0 %v5958_v45, %s5308_s3  ;;  %v4693_v45 = vpack.c.bf16 %v3320_v59, %v3318_v58 }
0x3f3b   :  { %4694 = vmatpush1.bf16.msra.mxu0 %v4693_v45 }
0x3f3d   :  { %2494 = vrot.lane.b32.xlu0 %v5872_v44, %s5308_s3  ;;  %v3323_v44 = vld [vmem:[#allocation17 + $0x68] sm:$0xff] }
0x3f41   :  { %2725 = vrot.lane.b32.xlu0 %v5902_v16, %s5308_s3  ;;  %v3325_v16 = vld [vmem:[#allocation17 + $0x78] sm:$0xff] }
0x3f42   :  { %v4695_v50 = vpack.c.bf16 %v3325_v16, %v3323_v44 }
0x3f44   :  { %4696 = vmatprep.subr.bf16.mxu0 %v4695_v50 }
0x3f45   :  { %4698 = vmatpush1.bf16.msra.mxu0 %v4697_v33 }
0x3f46   :  { %4716 = vmatprep.subr.bf16.mxu0 %v6000_v24 }
0x3fa3   :  { %v3296_v9 = vpop.permute.xlu0 %3295 }
0x3fa4   :  { %v6014_v20 = vmul.f32 %v5986_v10, %v3296_v9 }
0x3fa6   :  { %3300 = vrot.lane.b32.xlu0 %v6014_v20, %s5309_s24  ;;  %3304 = vrot.lane.b32.xlu1 %v6014_v20, %s5308_s3 }
0x3fa7   :  { %v2957_v54 = vpop.permute.xlu0 %2956 }
0x3fa8   :  { %2959 = vst.msk [vmem:[#allocation3 + $0x4] sm:$0xc] %vm401_vm4, %v2957_v54 }
0x3faa   :  { %2842 = vrot.lane.b32.xlu1 %v5917_v7, %s5308_s3 }
0x3fab   :  { %v3188_v8 = vpop.permute.xlu0 %3187 }
0x3fac   :  { %3190 = vst.msk [vmem:[#allocation3] sm:$0xc] %vm401_vm4, %v3188_v8 }
0x3fae   :  { %2253 = vrot.lane.b32.xlu1 %v6026_v15, %s5309_s24 }
0x3faf   :  { %v2495_v10 = vpop.permute.xlu0 %2494 }
0x3fb0   :  { %2497 = vst.msk [vmem:[#allocation3 + $0xc] sm:$0xc] %vm401_vm4, %v2495_v10 }
0x3fb3   :  { %v2726_v21 = vpop.permute.xlu0 %2725 }
0x3fb4   :  { %2728 = vst.msk [vmem:[#allocation3 + $0x8] sm:$0xc] %vm401_vm4, %v2726_v21 }
0x3fb5   :  { %3072 = vst.msk [vmem:[#allocation3 + $0xa] sm:$0x3] %vm396_vm2, %v5948_v6 }
0x4018   :  { %v3301_v7 = vpop.permute.xlu0 %3300  ;;  %v3305_v22 = vpop.permute.xlu1 %3304 }
0x4019   :  { %3303 = vst.msk [vmem:[#allocation3 + $0xe] sm:$0x3] %vm396_vm2, %v3301_v7 }
0x401a   :  { %3307 = vst.msk [vmem:[#allocation3 - $0x2] sm:$0xc] %vm401_vm4, %v3305_v22 }
0x401c   :  { %v2843_v53 = vpop.permute.xlu1 %2842 }
0x401d   :  { %2845 = vst.msk [vmem:[#allocation3 + $0x6] sm:$0xc] %vm401_vm4, %v2843_v53 }
0x401e   :  { %2955 = vst.msk [vmem:[#allocation3 + $0x8] sm:$0x3] %vm396_vm2, %v5935_v19  ;;  %v3326_v19 = vld [vmem:[%s6231_s12] sm:$0x3]  ;;  %s5310_s12 = smov 96  }
0x401f   :  { %v3331_v28 = vrot.slane %v3326_v19, %v5550_v23  ;;  %v3335_v29 = vrot.slane %v3326_v19, %v5555_v25 }
0x4020   :  { %v6040_v3 = vpop.permute.xlu1 %2253 }
0x4021   :  { %v3308_v4 = vld [vmem:[#allocation3] sm:$0xff]  ;;  %4451 = vmatmul.mubr.msk.f32.vlgmr.msra.gmra.mrb[30].mxu1 %vm284_vm3, %v6040_v3 }
0x4022   :  { %4449 = vmatmul.mubr.msk.f32.vlgmr.msra.gmra.mrb[30].mxu0 %vm1243_vm5, %v3308_v4  ;;  %4710 = vmatpush1.bf16.msra.mxu1 %v6002_v47 }
0x4023   :  { %3414 = vmatprep.mubr.f32.mxu0 %v5307_v0  ;;  %4712 = vmatprep.subr.bf16.mxu1 %v6006_v35 }
0x4024   :  { %3613 = vmatprep.mubr.f32.mxu1 %v5307_v0  ;;  %4718 = vmatpush1.bf16.msra.mxu0 %v6002_v47 }
0x4025   :  { %v3309_v6 = vld [vmem:[#allocation3 + $0x8] sm:$0xff]  ;;  %4720 = vmatprep.subr.bf16.mxu0 %v6006_v35 }
0x4026   :  { %4450 = vmatmul.mubr.msk.f32.gmra.mrb[32].mxu0 %vm1243_vm5, %v3309_v6  ;;  %4714 = vmatpush1.bf16.msra.mxu1 %v6008_v55 }
0x4027   :  { %3730 = vmatprep.mubr.f32.mxu0 %v5307_v0  ;;  %4724 = vmatprep.subr.bf16.mxu1 %v6000_v24 }
0x4028   :  { %4722 = vmatpush1.bf16.msra.mxu0 %v6008_v55 }
0x4029   :  { %4732 = vmatprep.subr.bf16.mxu0 %v6000_v24 }
0x40f4   :  { %v3501_v30 = vpop.f32.mrb[30].mxu1 }
0x40f5   :  { %v3410_v18 = vpop.f32.mrb[30].mxu0  ;;  %v3503_v36 = vpop.f32.mrb[31].mxu1 }
0x40f6   :  { %v3411_v31 = vadd.f32 %v3410_v18, %v3331_v28  ;;  %v3412_v32 = vpop.f32.mrb[31].mxu0 }
0x40f7   :  { %v3413_v37 = vadd.f32 %v3412_v32, %v3335_v29 }
0x40f8   :  { %3421 = vst [vmem:[#allocation2] sm:$0xff] %v3411_v31 }
0x40f9   :  { %3422 = vst [vmem:[#allocation2 + $0x8] sm:$0xff] %v3413_v37  ;;  %v3416_v38 = vpop.f32.mrb[32].mxu0 }
0x40fa   :  { %v3417_v39 = vadd.f32 %v3416_v38, %v3331_v28  ;;  %v3418_v41 = vpop.f32.mrb[33].mxu0 }
0x40fb   :  { %v3419_v42 = vadd.f32 %v3418_v41, %v3335_v29 }
0x40fc   :  { %3423 = vst [vmem:[#allocation2 + $0x10] sm:$0xff] %v3417_v39 }
0x40fd   :  { %3424 = vst [vmem:[#allocation2 + $0x18] sm:$0xff] %v3419_v42 }
0x40ff   :  { %v3506_v40 = vld [vmem:[#allocation2] sm:$0x3]  ;;  %v3737_v37 = vld [vmem:[#allocation2] sm:$0x30] }
0x4100   :  { %v3507_v23 = vadd.f32 %v3506_v40, %v3501_v30  ;;  %v3739_v38 = vrot.slane %v3737_v37, 4 }
0x4103   :  { %v3968_v37 = vld [vmem:[#allocation2 + $0x10] sm:$0x3] }
0x4104   :  { %v3508_v12 = vld [vmem:[#allocation2 + $0x18] sm:$0xc0]  ;;  %v3625_v63 = vld [vmem:[#allocation2 + $0x18] sm:$0x30]  ;;  %v3742_v40 = vld [vmem:[#allocation2 + $0x18] sm:$0xc] }
0x4105   :  { %v3510_v46 = vrot.slane %v3508_v12, 4  ;;  %v3627_v2 = vrot.slane %v3625_v63, 2 }
0x4107   :  { %v3512_v48 = vadd.f32 %v3510_v46, %v3503_v36 }
0x4109   :  { %v3513_v25 = vsel %vm366_vm1, %v3507_v23, %v3512_v48 }
0x410a   :  { %4974 = vtanh.f32 %v3513_v25  ;;  %v4452_v49 = vmul.f32 -1.442695, %v3513_v25 }
0x410c   :  { %4976 = vpow2.f32 %v4452_v49 }
0x4114   :  { %v4975_v43 = vpop.eup %4974 }
0x4115   :  { %3523 = vrot.lane.b32.xlu0 %v4975_v43, %s5308_s3 }
0x4116   :  { %v4977_v52 = vpop.eup %4976 }
0x4117   :  { %v3517_v58 = vadd.f32 1.0, %v4977_v52 }
0x4119   :  { %4978 = vrcp.f32 %v3517_v58 }
0x4123   :  { %v4979_v59 = vpop.eup %4978 }
0x4124   :  { %v3521_v11 = vmul.f32 %v4979_v59, %v5972_v27  ;;  %v3620_v27 = vld [vmem:[#allocation2] sm:$0xc] }
0x4125   :  { %v3622_v33 = vrot.slane %v3620_v27, 2 }
0x4187   :  { %v3524_v45 = vpop.permute.xlu0 %3523 }
0x4188   :  { %v3526_v26 = vmul.f32 %v4979_v59, %v3524_v45 }
0x418a   :  { %3528 = vrot.lane.b32.xlu1 %v3526_v26, %s5309_s24 }
0x41fc   :  { %v3529_v44 = vpop.permute.xlu1 %3528 }
0x41fd   :  { %v3531_v16 = vadd.f32 %v3529_v44, %v3521_v11 }
0x41ff   :  { %4980 = vtanh.f32 %v3531_v16 }
0x4209   :  { %v4981_v60 = vpop.eup %4980 }
0x420a   :  { %3534 = vrot.lane.b32.xlu0 %v4981_v60, %s5308_s3 }
0x427c   :  { %v3535_v50 = vpop.permute.xlu0 %3534 }
0x427d   :  { %v6067_v57 = vmul.f32 %v4979_v59, %v3535_v50  ;;  %v3851_v50 = vld [vmem:[#allocation2] sm:$0xc0] }
0x427e   :  { %v3853_v27 = vrot.slane %v3851_v50, 6  ;;  %v4087_v50 = vld [vmem:[#allocation2 + $0x8] sm:$0x30] }
0x427f   :  { %3539 = vrot.lane.b32.xlu1 %v6067_v57, %s5309_s24 }
0x42f1   :  { %v3540_v61 = vpop.permute.xlu1 %3539 }
0x42f2   :  { %4453 = vmatmul.mubr.msk.f32.vlgmr.msra.gmra.mrb[32].mxu1 %vm284_vm3, %v3540_v61  ;;  %v3856_v61 = vld [vmem:[#allocation2 + $0x18] sm:$0x3] }
0x42f3   :  { %4726 = vmatpush1.bf16.msra.mxu1 %v6002_v47  ;;  %3844 = vmatprep.mubr.f32.mxu1 %v5307_v0 }
0x42f4   :  { %4728 = vmatprep.subr.bf16.mxu1 %v6006_v35 }
0x42f7   :  { %4730 = vmatpush1.bf16.msra.mxu1 %v6008_v55 }
0x42f8   :  { %4740 = vmatprep.subr.bf16.mxu1 %v6000_v24 }
0x43c5   :  { %v3615_v1 = vpop.f32.mrb[32].mxu1 }
0x43c6   :  { %v3624_v9 = vadd.f32 %v3622_v33, %v3615_v1  ;;  %v3617_v54 = vpop.f32.mrb[33].mxu1  ;;  %v3858_v33 = vrot.slane %v3856_v61, 6 }
0x43c7   :  { %v3629_v8 = vadd.f32 %v3627_v2, %v3617_v54 }
0x43c9   :  { %v3630_v10 = vsel %vm366_vm1, %v3624_v9, %v3629_v8 }
0x43ca   :  { %4982 = vtanh.f32 %v3630_v10  ;;  %v4454_v7 = vmul.f32 -1.442695, %v3630_v10 }
0x43cc   :  { %4984 = vpow2.f32 %v4454_v7 }
0x43d4   :  { %v4983_v21 = vpop.eup %4982 }
0x43d5   :  { %3640 = vrot.lane.b32.xlu0 %v4983_v21, %s5308_s3 }
0x43d6   :  { %v4985_v22 = vpop.eup %4984 }
0x43d7   :  { %v3634_v53 = vadd.f32 1.0, %v4985_v22 }
0x43d9   :  { %4986 = vrcp.f32 %v3634_v53 }
0x43e3   :  { %v4987_v4 = vpop.eup %4986 }
0x43e4   :  { %v3638_v28 = vmul.f32 %v4987_v4, %v3531_v16 }
0x4447   :  { %v3641_v6 = vpop.permute.xlu0 %3640 }
0x4448   :  { %v3643_v19 = vmul.f32 %v4987_v4, %v3641_v6 }
0x444a   :  { %3645 = vrot.lane.b32.xlu1 %v3643_v19, %s5309_s24 }
0x44bc   :  { %v3646_v29 = vpop.permute.xlu1 %3645 }
0x44bd   :  { %v3648_v18 = vadd.f32 %v3646_v29, %v3638_v28 }
0x44bf   :  { %4988 = vtanh.f32 %v3648_v18 }
0x44c9   :  { %v4989_v30 = vpop.eup %4988 }
0x44ca   :  { %3651 = vrot.lane.b32.xlu0 %v4989_v30, %s5308_s3 }
0x453c   :  { %v3652_v31 = vpop.permute.xlu0 %3651 }
0x453d   :  { %v6081_v32 = vmul.f32 %v4987_v4, %v3652_v31  ;;  %v3970_v31 = vld [vmem:[#allocation2 + $0x8] sm:$0xc0] }
0x453f   :  { %3656 = vrot.lane.b32.xlu1 %v6081_v32, %s5309_s24 }
0x45b1   :  { %v3657_v36 = vpop.permute.xlu1 %3656 }
0x45b2   :  { %4455 = vmatmul.mubr.msk.f32.vlgmr.msra.gmra.mrb[34].mxu0 %vm284_vm3, %v3657_v36 }
0x45b3   :  { %4734 = vmatpush1.bf16.msra.mxu0 %v6002_v47  ;;  %3961 = vmatprep.mubr.f32.mxu0 %v5307_v0 }
0x45b4   :  { %4736 = vmatprep.subr.bf16.mxu0 %v6006_v35 }
0x45b7   :  { %4738 = vmatpush1.bf16.msra.mxu0 %v6008_v55 }
0x45b8   :  { %4748 = vmatprep.subr.bf16.mxu0 %v6000_v24 }
0x4685   :  { %v3732_v39 = vpop.f32.mrb[34].mxu0 }
0x4686   :  { %v3741_v41 = vadd.f32 %v3739_v38, %v3732_v39  ;;  %v3734_v42 = vpop.f32.mrb[35].mxu0  ;;  %v3972_v38 = vrot.slane %v3970_v31, 4 }
0x4687   :  { %v3743_v12 = vadd.f32 %v3742_v40, %v3734_v42 }
0x4689   :  { %v3744_v46 = vsel %vm366_vm1, %v3741_v41, %v3743_v12 }
0x468a   :  { %4990 = vtanh.f32 %v3744_v46  ;;  %v4456_v48 = vmul.f32 -1.442695, %v3744_v46 }
0x468c   :  { %4992 = vpow2.f32 %v4456_v48 }
0x4694   :  { %v4991_v23 = vpop.eup %4990 }
0x4695   :  { %3754 = vrot.lane.b32.xlu0 %v4991_v23, %s5308_s3 }
0x4696   :  { %v4993_v25 = vpop.eup %4992 }
0x4697   :  { %v3748_v43 = vadd.f32 1.0, %v4993_v25 }
0x4699   :  { %4994 = vrcp.f32 %v3748_v43 }
0x46a3   :  { %v4995_v49 = vpop.eup %4994 }
0x46a4   :  { %v3752_v59 = vmul.f32 %v4995_v49, %v3648_v18 }
0x4707   :  { %v3755_v52 = vpop.permute.xlu0 %3754 }
0x4708   :  { %v3757_v58 = vmul.f32 %v4995_v49, %v3755_v52 }
0x470a   :  { %3759 = vrot.lane.b32.xlu1 %v3757_v58, %s5309_s24 }
0x477c   :  { %v3760_v45 = vpop.permute.xlu1 %3759 }
0x477d   :  { %v3762_v26 = vadd.f32 %v3760_v45, %v3752_v59 }
0x477f   :  { %4996 = vtanh.f32 %v3762_v26 }
0x4789   :  { %v4997_v11 = vpop.eup %4996 }
0x478a   :  { %3765 = vrot.lane.b32.xlu0 %v4997_v11, %s5308_s3 }
0x47fc   :  { %v3766_v44 = vpop.permute.xlu0 %3765 }
0x47fd   :  { %v6095_v16 = vmul.f32 %v4995_v49, %v3766_v44 }
0x47ff   :  { %3770 = vrot.lane.b32.xlu1 %v6095_v16, %s5309_s24 }
0x4871   :  { %v3771_v60 = vpop.permute.xlu1 %3770 }
0x4872   :  { %4457 = vmatmul.mubr.msk.f32.vlgmr.msra.gmra.mrb[34].mxu1 %vm284_vm3, %v3771_v60  ;;  %v4082_v60 = vld [vmem:[#allocation2 + $0x10] sm:$0xc] }
0x4873   :  { %4742 = vmatpush1.bf16.msra.mxu1 %v6002_v47  ;;  %4075 = vmatprep.mubr.f32.mxu1 %v5307_v0  ;;  %v4084_v61 = vrot.slane %v4082_v60, 2 }
0x4874   :  { %4744 = vmatprep.subr.bf16.mxu1 %v6006_v35 }
0x4877   :  { %4746 = vmatpush1.bf16.msra.mxu1 %v6008_v55 }
0x4878   :  { %4756 = vmatprep.subr.bf16.mxu1 %v6000_v24 }
0x4945   :  { %v3846_v63 = vpop.f32.mrb[34].mxu1 }
0x4946   :  { %v3855_v1 = vadd.f32 %v3853_v27, %v3846_v63  ;;  %v3848_v2 = vpop.f32.mrb[35].mxu1  ;;  %v4089_v63 = vrot.slane %v4087_v50, 2 }
0x4947   :  { %v3860_v9 = vadd.f32 %v3858_v33, %v3848_v2 }
0x4949   :  { %v3861_v54 = vsel %vm366_vm1, %v3855_v1, %v3860_v9 }
0x494a   :  { %4998 = vtanh.f32 %v3861_v54  ;;  %v4458_v10 = vmul.f32 -1.442695, %v3861_v54 }
0x494c   :  { %5000 = vpow2.f32 %v4458_v10 }
0x4954   :  { %v4999_v8 = vpop.eup %4998 }
0x4955   :  { %3871 = vrot.lane.b32.xlu0 %v4999_v8, %s5308_s3 }
0x4956   :  { %v5001_v21 = vpop.eup %5000 }
0x4957   :  { %v3865_v7 = vadd.f32 1.0, %v5001_v21 }
0x4959   :  { %5002 = vrcp.f32 %v3865_v7 }
0x4963   :  { %v5003_v24 = vpop.eup %5002 }
0x4964   :  { %v3869_v4 = vmul.f32 %v5003_v24, %v3762_v26 }
0x49c7   :  { %v3872_v22 = vpop.permute.xlu0 %3871 }
0x49c8   :  { %v3874_v53 = vmul.f32 %v5003_v24, %v3872_v22 }
0x49ca   :  { %3876 = vrot.lane.b32.xlu1 %v3874_v53, %s5309_s24 }
0x4a3c   :  { %v3877_v6 = vpop.permute.xlu1 %3876 }
0x4a3d   :  { %v3879_v19 = vadd.f32 %v3877_v6, %v3869_v4 }
0x4a3f   :  { %5004 = vtanh.f32 %v3879_v19 }
0x4a49   :  { %v5005_v28 = vpop.eup %5004 }
0x4a4a   :  { %3882 = vrot.lane.b32.xlu0 %v5005_v28, %s5308_s3 }
0x4abc   :  { %v3883_v29 = vpop.permute.xlu0 %3882 }
0x4abd   :  { %v6109_v18 = vmul.f32 %v5003_v24, %v3883_v29 }
0x4abf   :  { %3887 = vrot.lane.b32.xlu1 %v6109_v18, %s5309_s24 }
0x4b31   :  { %v3888_v30 = vpop.permute.xlu1 %3887 }
0x4b32   :  { %4459 = vmatmul.mubr.msk.f32.vlgmr.msra.gmra.mrb[36].mxu0 %vm284_vm3, %v3888_v30 }
0x4b33   :  { %4750 = vmatpush1.bf16.msra.mxu0 %v6002_v47  ;;  %4192 = vmatprep.mubr.f32.mxu0 %v5307_v0 }
0x4b34   :  { %4752 = vmatprep.subr.bf16.mxu0 %v6006_v35 }
0x4b37   :  { %4754 = vmatpush1.bf16.msra.mxu0 %v6008_v55 }
0x4c05   :  { %v3963_v36 = vpop.f32.mrb[36].mxu0 }
0x4c06   :  { %v3969_v39 = vadd.f32 %v3968_v37, %v3963_v36  ;;  %v3965_v41 = vpop.f32.mrb[37].mxu0  ;;  %v4204_v36 = vld [vmem:[#allocation2 + $0x8] sm:$0xc] }
0x4c07   :  { %v3974_v42 = vadd.f32 %v3972_v38, %v3965_v41 }
0x4c09   :  { %v3975_v40 = vsel %vm366_vm1, %v3969_v39, %v3974_v42 }
0x4c0a   :  { %5006 = vtanh.f32 %v3975_v40  ;;  %v4460_v46 = vmul.f32 -1.442695, %v3975_v40 }
0x4c0c   :  { %5008 = vpow2.f32 %v4460_v46 }
0x4c14   :  { %v5007_v12 = vpop.eup %5006 }
0x4c15   :  { %3985 = vrot.lane.b32.xlu0 %v5007_v12, %s5308_s3 }
0x4c16   :  { %v5009_v23 = vpop.eup %5008 }
0x4c17   :  { %v3979_v48 = vadd.f32 1.0, %v5009_v23 }
0x4c19   :  { %5010 = vrcp.f32 %v3979_v48 }
0x4c23   :  { %v5011_v25 = vpop.eup %5010 }
0x4c24   :  { %v3983_v52 = vmul.f32 %v5011_v25, %v3879_v19  ;;  %v4199_v19 = vld [vmem:[#allocation2 + $0x10] sm:$0x30] }
0x4c25   :  { %v4201_v28 = vrot.slane %v4199_v19, 4 }
0x4c87   :  { %v3986_v43 = vpop.permute.xlu0 %3985 }
0x4c88   :  { %v3988_v49 = vmul.f32 %v5011_v25, %v3986_v43 }
0x4c8a   :  { %3990 = vrot.lane.b32.xlu1 %v3988_v49, %s5309_s24 }
0x4cfc   :  { %v3991_v58 = vpop.permute.xlu1 %3990 }
0x4cfd   :  { %v3993_v59 = vadd.f32 %v3991_v58, %v3983_v52 }
0x4cff   :  { %5012 = vtanh.f32 %v3993_v59 }
0x4d09   :  { %v5013_v45 = vpop.eup %5012 }
0x4d0a   :  { %3996 = vrot.lane.b32.xlu0 %v5013_v45, %s5308_s3  ;;  %v4313_v45 = vld [vmem:[#allocation2 + $0x10] sm:$0xc0] }
0x4d7c   :  { %v3997_v26 = vpop.permute.xlu0 %3996 }
0x4d7d   :  { %v6122_v11 = vmul.f32 %v5011_v25, %v3997_v26  ;;  %v4318_v26 = vld [vmem:[#allocation2 + $0x8] sm:$0x3] }
0x4d7e   :  { %v4320_v50 = vrot.slane %v4318_v26, 6 }
0x4d7f   :  { %4001 = vrot.lane.b32.xlu1 %v6122_v11, %s5309_s24 }
0x4df1   :  { %v4002_v44 = vpop.permute.xlu1 %4001 }
0x4df2   :  { %4461 = vmatmul.mubr.msk.f32.vlgmr.msra.gmra.mrb[36].mxu1 %vm284_vm3, %v4002_v44  ;;  %v4315_v44 = vrot.slane %v4313_v45, 6 }
0x4df3   :  { %4758 = vmatpush1.bf16.msra.mxu1 %v6002_v47  ;;  %4306 = vmatprep.mubr.f32.mxu1 %v5307_v0 }
0x4df4   :  { %4760 = vmatprep.subr.bf16.mxu1 %v6006_v35 }
0x4df7   :  { %4762 = vmatpush1.bf16.msra.mxu1 %v6008_v55 }
0x4ec5   :  { %v4077_v27 = vpop.f32.mrb[36].mxu1 }
0x4ec6   :  { %v4086_v33 = vadd.f32 %v4084_v61, %v4077_v27  ;;  %v4079_v1 = vpop.f32.mrb[37].mxu1 }
0x4ec7   :  { %v4091_v2 = vadd.f32 %v4089_v63, %v4079_v1 }
0x4ec9   :  { %v4092_v9 = vsel %vm366_vm1, %v4086_v33, %v4091_v2 }
0x4eca   :  { %5014 = vtanh.f32 %v4092_v9  ;;  %v4462_v47 = vmul.f32 -1.442695, %v4092_v9 }
0x4ecc   :  { %5016 = vpow2.f32 %v4462_v47 }
0x4ed4   :  { %v5015_v54 = vpop.eup %5014 }
0x4ed5   :  { %4102 = vrot.lane.b32.xlu0 %v5015_v54, %s5308_s3 }
0x4ed6   :  { %v5017_v0 = vpop.eup %5016 }
0x4ed7   :  { %v4096_v35 = vadd.f32 1.0, %v5017_v0 }
0x4ed9   :  { %5018 = vrcp.f32 %v4096_v35 }
0x4ee3   :  { %v5019_v55 = vpop.eup %5018 }
0x4ee4   :  { %v4100_v21 = vmul.f32 %v5019_v55, %v3993_v59 }
0x4f47   :  { %v4103_v8 = vpop.permute.xlu0 %4102 }
0x4f48   :  { %v4105_v10 = vmul.f32 %v5019_v55, %v4103_v8 }
0x4f4a   :  { %4107 = vrot.lane.b32.xlu1 %v4105_v10, %s5309_s24 }
0x4fbc   :  { %v4108_v7 = vpop.permute.xlu1 %4107 }
0x4fbd   :  { %v4110_v24 = vadd.f32 %v4108_v7, %v4100_v21 }
0x4fbf   :  { %5020 = vtanh.f32 %v4110_v24 }
0x4fc9   :  { %v5021_v22 = vpop.eup %5020 }
0x4fca   :  { %4113 = vrot.lane.b32.xlu0 %v5021_v22, %s5308_s3 }
0x503c   :  { %v4114_v53 = vpop.permute.xlu0 %4113 }
0x503d   :  { %v6135_v4 = vmul.f32 %v5019_v55, %v4114_v53 }
0x503f   :  { %4118 = vrot.lane.b32.xlu1 %v6135_v4, %s5309_s24 }
0x50b1   :  { %v4119_v6 = vpop.permute.xlu1 %4118 }
0x50b2   :  { %4463 = vmatmul.mubr.msk.f32.vlgmr.msra.gmra.mrb[38].mxu0 %vm284_vm3, %v4119_v6 }
0x5185   :  { %v4194_v29 = vpop.f32.mrb[38].mxu0 }
0x5186   :  { %v4203_v30 = vadd.f32 %v4201_v28, %v4194_v29  ;;  %v4196_v31 = vpop.f32.mrb[39].mxu0 }
0x5187   :  { %v4205_v37 = vadd.f32 %v4204_v36, %v4196_v31 }
0x5189   :  { %v4206_v38 = vsel %vm366_vm1, %v4203_v30, %v4205_v37 }
0x518a   :  { %5022 = vtanh.f32 %v4206_v38  ;;  %v4464_v41 = vmul.f32 -1.442695, %v4206_v38 }
0x518c   :  { %5024 = vpow2.f32 %v4464_v41 }
0x5194   :  { %v5023_v39 = vpop.eup %5022 }
0x5195   :  { %4216 = vrot.lane.b32.xlu0 %v5023_v39, %s5308_s3 }
0x5196   :  { %v5025_v42 = vpop.eup %5024 }
0x5197   :  { %v4210_v40 = vadd.f32 1.0, %v5025_v42 }
0x5199   :  { %5026 = vrcp.f32 %v4210_v40 }
0x51a3   :  { %v5027_v12 = vpop.eup %5026 }
0x51a4   :  { %v4214_v48 = vmul.f32 %v5027_v12, %v4110_v24 }
0x5207   :  { %v4217_v46 = vpop.permute.xlu0 %4216 }
0x5208   :  { %v4219_v23 = vmul.f32 %v5027_v12, %v4217_v46 }
0x520a   :  { %4221 = vrot.lane.b32.xlu1 %v4219_v23, %s5309_s24 }
0x527c   :  { %v4222_v25 = vpop.permute.xlu1 %4221 }
0x527d   :  { %v4224_v43 = vadd.f32 %v4222_v25, %v4214_v48 }
0x527f   :  { %5028 = vtanh.f32 %v4224_v43 }
0x5289   :  { %v5029_v49 = vpop.eup %5028 }
0x528a   :  { %4227 = vrot.lane.b32.xlu0 %v5029_v49, %s5308_s3 }
0x52fc   :  { %v4228_v52 = vpop.permute.xlu0 %4227 }
0x52fd   :  { %v4230_v58 = vmul.f32 %v5027_v12, %v4228_v52 }
0x52ff   :  { %4232 = vrot.lane.b32.xlu1 %v4230_v58, %s5309_s24 }
0x5371   :  { %v4233_v59 = vpop.permute.xlu1 %4232 }
0x5372   :  { %4465 = vmatmul.mubr.msk.f32.vlgmr.msra.gmra.mrb[38].mxu1 %vm284_vm3, %v4233_v59 }
0x5445   :  { %v4308_v60 = vpop.f32.mrb[38].mxu1 }
0x5446   :  { %v4317_v61 = vadd.f32 %v4315_v44, %v4308_v60  ;;  %v4310_v27 = vpop.f32.mrb[39].mxu1 }
0x5447   :  { %v4322_v63 = vadd.f32 %v4320_v50, %v4310_v27 }
0x5449   :  { %v4323_v33 = vsel %vm366_vm1, %v4317_v61, %v4322_v63 }
0x544a   :  { %5030 = vtanh.f32 %v4323_v33  ;;  %v4466_v2 = vmul.f32 -1.442695, %v4323_v33 }
0x544c   :  { %5032 = vpow2.f32 %v4466_v2 }
0x5454   :  { %v5031_v1 = vpop.eup %5030 }
0x5455   :  { %4333 = vrot.lane.b32.xlu0 %v5031_v1, %s5308_s3 }
0x5456   :  { %v5033_v9 = vpop.eup %5032 }
0x5457   :  { %v4327_v54 = vadd.f32 1.0, %v5033_v9 }
0x5459   :  { %5034 = vrcp.f32 %v4327_v54 }
0x5463   :  { %v5035_v47 = vpop.eup %5034 }
0x5464   :  { %v4331_v55 = vmul.f32 %v5035_v47, %v4224_v43 }
0x54c7   :  { %v4334_v0 = vpop.permute.xlu0 %4333 }
0x54c8   :  { %v4336_v35 = vmul.f32 %v5035_v47, %v4334_v0 }
0x54ca   :  { %4338 = vrot.lane.b32.xlu1 %v4336_v35, %s5309_s24 }
0x54ce   :  { %1447 = vrot.lane.b32.xlu1 %v5743_v62, %s5308_s3 }
0x54d2   :  { %1678 = vrot.lane.b32.xlu1 %v5771_v51, %s5308_s3 }
0x54d6   :  { %1909 = vrot.lane.b32.xlu1 %v5798_v56, %s5308_s3 }
0x54da   :  { %2140 = vrot.lane.b32.xlu1 %v5842_v13, %s5308_s3 }
0x54de   :  { %2264 = vrot.lane.b32.xlu1 %v5690_v14, %s5310_s12 }
0x54e2   :  { %3660 = vrot.lane.b32.xlu1 %v6081_v32, %s5308_s3 }
0x553c   :  { %v4339_v8 = vpop.permute.xlu1 %4338 }
0x553d   :  { %v4341_v10 = vadd.f32 %v4339_v8, %v4331_v55 }
0x553f   :  { %5036 = vtanh.f32 %v4341_v10 }
0x5540   :  { %v1448_v62 = vpop.permute.xlu1 %1447 }
0x5541   :  { %1450 = vst.msk [vmem:[#allocation4 + $0xc] sm:$0xc] %vm401_vm4, %v1448_v62 }
0x5542   :  { %2256 = vst.msk [vmem:[#allocation4 + $0xe] sm:$0x3] %vm396_vm2, %v6040_v3 }
0x5544   :  { %v1679_v51 = vpop.permute.xlu1 %1678 }
0x5548   :  { %v1910_v56 = vpop.permute.xlu1 %1909 }
0x5549   :  { %v5037_v13 = vpop.eup %5036  ;;  %v2261_v21 = vld [vmem:[#allocation4 + $0xe] sm:$0x3] }
0x554a   :  { %4344 = vrot.lane.b32.xlu0 %v5037_v13, %s5308_s3  ;;  %2263 = vst.msk [vmem:[#allocation20] sm:$0x3] %vm2262_vm6, %v2261_v21 }
0x554c   :  { %v2141_v14 = vpop.permute.xlu1 %2140 }
0x554e   :  { %3543 = vrot.lane.b32.xlu0 %v6067_v57, %s5308_s3 }
0x5550   :  { %v2265_v32 = vpop.permute.xlu1 %2264 }
0x5551   :  { %2268 = vst.msk [vmem:[#allocation20] sm:$0x3] %vm2267_vm7, %v2265_v32 }
0x5552   :  { %1564 = vrot.lane.b32.xlu0 %v5757_v34, %s5308_s3  ;;  %2270 = vst.msk [vmem:[#allocation20 - $0x2] sm:$0xc] %vm2269_vm8, %v6026_v15 }
0x5556   :  { %1795 = vrot.lane.b32.xlu0 %v5785_v17, %s5308_s3 }
0x555a   :  { %2026 = vrot.lane.b32.xlu0 %v5811_v5, %s5308_s3 }
0x555e   :  { %2257 = vrot.lane.b32.xlu0 %v6026_v15, %s5308_s3 }
0x5562   :  { %4359 = vrot.lane.b32.xlu0 %v6014_v20, %s5310_s12 }
0x5566   :  { %3774 = vrot.lane.b32.xlu0 %v6095_v16, %s5308_s3 }
0x556a   :  { %4005 = vrot.lane.b32.xlu0 %v6122_v11, %s5308_s3 }
0x556e   :  { %4236 = vrot.lane.b32.xlu0 %v4230_v58, %s5308_s3 }
0x55bc   :  { %v4345_v34 = vpop.permute.xlu0 %4344 }
0x55bd   :  { %v4347_v3 = vmul.f32 %v5035_v47, %v4345_v34 }
0x55bf   :  { %4349 = vrot.lane.b32.xlu1 %v4347_v3, %s5309_s24 }
0x55c0   :  { %v3544_v17 = vpop.permute.xlu0 %3543 }
0x55c1   :  { %3546 = vst.msk [vmem:[#allocation4 + $0xc] sm:$0xc] %vm401_vm4, %v3544_v17 }
0x55c2   :  { %5247 = shalt.err (!%p5244_p6)
}
0x55c3   :  { %s5248_s5 = scalar_lea.hbm %s6232_s13, 32 }
0x55c4   :  { %p5249_p7 = scmp.ne.s32.totalorder %s6232_s13, %s5248_s5  ;;  %p5252_p8 = scmp.lt.u32.totalorder %s5248_s5, %s6232_s13 }
0x55c6   :  { %p5254_p9 = pnand %p5252_p8, %p5249_p7 }
0x55c8   :  { %5257 = shalt.err (!%p5254_p9)
}
0x55c9   :  { %4373 = dma.vmem_to_hbm [thread:$0]  %s4371_s30, 32, %s6232_s13, [#allocation7]   ;;  %3891 = vrot.lane.b32.xlu1 %v6109_v18, %s5308_s3  ;;  %v1565_v5 = vpop.permute.xlu0 %1564  ;;  %v3661_v20 = vpop.permute.xlu1 %3660 }
0x55ca   :  { %s5312_s13 = smov [#allocation21]  }
0x55cb   :  { %s4380_s19 = sshll.u32 %s5312_s13, 4  ;;  %s4381_s19 = int_to_ptr.vmem [resolvable:$true] %s4380_s19 }
0x55cc   :  { %s5258_s2 = scalar_lea.vmem %s4381_s19, 32  ;;  %p5263_p11 = scmp.lt.s32.totalorder %s4381_s19, %s4381_s19 }
0x55cd   :  { %4122 = vrot.lane.b32.xlu1 %v6135_v4, %s5308_s3  ;;  %v1796_v15 = vpop.permute.xlu0 %1795  ;;  %p5259_p10 = scmp.ne.s32.totalorder %s4381_s19, %s5258_s2  ;;  %p5264_p12 = scmp.lt.s32.totalorder %s5258_s2, %s5258_s2 }
0x55cf   :  { %p5265_p13 = por %p5264_p12, %p5263_p11 }
0x55d1   :  { %4353 = vrot.lane.b32.xlu1 %v4347_v3, %s5308_s3  ;;  %v2027_v57 = vpop.permute.xlu0 %2026  ;;  %p5266_p0 = pnand %p5265_p13, %p5259_p10 }
0x55d5   :  { %v2258_v16 = vpop.permute.xlu0 %2257 }
0x55d9   :  { %v4360_v11 = vpop.permute.xlu0 %4359 }
0x55dd   :  { %v3775_v7 = vpop.permute.xlu0 %3774 }
0x55e1   :  { %v4006_v24 = vpop.permute.xlu0 %4005 }
0x55e5   :  { %v4237_v22 = vpop.permute.xlu0 %4236 }
0x5631   :  { %v4350_v53 = vpop.permute.xlu1 %4349 }
0x5632   :  { %4352 = vst.msk [vmem:[#allocation4 + $0xe] sm:$0x3] %vm396_vm2, %v4350_v53 }
0x5639   :  { %v4357_v19 = vld [vmem:[#allocation4 + $0xe] sm:$0x3] }
0x563a   :  { %4358 = vst.msk [vmem:[#allocation21] sm:$0x3] %vm2262_vm6, %v4357_v19 }
0x563b   :  { %v3892_v6 = vpop.permute.xlu1 %3891  ;;  %4362 = vst.msk [vmem:[#allocation21] sm:$0x3] %vm2267_vm7, %v4360_v11 }
0x563c   :  { %4363 = vst.msk [vmem:[#allocation21 - $0x2] sm:$0xc] %vm2269_vm8, %v4347_v3 }
0x563f   :  { %v4123_v18 = vpop.permute.xlu1 %4122 }
0x5643   :  { %v4354_v4 = vpop.permute.xlu1 %4353 }
0x5644   :  { %5269 = shalt.err (!%p5266_p0)
}
0x5645   :  { %s5270_s8 = scalar_lea.hbm %s6233_s14, 32 }
0x5646   :  { %p5271_p1 = scmp.ne.s32.totalorder %s6233_s14, %s5270_s8  ;;  %p5274_p2 = scmp.lt.u32.totalorder %s5270_s8, %s6233_s14 }
0x5648   :  { %p5276_p3 = pnand %p5274_p2, %p5271_p1 }
0x564a   :  { %5279 = shalt.err (!%p5276_p3)
}
0x564b   :  { %4383 = dma.vmem_to_hbm [thread:$0]  %s4381_s19, 32, %s6233_s14, [#allocation22]  }
0x564c   :  { %5290 = dma.done.wait [#allocation7], 32  }
0x564d   :  { %5291 = vsyncadd [#allocation7], 4294967264 }
0x564e   :  { %5292 = dma.done.wait [#allocation22], 32  }
0x564f   :  { %5293 = vsyncadd [#allocation22], 4294967264 }
0x5650   :  { %4390 = vsyncpa [#allocation6], 1 }
0x5651   :  { %4391 = vsyncpa [#allocation9], 1 }
0x5652   :  { %4392 = vsyncpa [#allocation12], 1 }
0x5653   :  { %4393 = vsyncpa [#allocation15], 1 }
0x5654   :  { %4394 = vsyncpa [#allocation18], 1 }
0x5655   :  { %4395 = vsyncpa [#allocation7], 1 }
0x5656   :  { %4396 = vsyncpa [#allocation22], 1 }

</bundles_post_ra>
